<compile_context>
chip_gen: v5e
topology: v5e:2x2
jax: 0.10.0
libtpu: 0.0.40
codegen_flags: <defaults>
</compile_context>

<pallas_src>
import numpy as np
import jax
import jax.numpy as jnp
from jax import lax
from jax.experimental import pallas as pl
from jax.experimental.pallas import tpu as pltpu

# ----------------------------------------------------------------------------
# Fixed finite-difference conv stencils (identical construction to the
# reference, including the (0, 1, 3, 2) transpose).  Each output channel has a
# +1 at the center and a -1 at exactly one (possibly dilated) neighbor, so the
# whole conv reduces to shifted differences; extract the neighbor offsets once
# in numpy so the in-kernel directions provably match the reference kernels.
# ----------------------------------------------------------------------------
op10 = [[[[0, 0, 0], [0, 1, 0], [0, -1, 0]]]]
op11 = [[[[0, 0, 0], [0, 1, 0], [-1, 0, 0]]]]
op4 = [[[[0, 0, 0], [-1, 1, 0], [0, 0, 0]]]]
op5 = [[[[-1, 0, 0], [0, 1, 0], [0, 0, 0]]]]
op6 = [[[[0, -1, 0], [0, 1, 0], [0, 0, 0]]]]
op7 = [[[[0, 0, -1], [0, 1, 0], [0, 0, 0]]]]
op8 = [[[[0, 0, 0], [0, 1, -1], [0, 0, 0]]]]
op9 = [[[[0, 0, 0], [0, 1, 0], [0, 0, -1]]]]
cnnKernel1 = np.transpose(
    np.concatenate((op4, op5, op6, op7, op8, op9, op10, op11), axis=0), (0, 1, 3, 2)
).astype(np.float32)  # (8, 1, 3, 3)  cnn_1: 3x3, replicate pad 1

op0 = [[[[0, 0, 0], [-1, 1, 0], [0, 0, 0]]]]
op1 = [[[[0, -1, 0], [0, 1, 0], [0, 0, 0]]]]
op2 = [[[[0, 0, 0], [0, 1, -1], [0, 0, 0]]]]
op3 = [[[[0, 0, 0], [0, 1, 0], [0, -1, 0]]]]
cnnKernel2 = np.transpose(
    np.concatenate((op0, op1, op2, op3), axis=0), (0, 1, 3, 2)
).astype(np.float32)  # (4, 1, 3, 3)  cnn_2: 3x3, dilation 2, manual 2-wide pad


def _minus_tap_offsets(kern, dil):
    offs = []
    for c in range(kern.shape[0]):
        ky, kx = np.argwhere(kern[c, 0] == -1.0)[0]
        offs.append((int(dil * (ky - 1)), int(dil * (kx - 1))))
    return tuple(offs)


OFFSETS1 = _minus_tap_offsets(cnnKernel1, 1)  # 8 dilation-1 neighbor offsets
OFFSETS2 = _minus_tap_offsets(cnnKernel2, 2)  # 4 dilation-2 neighbor offsets


# ----------------------------------------------------------------------------
# Pallas kernel: whole clothNet forward for one batch element.
# ----------------------------------------------------------------------------
def cloth_kernel(params_ref, h_ref, out_ref):
    f32 = jnp.float32
    H = h_ref.shape[2]
    W = h_ref.shape[3]

    # ---- scalar / per-channel parameters (SMEM) ----
    cnnP = [params_ref[i] for i in range(12)]          # cnnP1 (8) ++ cnnP2 (4)
    alphas = [params_ref[12 + i] for i in range(12)]   # alpha1_*1e6 ++ alpha2_*1e6
    beta_ = params_ref[24]
    gamma_ = params_ref[25]
    delta = (params_ref[26], params_ref[27], params_ref[28])  # total = 12 * delta/12
    dt = params_ref[29]
    drag = params_ref[30]
    press = params_ref[31]
    radius = params_ref[32]
    bc = [params_ref[33 + i] for i in range(3)]
    pcoef = press * dt * drag      # pressure scaling folded into one scalar
    rad2 = radius * radius

    # ---- hoisted scalar -> vector broadcasts (JAX does not CSE broadcasts) ----
    beta_v = jnp.broadcast_to(beta_, (H, W))
    gamma_v = jnp.broadcast_to(gamma_, (H, W))
    dt_v = jnp.broadcast_to(dt, (H, W))
    drag_v = jnp.broadcast_to(drag, (H, W))

    # ---- boundary masks (computed once, reused by every shifted difference) ----
    row = lax.broadcasted_iota(jnp.int32, (H, W), 0)
    col = lax.broadcasted_iota(jnp.int32, (H, W), 1)
    top1, bot1 = row == 0, row == H - 1
    lft1, rgt1 = col == 0, col == W - 1
    top2, bot2 = row < 2, row >= H - 2
    lft2, rgt2 = col < 2, col >= W - 2

    # Replicate-clamped neighbor fetch: one XLU roll + one select per axis.
    def shift_rows(x, dy):   # y[i, j] = x[clip(i + dy), j],  dy in {-1, +1}
        r = pltpu.roll(x, (-dy) % H, axis=0)
        return jnp.where(top1 if dy < 0 else bot1, x, r)

    def shift_cols(x, dx):   # y[i, j] = x[i, clip(j + dx)],  dx in {-1, +1}
        r = pltpu.roll(x, (-dx) % W, axis=1)
        return jnp.where(lft1 if dx < 0 else rgt1, x, r)

    # Dilation-2 difference.  The reference pads with rows/cols [0:2] and [-2:],
    # which makes the difference exactly 0 on the two clamped edge rows/cols.
    def diff2(x, dy, dx):
        if dy != 0:
            d = x - pltpu.roll(x, (-dy) % H, axis=0)
            return jnp.where(top2 if dy < 0 else bot2, 0.0, d)
        d = x - pltpu.roll(x, (-dx) % W, axis=1)
        return jnp.where(lft2 if dx < 0 else rgt2, 0.0, d)

    # ---- load the six channel planes of this batch element ----
    planes = [h_ref[0, c, :, :] for c in range(6)]
    pos, vel = planes[0:3], planes[3:6]

    # Row-clamped copies reused by three directions each (axis + two diagonals).
    up1 = [shift_rows(p, -1) for p in planes]   # neighbor at row i-1
    dn1 = [shift_rows(p, +1) for p in planes]   # neighbor at row i+1

    def neighbor1(c, dy, dx):
        base = planes[c] if dy == 0 else (up1[c] if dy < 0 else dn1[c])
        return base if dx == 0 else shift_cols(base, dx)

    # ---- fused CNNBranch: per direction, diff -> ISRU -> accumulate ----
    fx = jnp.zeros((H, W), f32)
    fy = jnp.zeros((H, W), f32)
    fz = jnp.zeros((H, W), f32)

    def accumulate(d, k, fx, fy, fz):
        # d: the six unscaled (H, W) diffs (x, y, z, u, v, w) for direction k.
        p_v = jnp.broadcast_to(cnnP[k], (H, W))
        a_v = jnp.broadcast_to(alphas[k], (H, W))
        xs, ys, zs = d[0] * p_v, d[1] * p_v, d[2] * p_v
        us, vs, ws = d[3] * p_v, d[4] * p_v, d[5] * p_v
        inv = lax.rsqrt(xs * xs + ys * ys + zs * zs + 1e-9)   # ISRU (EUP slot)
        nx, ny, nz = xs * inv, ys * inv, zs * inv
        correl = us * nx + vs * ny + ws * nz
        s = gamma_v * correl + beta_v
        fx = fx + xs * a_v + nx * s
        fy = fy + ys * a_v + ny * s
        fz = fz + zs * a_v + nz * s
        return fx, fy, fz

    axis_pos_diffs = {}   # unscaled position diffs reused by the pressure term
    for k, (dy, dx) in enumerate(OFFSETS1):
        d = [planes[c] - neighbor1(c, dy, dx) for c in range(6)]
        if dy == 0 or dx == 0:
            axis_pos_diffs[(dy, dx)] = d[0:3]
        fx, fy, fz = accumulate(d, k, fx, fy, fz)
    for j, (dy, dx) in enumerate(OFFSETS2):
        d = [diff2(planes[c], dy, dx) for c in range(6)]
        fx, fy, fz = accumulate(d, 8 + j, fx, fy, fz)

    # delta adds hoisted out of the loop: 12 * (delta_k / 12) == delta_k.
    basicf = [(fx + delta[0]) * dt_v, (fy + delta[1]) * dt_v, (fz + delta[2]) * dt_v]

    # ---- pressure term (reuses the axis-aligned position diffs) ----
    d_im = axis_pos_diffs[(-1, 0)]   # xx - roll(i -> i-1)
    d_ip = axis_pos_diffs[(1, 0)]    # xx - roll(i -> i+1)
    d_jm = axis_pos_diffs[(0, -1)]   # xx - roll(j -> j-1)
    d_jp = axis_pos_diffs[(0, 1)]    # xx - roll(j -> j+1)

    def crossP(a, b):
        return [a[1] * b[2] - a[2] * b[1],
                a[2] * b[0] - a[0] * b[2],
                a[0] * b[1] - a[1] * b[0]]

    ca = crossP(d_im, d_jp)
    cb = crossP(d_jp, d_ip)
    cc = crossP(d_ip, d_jm)
    cd = crossP(d_jm, d_im)
    basicf = [basicf[k] + (ca[k] + cb[k] + cc[k] + cd[k]) * pcoef for k in range(3)]

    # ---- velocity update + sphere collision ----
    vout = [vel[k] * drag_v + basicf[k] for k in range(3)]

    rr = [pos[k] - bc[k] for k in range(3)]
    d2 = rr[0] * rr[0] + rr[1] * rr[1] + rr[2] * rr[2] + 1e-10
    inv_r = lax.rsqrt(d2)                        # no sqrt / divide on the VALU
    rrn = [rr[k] * inv_r for k in range(3)]
    flag1 = (d2 <= rad2).astype(f32)             # |r| <= radius  <=>  |r|^2 <= radius^2
    rv = vout[0] * rrn[0] + vout[1] * rrn[1] + vout[2] * rrn[2]
    flag2 = (rv < 0.0).astype(f32)
    ff = flag1 * flag2
    vout = [vout[k] - ff * rv * rrn[k] for k in range(3)]
    vout = [vout[k] * (1.0 - 0.05 * ff) for k in range(3)]

    for k in range(3):
        out_ref[0, k, :, :] = pos[k] + dt_v * vout[k]
        out_ref[0, 3 + k, :, :] = vout[k]


# ----------------------------------------------------------------------------
# Wrapper + deterministic parameter init (matches the module's __init__).
# ----------------------------------------------------------------------------
def make_params(dt_=0.04 / 128, pressure=0.0):
    p = np.zeros(40, np.float32)
    p[0:8] = 1.0              # cnnP1 = ones(8)
    p[8:12] = 1.0             # cnnP2 = ones(4)
    p[12:20] = -1.0 * 1e6     # alpha1 * 1e6
    p[20:24] = -1.0 * 1e6     # alpha2 * 1e6
    p[24] = 1.0 * 1e4         # beta * 1e4
    p[25] = -1.0 * 1e2        # gamma * 1e2
    p[26] = 1.0               # delta0 * 1
    p[27] = -1.0 * 10.0       # delta1 * 10
    p[28] = 1.0               # delta2 * 1
    p[29] = dt_               # dt
    p[30] = np.exp(-3 * dt_)  # drag
    p[31] = pressure          # press
    p[32] = 0.3               # ball radius
    p[33:36] = 0.0            # ball center
    return jnp.asarray(p)


@jax.jit
def cloth_net(h, params):
    B, C, H, W = h.shape
    return pl.pallas_call(
        cloth_kernel,
        out_shape=jax.ShapeDtypeStruct((B, 6, H, W), h.dtype),
        grid=(B,),
        in_specs=[
            pl.BlockSpec(memory_space=pltpu.MemorySpace.SMEM),      # params (scalars)
            pl.BlockSpec((1, 6, H, W), lambda b: (b, 0, 0, 0)),     # h
        ],
        out_specs=pl.BlockSpec((1, 6, H, W), lambda b: (b, 0, 0, 0)),
        # h's HBM buffer is reused for the output; donate h at the jit level
        # when chaining simulation steps to make this a true in-place update.
        input_output_aliases={1: 0},
        compiler_params=pltpu.CompilerParams(dimension_semantics=("parallel",)),
    )(params, h)


if __name__ == "__main__":
    key = jax.random.PRNGKey(0)
    B, C, H, W = 2, 6, 16, 128   # W multiple of 128 keeps stores lane-dense
    # positions (ch 0:3) and velocities (ch 3:6); some points fall inside the
    # collision sphere (radius 0.3) so the contact branch is exercised.
    h = jax.random.normal(key, (B, C, H, W), dtype=jnp.float32) * 0.2
    params = make_params(dt_=0.04 / 128, pressure=0.5)

    out = cloth_net(h, params)
    out = jax.block_until_ready(out)

    assert out.shape == (B, 6, H, W)
    assert bool(jnp.all(jnp.isfinite(out)))
    print("KERNEL_OK")
</pallas_src>

<mosaic_0001>
module attributes {stable_mosaic.version = 11 : i64} {
  func.func @cloth_kernel(%arg0: i32, %arg1: memref<40xf32, #tpu.memory_space<smem>>, %arg2: memref<1x6x16x128xf32, #tpu.memory_space<vmem>>, %arg3: memref<1x6x16x128xf32, #tpu.memory_space<vmem>>) attributes {dimension_semantics = [#tpu.dimension_semantics<parallel>], iteration_bounds = array<i64: 2>, scalar_prefetch = 0 : i64, scratch_operands = 0 : i64, tpu.core_type = #tpu.core_type<tc>, window_params = [{transform_indices = @transform_0, window_bounds = array<i64: 40>}, {transform_indices = @transform_1, window_bounds = array<i64: 1, 6, 16, 128>}, {transform_indices = @transform_2, window_bounds = array<i64: 1, 6, 16, 128>}]} {
    %c0 = arith.constant 0 : index
    %0 = memref.load %arg1[%c0] : memref<40xf32, #tpu.memory_space<smem>>
    %c1 = arith.constant 1 : index
    %1 = memref.load %arg1[%c1] : memref<40xf32, #tpu.memory_space<smem>>
    %c2 = arith.constant 2 : index
    %2 = memref.load %arg1[%c2] : memref<40xf32, #tpu.memory_space<smem>>
    %c3 = arith.constant 3 : index
    %3 = memref.load %arg1[%c3] : memref<40xf32, #tpu.memory_space<smem>>
    %c4 = arith.constant 4 : index
    %4 = memref.load %arg1[%c4] : memref<40xf32, #tpu.memory_space<smem>>
    %c5 = arith.constant 5 : index
    %5 = memref.load %arg1[%c5] : memref<40xf32, #tpu.memory_space<smem>>
    %c6 = arith.constant 6 : index
    %6 = memref.load %arg1[%c6] : memref<40xf32, #tpu.memory_space<smem>>
    %c7 = arith.constant 7 : index
    %7 = memref.load %arg1[%c7] : memref<40xf32, #tpu.memory_space<smem>>
    %c8 = arith.constant 8 : index
    %8 = memref.load %arg1[%c8] : memref<40xf32, #tpu.memory_space<smem>>
    %c9 = arith.constant 9 : index
    %9 = memref.load %arg1[%c9] : memref<40xf32, #tpu.memory_space<smem>>
    %c10 = arith.constant 10 : index
    %10 = memref.load %arg1[%c10] : memref<40xf32, #tpu.memory_space<smem>>
    %c11 = arith.constant 11 : index
    %11 = memref.load %arg1[%c11] : memref<40xf32, #tpu.memory_space<smem>>
    %c12 = arith.constant 12 : index
    %12 = memref.load %arg1[%c12] : memref<40xf32, #tpu.memory_space<smem>>
    %c13 = arith.constant 13 : index
    %13 = memref.load %arg1[%c13] : memref<40xf32, #tpu.memory_space<smem>>
    %c14 = arith.constant 14 : index
    %14 = memref.load %arg1[%c14] : memref<40xf32, #tpu.memory_space<smem>>
    %c15 = arith.constant 15 : index
    %15 = memref.load %arg1[%c15] : memref<40xf32, #tpu.memory_space<smem>>
    %c16 = arith.constant 16 : index
    %16 = memref.load %arg1[%c16] : memref<40xf32, #tpu.memory_space<smem>>
    %c17 = arith.constant 17 : index
    %17 = memref.load %arg1[%c17] : memref<40xf32, #tpu.memory_space<smem>>
    %c18 = arith.constant 18 : index
    %18 = memref.load %arg1[%c18] : memref<40xf32, #tpu.memory_space<smem>>
    %c19 = arith.constant 19 : index
    %19 = memref.load %arg1[%c19] : memref<40xf32, #tpu.memory_space<smem>>
    %c20 = arith.constant 20 : index
    %20 = memref.load %arg1[%c20] : memref<40xf32, #tpu.memory_space<smem>>
    %c21 = arith.constant 21 : index
    %21 = memref.load %arg1[%c21] : memref<40xf32, #tpu.memory_space<smem>>
    %c22 = arith.constant 22 : index
    %22 = memref.load %arg1[%c22] : memref<40xf32, #tpu.memory_space<smem>>
    %c23 = arith.constant 23 : index
    %23 = memref.load %arg1[%c23] : memref<40xf32, #tpu.memory_space<smem>>
    %c24 = arith.constant 24 : index
    %24 = memref.load %arg1[%c24] : memref<40xf32, #tpu.memory_space<smem>>
    %c25 = arith.constant 25 : index
    %25 = memref.load %arg1[%c25] : memref<40xf32, #tpu.memory_space<smem>>
    %c26 = arith.constant 26 : index
    %26 = memref.load %arg1[%c26] : memref<40xf32, #tpu.memory_space<smem>>
    %c27 = arith.constant 27 : index
    %27 = memref.load %arg1[%c27] : memref<40xf32, #tpu.memory_space<smem>>
    %c28 = arith.constant 28 : index
    %28 = memref.load %arg1[%c28] : memref<40xf32, #tpu.memory_space<smem>>
    %c29 = arith.constant 29 : index
    %29 = memref.load %arg1[%c29] : memref<40xf32, #tpu.memory_space<smem>>
    %c30 = arith.constant 30 : index
    %30 = memref.load %arg1[%c30] : memref<40xf32, #tpu.memory_space<smem>>
    %c31 = arith.constant 31 : index
    %31 = memref.load %arg1[%c31] : memref<40xf32, #tpu.memory_space<smem>>
    %c32 = arith.constant 32 : index
    %32 = memref.load %arg1[%c32] : memref<40xf32, #tpu.memory_space<smem>>
    %c33 = arith.constant 33 : index
    %33 = memref.load %arg1[%c33] : memref<40xf32, #tpu.memory_space<smem>>
    %c34 = arith.constant 34 : index
    %34 = memref.load %arg1[%c34] : memref<40xf32, #tpu.memory_space<smem>>
    %c35 = arith.constant 35 : index
    %35 = memref.load %arg1[%c35] : memref<40xf32, #tpu.memory_space<smem>>
    %36 = arith.mulf %31, %29 : f32
    %37 = arith.mulf %36, %30 : f32
    %38 = arith.mulf %32, %32 : f32
    %39 = vector.broadcast %24 : f32 to vector<16x128xf32>
    %40 = vector.broadcast %25 : f32 to vector<16x128xf32>
    %41 = vector.broadcast %29 : f32 to vector<16x128xf32>
    %42 = vector.broadcast %30 : f32 to vector<16x128xf32>
    %43 = tpu.iota {dimensions = array<i32: 0>} : vector<16x128xi32>
    %44 = tpu.iota {dimensions = array<i32: 1>} : vector<16x128xi32>
    %c0_i32 = arith.constant 0 : i32
    %45 = vector.broadcast %c0_i32 : i32 to vector<16x128xi32>
    %46 = arith.cmpi eq, %43, %45 : vector<16x128xi32>
    %c15_i32 = arith.constant 15 : i32
    %47 = vector.broadcast %c15_i32 : i32 to vector<16x128xi32>
    %48 = arith.cmpi eq, %43, %47 : vector<16x128xi32>
    %c0_i32_0 = arith.constant 0 : i32
    %49 = vector.broadcast %c0_i32_0 : i32 to vector<16x128xi32>
    %50 = arith.cmpi eq, %44, %49 : vector<16x128xi32>
    %c127_i32 = arith.constant 127 : i32
    %51 = vector.broadcast %c127_i32 : i32 to vector<16x128xi32>
    %52 = arith.cmpi eq, %44, %51 : vector<16x128xi32>
    %c2_i32 = arith.constant 2 : i32
    %53 = vector.broadcast %c2_i32 : i32 to vector<16x128xi32>
    %54 = arith.cmpi slt, %43, %53 : vector<16x128xi32>
    %c14_i32 = arith.constant 14 : i32
    %55 = vector.broadcast %c14_i32 : i32 to vector<16x128xi32>
    %56 = arith.cmpi sge, %43, %55 : vector<16x128xi32>
    %c2_i32_1 = arith.constant 2 : i32
    %57 = vector.broadcast %c2_i32_1 : i32 to vector<16x128xi32>
    %58 = arith.cmpi slt, %44, %57 : vector<16x128xi32>
    %c126_i32 = arith.constant 126 : i32
    %59 = vector.broadcast %c126_i32 : i32 to vector<16x128xi32>
    %60 = arith.cmpi sge, %44, %59 : vector<16x128xi32>
    %c0_2 = arith.constant 0 : index
    %c0_3 = arith.constant 0 : index
    %c0_4 = arith.constant 0 : index
    %c0_5 = arith.constant 0 : index
    %61 = vector.load %arg2[%c0_2, %c0_3, %c0_4, %c0_5] : memref<1x6x16x128xf32, #tpu.memory_space<vmem>>, vector<1x1x16x128xf32>
    %62 = vector.shape_cast %61 : vector<1x1x16x128xf32> to vector<16x128xf32>
    %c0_6 = arith.constant 0 : index
    %c1_7 = arith.constant 1 : index
    %c0_8 = arith.constant 0 : index
    %c0_9 = arith.constant 0 : index
    %63 = vector.load %arg2[%c0_6, %c1_7, %c0_8, %c0_9] : memref<1x6x16x128xf32, #tpu.memory_space<vmem>>, vector<1x1x16x128xf32>
    %64 = vector.shape_cast %63 : vector<1x1x16x128xf32> to vector<16x128xf32>
    %c0_10 = arith.constant 0 : index
    %c2_11 = arith.constant 2 : index
    %c0_12 = arith.constant 0 : index
    %c0_13 = arith.constant 0 : index
    %65 = vector.load %arg2[%c0_10, %c2_11, %c0_12, %c0_13] : memref<1x6x16x128xf32, #tpu.memory_space<vmem>>, vector<1x1x16x128xf32>
    %66 = vector.shape_cast %65 : vector<1x1x16x128xf32> to vector<16x128xf32>
    %c0_14 = arith.constant 0 : index
    %c3_15 = arith.constant 3 : index
    %c0_16 = arith.constant 0 : index
    %c0_17 = arith.constant 0 : index
    %67 = vector.load %arg2[%c0_14, %c3_15, %c0_16, %c0_17] : memref<1x6x16x128xf32, #tpu.memory_space<vmem>>, vector<1x1x16x128xf32>
    %68 = vector.shape_cast %67 : vector<1x1x16x128xf32> to vector<16x128xf32>
    %c0_18 = arith.constant 0 : index
    %c4_19 = arith.constant 4 : index
    %c0_20 = arith.constant 0 : index
    %c0_21 = arith.constant 0 : index
    %69 = vector.load %arg2[%c0_18, %c4_19, %c0_20, %c0_21] : memref<1x6x16x128xf32, #tpu.memory_space<vmem>>, vector<1x1x16x128xf32>
    %70 = vector.shape_cast %69 : vector<1x1x16x128xf32> to vector<16x128xf32>
    %c0_22 = arith.constant 0 : index
    %c5_23 = arith.constant 5 : index
    %c0_24 = arith.constant 0 : index
    %c0_25 = arith.constant 0 : index
    %71 = vector.load %arg2[%c0_22, %c5_23, %c0_24, %c0_25] : memref<1x6x16x128xf32, #tpu.memory_space<vmem>>, vector<1x1x16x128xf32>
    %72 = vector.shape_cast %71 : vector<1x1x16x128xf32> to vector<16x128xf32>
    %c1_i32 = arith.constant 1 : i32
    %73 = tpu.dynamic_rotate %62 by %c1_i32 dim 0 : vector<16x128xf32>, i32 -> vector<16x128xf32>
    %74 = arith.select %46, %62, %73 : vector<16x128xi1>, vector<16x128xf32>
    %c1_i32_26 = arith.constant 1 : i32
    %75 = tpu.dynamic_rotate %64 by %c1_i32_26 dim 0 : vector<16x128xf32>, i32 -> vector<16x128xf32>
    %76 = arith.select %46, %64, %75 : vector<16x128xi1>, vector<16x128xf32>
    %c1_i32_27 = arith.constant 1 : i32
    %77 = tpu.dynamic_rotate %66 by %c1_i32_27 dim 0 : vector<16x128xf32>, i32 -> vector<16x128xf32>
    %78 = arith.select %46, %66, %77 : vector<16x128xi1>, vector<16x128xf32>
    %c1_i32_28 = arith.constant 1 : i32
    %79 = tpu.dynamic_rotate %68 by %c1_i32_28 dim 0 : vector<16x128xf32>, i32 -> vector<16x128xf32>
    %80 = arith.select %46, %68, %79 : vector<16x128xi1>, vector<16x128xf32>
    %c1_i32_29 = arith.constant 1 : i32
    %81 = tpu.dynamic_rotate %70 by %c1_i32_29 dim 0 : vector<16x128xf32>, i32 -> vector<16x128xf32>
    %82 = arith.select %46, %70, %81 : vector<16x128xi1>, vector<16x128xf32>
    %c1_i32_30 = arith.constant 1 : i32
    %83 = tpu.dynamic_rotate %72 by %c1_i32_30 dim 0 : vector<16x128xf32>, i32 -> vector<16x128xf32>
    %84 = arith.select %46, %72, %83 : vector<16x128xi1>, vector<16x128xf32>
    %c15_i32_31 = arith.constant 15 : i32
    %85 = tpu.dynamic_rotate %62 by %c15_i32_31 dim 0 : vector<16x128xf32>, i32 -> vector<16x128xf32>
    %86 = arith.select %48, %62, %85 : vector<16x128xi1>, vector<16x128xf32>
    %c15_i32_32 = arith.constant 15 : i32
    %87 = tpu.dynamic_rotate %64 by %c15_i32_32 dim 0 : vector<16x128xf32>, i32 -> vector<16x128xf32>
    %88 = arith.select %48, %64, %87 : vector<16x128xi1>, vector<16x128xf32>
    %c15_i32_33 = arith.constant 15 : i32
    %89 = tpu.dynamic_rotate %66 by %c15_i32_33 dim 0 : vector<16x128xf32>, i32 -> vector<16x128xf32>
    %90 = arith.select %48, %66, %89 : vector<16x128xi1>, vector<16x128xf32>
    %c15_i32_34 = arith.constant 15 : i32
    %91 = tpu.dynamic_rotate %68 by %c15_i32_34 dim 0 : vector<16x128xf32>, i32 -> vector<16x128xf32>
    %92 = arith.select %48, %68, %91 : vector<16x128xi1>, vector<16x128xf32>
    %c15_i32_35 = arith.constant 15 : i32
    %93 = tpu.dynamic_rotate %70 by %c15_i32_35 dim 0 : vector<16x128xf32>, i32 -> vector<16x128xf32>
    %94 = arith.select %48, %70, %93 : vector<16x128xi1>, vector<16x128xf32>
    %c15_i32_36 = arith.constant 15 : i32
    %95 = tpu.dynamic_rotate %72 by %c15_i32_36 dim 0 : vector<16x128xf32>, i32 -> vector<16x128xf32>
    %96 = arith.select %48, %72, %95 : vector<16x128xi1>, vector<16x128xf32>
    %cst = arith.constant 0.000000e+00 : f32
    %97 = vector.broadcast %cst : f32 to vector<16x128xf32>
    %cst_37 = arith.constant 0.000000e+00 : f32
    %98 = vector.broadcast %cst_37 : f32 to vector<16x128xf32>
    %cst_38 = arith.constant 0.000000e+00 : f32
    %99 = vector.broadcast %cst_38 : f32 to vector<16x128xf32>
    %100 = arith.subf %62, %74 : vector<16x128xf32>
    %101 = arith.subf %64, %76 : vector<16x128xf32>
    %102 = arith.subf %66, %78 : vector<16x128xf32>
    %103 = arith.subf %68, %80 : vector<16x128xf32>
    %104 = arith.subf %70, %82 : vector<16x128xf32>
    %105 = arith.subf %72, %84 : vector<16x128xf32>
    %106 = vector.broadcast %0 : f32 to vector<16x128xf32>
    %107 = vector.broadcast %12 : f32 to vector<16x128xf32>
    %108 = arith.mulf %100, %106 : vector<16x128xf32>
    %109 = arith.mulf %101, %106 : vector<16x128xf32>
    %110 = arith.mulf %102, %106 : vector<16x128xf32>
    %111 = arith.mulf %103, %106 : vector<16x128xf32>
    %112 = arith.mulf %104, %106 : vector<16x128xf32>
    %113 = arith.mulf %105, %106 : vector<16x128xf32>
    %114 = arith.mulf %108, %108 : vector<16x128xf32>
    %115 = arith.mulf %109, %109 : vector<16x128xf32>
    %116 = arith.addf %114, %115 : vector<16x128xf32>
    %117 = arith.mulf %110, %110 : vector<16x128xf32>
    %118 = arith.addf %116, %117 : vector<16x128xf32>
    %cst_39 = arith.constant 9.99999971E-10 : f32
    %119 = vector.broadcast %cst_39 : f32 to vector<16x128xf32>
    %120 = arith.addf %118, %119 : vector<16x128xf32>
    %121 = math.rsqrt %120 : vector<16x128xf32>
    %122 = arith.mulf %108, %121 : vector<16x128xf32>
    %123 = arith.mulf %109, %121 : vector<16x128xf32>
    %124 = arith.mulf %110, %121 : vector<16x128xf32>
    %125 = arith.mulf %111, %122 : vector<16x128xf32>
    %126 = arith.mulf %112, %123 : vector<16x128xf32>
    %127 = arith.addf %125, %126 : vector<16x128xf32>
    %128 = arith.mulf %113, %124 : vector<16x128xf32>
    %129 = arith.addf %127, %128 : vector<16x128xf32>
    %130 = arith.mulf %40, %129 : vector<16x128xf32>
    %131 = arith.addf %130, %39 : vector<16x128xf32>
    %132 = arith.mulf %108, %107 : vector<16x128xf32>
    %133 = arith.addf %97, %132 : vector<16x128xf32>
    %134 = arith.mulf %122, %131 : vector<16x128xf32>
    %135 = arith.addf %133, %134 : vector<16x128xf32>
    %136 = arith.mulf %109, %107 : vector<16x128xf32>
    %137 = arith.addf %98, %136 : vector<16x128xf32>
    %138 = arith.mulf %123, %131 : vector<16x128xf32>
    %139 = arith.addf %137, %138 : vector<16x128xf32>
    %140 = arith.mulf %110, %107 : vector<16x128xf32>
    %141 = arith.addf %99, %140 : vector<16x128xf32>
    %142 = arith.mulf %124, %131 : vector<16x128xf32>
    %143 = arith.addf %141, %142 : vector<16x128xf32>
    %c1_i32_40 = arith.constant 1 : i32
    %144 = tpu.dynamic_rotate %74 by %c1_i32_40 dim 1 : vector<16x128xf32>, i32 -> vector<16x128xf32>
    %145 = arith.select %50, %74, %144 : vector<16x128xi1>, vector<16x128xf32>
    %146 = arith.subf %62, %145 : vector<16x128xf32>
    %c1_i32_41 = arith.constant 1 : i32
    %147 = tpu.dynamic_rotate %76 by %c1_i32_41 dim 1 : vector<16x128xf32>, i32 -> vector<16x128xf32>
    %148 = arith.select %50, %76, %147 : vector<16x128xi1>, vector<16x128xf32>
    %149 = arith.subf %64, %148 : vector<16x128xf32>
    %c1_i32_42 = arith.constant 1 : i32
    %150 = tpu.dynamic_rotate %78 by %c1_i32_42 dim 1 : vector<16x128xf32>, i32 -> vector<16x128xf32>
    %151 = arith.select %50, %78, %150 : vector<16x128xi1>, vector<16x128xf32>
    %152 = arith.subf %66, %151 : vector<16x128xf32>
    %c1_i32_43 = arith.constant 1 : i32
    %153 = tpu.dynamic_rotate %80 by %c1_i32_43 dim 1 : vector<16x128xf32>, i32 -> vector<16x128xf32>
    %154 = arith.select %50, %80, %153 : vector<16x128xi1>, vector<16x128xf32>
    %155 = arith.subf %68, %154 : vector<16x128xf32>
    %c1_i32_44 = arith.constant 1 : i32
    %156 = tpu.dynamic_rotate %82 by %c1_i32_44 dim 1 : vector<16x128xf32>, i32 -> vector<16x128xf32>
    %157 = arith.select %50, %82, %156 : vector<16x128xi1>, vector<16x128xf32>
    %158 = arith.subf %70, %157 : vector<16x128xf32>
    %c1_i32_45 = arith.constant 1 : i32
    %159 = tpu.dynamic_rotate %84 by %c1_i32_45 dim 1 : vector<16x128xf32>, i32 -> vector<16x128xf32>
    %160 = arith.select %50, %84, %159 : vector<16x128xi1>, vector<16x128xf32>
    %161 = arith.subf %72, %160 : vector<16x128xf32>
    %162 = vector.broadcast %1 : f32 to vector<16x128xf32>
    %163 = vector.broadcast %13 : f32 to vector<16x128xf32>
    %164 = arith.mulf %146, %162 : vector<16x128xf32>
    %165 = arith.mulf %149, %162 : vector<16x128xf32>
    %166 = arith.mulf %152, %162 : vector<16x128xf32>
    %167 = arith.mulf %155, %162 : vector<16x128xf32>
    %168 = arith.mulf %158, %162 : vector<16x128xf32>
    %169 = arith.mulf %161, %162 : vector<16x128xf32>
    %170 = arith.mulf %164, %164 : vector<16x128xf32>
    %171 = arith.mulf %165, %165 : vector<16x128xf32>
    %172 = arith.addf %170, %171 : vector<16x128xf32>
    %173 = arith.mulf %166, %166 : vector<16x128xf32>
    %174 = arith.addf %172, %173 : vector<16x128xf32>
    %cst_46 = arith.constant 9.99999971E-10 : f32
    %175 = vector.broadcast %cst_46 : f32 to vector<16x128xf32>
    %176 = arith.addf %174, %175 : vector<16x128xf32>
    %177 = math.rsqrt %176 : vector<16x128xf32>
    %178 = arith.mulf %164, %177 : vector<16x128xf32>
    %179 = arith.mulf %165, %177 : vector<16x128xf32>
    %180 = arith.mulf %166, %177 : vector<16x128xf32>
    %181 = arith.mulf %167, %178 : vector<16x128xf32>
    %182 = arith.mulf %168, %179 : vector<16x128xf32>
    %183 = arith.addf %181, %182 : vector<16x128xf32>
    %184 = arith.mulf %169, %180 : vector<16x128xf32>
    %185 = arith.addf %183, %184 : vector<16x128xf32>
    %186 = arith.mulf %40, %185 : vector<16x128xf32>
    %187 = arith.addf %186, %39 : vector<16x128xf32>
    %188 = arith.mulf %164, %163 : vector<16x128xf32>
    %189 = arith.addf %135, %188 : vector<16x128xf32>
    %190 = arith.mulf %178, %187 : vector<16x128xf32>
    %191 = arith.addf %189, %190 : vector<16x128xf32>
    %192 = arith.mulf %165, %163 : vector<16x128xf32>
    %193 = arith.addf %139, %192 : vector<16x128xf32>
    %194 = arith.mulf %179, %187 : vector<16x128xf32>
    %195 = arith.addf %193, %194 : vector<16x128xf32>
    %196 = arith.mulf %166, %163 : vector<16x128xf32>
    %197 = arith.addf %143, %196 : vector<16x128xf32>
    %198 = arith.mulf %180, %187 : vector<16x128xf32>
    %199 = arith.addf %197, %198 : vector<16x128xf32>
    %c1_i32_47 = arith.constant 1 : i32
    %200 = tpu.dynamic_rotate %62 by %c1_i32_47 dim 1 : vector<16x128xf32>, i32 -> vector<16x128xf32>
    %201 = arith.select %50, %62, %200 : vector<16x128xi1>, vector<16x128xf32>
    %202 = arith.subf %62, %201 : vector<16x128xf32>
    %c1_i32_48 = arith.constant 1 : i32
    %203 = tpu.dynamic_rotate %64 by %c1_i32_48 dim 1 : vector<16x128xf32>, i32 -> vector<16x128xf32>
    %204 = arith.select %50, %64, %203 : vector<16x128xi1>, vector<16x128xf32>
    %205 = arith.subf %64, %204 : vector<16x128xf32>
    %c1_i32_49 = arith.constant 1 : i32
    %206 = tpu.dynamic_rotate %66 by %c1_i32_49 dim 1 : vector<16x128xf32>, i32 -> vector<16x128xf32>
    %207 = arith.select %50, %66, %206 : vector<16x128xi1>, vector<16x128xf32>
    %208 = arith.subf %66, %207 : vector<16x128xf32>
    %c1_i32_50 = arith.constant 1 : i32
    %209 = tpu.dynamic_rotate %68 by %c1_i32_50 dim 1 : vector<16x128xf32>, i32 -> vector<16x128xf32>
    %210 = arith.select %50, %68, %209 : vector<16x128xi1>, vector<16x128xf32>
    %211 = arith.subf %68, %210 : vector<16x128xf32>
    %c1_i32_51 = arith.constant 1 : i32
    %212 = tpu.dynamic_rotate %70 by %c1_i32_51 dim 1 : vector<16x128xf32>, i32 -> vector<16x128xf32>
    %213 = arith.select %50, %70, %212 : vector<16x128xi1>, vector<16x128xf32>
    %214 = arith.subf %70, %213 : vector<16x128xf32>
    %c1_i32_52 = arith.constant 1 : i32
    %215 = tpu.dynamic_rotate %72 by %c1_i32_52 dim 1 : vector<16x128xf32>, i32 -> vector<16x128xf32>
    %216 = arith.select %50, %72, %215 : vector<16x128xi1>, vector<16x128xf32>
    %217 = arith.subf %72, %216 : vector<16x128xf32>
    %218 = vector.broadcast %2 : f32 to vector<16x128xf32>
    %219 = vector.broadcast %14 : f32 to vector<16x128xf32>
    %220 = arith.mulf %202, %218 : vector<16x128xf32>
    %221 = arith.mulf %205, %218 : vector<16x128xf32>
    %222 = arith.mulf %208, %218 : vector<16x128xf32>
    %223 = arith.mulf %211, %218 : vector<16x128xf32>
    %224 = arith.mulf %214, %218 : vector<16x128xf32>
    %225 = arith.mulf %217, %218 : vector<16x128xf32>
    %226 = arith.mulf %220, %220 : vector<16x128xf32>
    %227 = arith.mulf %221, %221 : vector<16x128xf32>
    %228 = arith.addf %226, %227 : vector<16x128xf32>
    %229 = arith.mulf %222, %222 : vector<16x128xf32>
    %230 = arith.addf %228, %229 : vector<16x128xf32>
    %cst_53 = arith.constant 9.99999971E-10 : f32
    %231 = vector.broadcast %cst_53 : f32 to vector<16x128xf32>
    %232 = arith.addf %230, %231 : vector<16x128xf32>
    %233 = math.rsqrt %232 : vector<16x128xf32>
    %234 = arith.mulf %220, %233 : vector<16x128xf32>
    %235 = arith.mulf %221, %233 : vector<16x128xf32>
    %236 = arith.mulf %222, %233 : vector<16x128xf32>
    %237 = arith.mulf %223, %234 : vector<16x128xf32>
    %238 = arith.mulf %224, %235 : vector<16x128xf32>
    %239 = arith.addf %237, %238 : vector<16x128xf32>
    %240 = arith.mulf %225, %236 : vector<16x128xf32>
    %241 = arith.addf %239, %240 : vector<16x128xf32>
    %242 = arith.mulf %40, %241 : vector<16x128xf32>
    %243 = arith.addf %242, %39 : vector<16x128xf32>
    %244 = arith.mulf %220, %219 : vector<16x128xf32>
    %245 = arith.addf %191, %244 : vector<16x128xf32>
    %246 = arith.mulf %234, %243 : vector<16x128xf32>
    %247 = arith.addf %245, %246 : vector<16x128xf32>
    %248 = arith.mulf %221, %219 : vector<16x128xf32>
    %249 = arith.addf %195, %248 : vector<16x128xf32>
    %250 = arith.mulf %235, %243 : vector<16x128xf32>
    %251 = arith.addf %249, %250 : vector<16x128xf32>
    %252 = arith.mulf %222, %219 : vector<16x128xf32>
    %253 = arith.addf %199, %252 : vector<16x128xf32>
    %254 = arith.mulf %236, %243 : vector<16x128xf32>
    %255 = arith.addf %253, %254 : vector<16x128xf32>
    %c1_i32_54 = arith.constant 1 : i32
    %256 = tpu.dynamic_rotate %86 by %c1_i32_54 dim 1 : vector<16x128xf32>, i32 -> vector<16x128xf32>
    %257 = arith.select %50, %86, %256 : vector<16x128xi1>, vector<16x128xf32>
    %258 = arith.subf %62, %257 : vector<16x128xf32>
    %c1_i32_55 = arith.constant 1 : i32
    %259 = tpu.dynamic_rotate %88 by %c1_i32_55 dim 1 : vector<16x128xf32>, i32 -> vector<16x128xf32>
    %260 = arith.select %50, %88, %259 : vector<16x128xi1>, vector<16x128xf32>
    %261 = arith.subf %64, %260 : vector<16x128xf32>
    %c1_i32_56 = arith.constant 1 : i32
    %262 = tpu.dynamic_rotate %90 by %c1_i32_56 dim 1 : vector<16x128xf32>, i32 -> vector<16x128xf32>
    %263 = arith.select %50, %90, %262 : vector<16x128xi1>, vector<16x128xf32>
    %264 = arith.subf %66, %263 : vector<16x128xf32>
    %c1_i32_57 = arith.constant 1 : i32
    %265 = tpu.dynamic_rotate %92 by %c1_i32_57 dim 1 : vector<16x128xf32>, i32 -> vector<16x128xf32>
    %266 = arith.select %50, %92, %265 : vector<16x128xi1>, vector<16x128xf32>
    %267 = arith.subf %68, %266 : vector<16x128xf32>
    %c1_i32_58 = arith.constant 1 : i32
    %268 = tpu.dynamic_rotate %94 by %c1_i32_58 dim 1 : vector<16x128xf32>, i32 -> vector<16x128xf32>
    %269 = arith.select %50, %94, %268 : vector<16x128xi1>, vector<16x128xf32>
    %270 = arith.subf %70, %269 : vector<16x128xf32>
    %c1_i32_59 = arith.constant 1 : i32
    %271 = tpu.dynamic_rotate %96 by %c1_i32_59 dim 1 : vector<16x128xf32>, i32 -> vector<16x128xf32>
    %272 = arith.select %50, %96, %271 : vector<16x128xi1>, vector<16x128xf32>
    %273 = arith.subf %72, %272 : vector<16x128xf32>
    %274 = vector.broadcast %3 : f32 to vector<16x128xf32>
    %275 = vector.broadcast %15 : f32 to vector<16x128xf32>
    %276 = arith.mulf %258, %274 : vector<16x128xf32>
    %277 = arith.mulf %261, %274 : vector<16x128xf32>
    %278 = arith.mulf %264, %274 : vector<16x128xf32>
    %279 = arith.mulf %267, %274 : vector<16x128xf32>
    %280 = arith.mulf %270, %274 : vector<16x128xf32>
    %281 = arith.mulf %273, %274 : vector<16x128xf32>
    %282 = arith.mulf %276, %276 : vector<16x128xf32>
    %283 = arith.mulf %277, %277 : vector<16x128xf32>
    %284 = arith.addf %282, %283 : vector<16x128xf32>
    %285 = arith.mulf %278, %278 : vector<16x128xf32>
    %286 = arith.addf %284, %285 : vector<16x128xf32>
    %cst_60 = arith.constant 9.99999971E-10 : f32
    %287 = vector.broadcast %cst_60 : f32 to vector<16x128xf32>
    %288 = arith.addf %286, %287 : vector<16x128xf32>
    %289 = math.rsqrt %288 : vector<16x128xf32>
    %290 = arith.mulf %276, %289 : vector<16x128xf32>
    %291 = arith.mulf %277, %289 : vector<16x128xf32>
    %292 = arith.mulf %278, %289 : vector<16x128xf32>
    %293 = arith.mulf %279, %290 : vector<16x128xf32>
    %294 = arith.mulf %280, %291 : vector<16x128xf32>
    %295 = arith.addf %293, %294 : vector<16x128xf32>
    %296 = arith.mulf %281, %292 : vector<16x128xf32>
    %297 = arith.addf %295, %296 : vector<16x128xf32>
    %298 = arith.mulf %40, %297 : vector<16x128xf32>
    %299 = arith.addf %298, %39 : vector<16x128xf32>
    %300 = arith.mulf %276, %275 : vector<16x128xf32>
    %301 = arith.addf %247, %300 : vector<16x128xf32>
    %302 = arith.mulf %290, %299 : vector<16x128xf32>
    %303 = arith.addf %301, %302 : vector<16x128xf32>
    %304 = arith.mulf %277, %275 : vector<16x128xf32>
    %305 = arith.addf %251, %304 : vector<16x128xf32>
    %306 = arith.mulf %291, %299 : vector<16x128xf32>
    %307 = arith.addf %305, %306 : vector<16x128xf32>
    %308 = arith.mulf %278, %275 : vector<16x128xf32>
    %309 = arith.addf %255, %308 : vector<16x128xf32>
    %310 = arith.mulf %292, %299 : vector<16x128xf32>
    %311 = arith.addf %309, %310 : vector<16x128xf32>
    %312 = arith.subf %62, %86 : vector<16x128xf32>
    %313 = arith.subf %64, %88 : vector<16x128xf32>
    %314 = arith.subf %66, %90 : vector<16x128xf32>
    %315 = arith.subf %68, %92 : vector<16x128xf32>
    %316 = arith.subf %70, %94 : vector<16x128xf32>
    %317 = arith.subf %72, %96 : vector<16x128xf32>
    %318 = vector.broadcast %4 : f32 to vector<16x128xf32>
    %319 = vector.broadcast %16 : f32 to vector<16x128xf32>
    %320 = arith.mulf %312, %318 : vector<16x128xf32>
    %321 = arith.mulf %313, %318 : vector<16x128xf32>
    %322 = arith.mulf %314, %318 : vector<16x128xf32>
    %323 = arith.mulf %315, %318 : vector<16x128xf32>
    %324 = arith.mulf %316, %318 : vector<16x128xf32>
    %325 = arith.mulf %317, %318 : vector<16x128xf32>
    %326 = arith.mulf %320, %320 : vector<16x128xf32>
    %327 = arith.mulf %321, %321 : vector<16x128xf32>
    %328 = arith.addf %326, %327 : vector<16x128xf32>
    %329 = arith.mulf %322, %322 : vector<16x128xf32>
    %330 = arith.addf %328, %329 : vector<16x128xf32>
    %cst_61 = arith.constant 9.99999971E-10 : f32
    %331 = vector.broadcast %cst_61 : f32 to vector<16x128xf32>
    %332 = arith.addf %330, %331 : vector<16x128xf32>
    %333 = math.rsqrt %332 : vector<16x128xf32>
    %334 = arith.mulf %320, %333 : vector<16x128xf32>
    %335 = arith.mulf %321, %333 : vector<16x128xf32>
    %336 = arith.mulf %322, %333 : vector<16x128xf32>
    %337 = arith.mulf %323, %334 : vector<16x128xf32>
    %338 = arith.mulf %324, %335 : vector<16x128xf32>
    %339 = arith.addf %337, %338 : vector<16x128xf32>
    %340 = arith.mulf %325, %336 : vector<16x128xf32>
    %341 = arith.addf %339, %340 : vector<16x128xf32>
    %342 = arith.mulf %40, %341 : vector<16x128xf32>
    %343 = arith.addf %342, %39 : vector<16x128xf32>
    %344 = arith.mulf %320, %319 : vector<16x128xf32>
    %345 = arith.addf %303, %344 : vector<16x128xf32>
    %346 = arith.mulf %334, %343 : vector<16x128xf32>
    %347 = arith.addf %345, %346 : vector<16x128xf32>
    %348 = arith.mulf %321, %319 : vector<16x128xf32>
    %349 = arith.addf %307, %348 : vector<16x128xf32>
    %350 = arith.mulf %335, %343 : vector<16x128xf32>
    %351 = arith.addf %349, %350 : vector<16x128xf32>
    %352 = arith.mulf %322, %319 : vector<16x128xf32>
    %353 = arith.addf %311, %352 : vector<16x128xf32>
    %354 = arith.mulf %336, %343 : vector<16x128xf32>
    %355 = arith.addf %353, %354 : vector<16x128xf32>
    %c127_i32_62 = arith.constant 127 : i32
    %356 = tpu.dynamic_rotate %86 by %c127_i32_62 dim 1 : vector<16x128xf32>, i32 -> vector<16x128xf32>
    %357 = arith.select %52, %86, %356 : vector<16x128xi1>, vector<16x128xf32>
    %358 = arith.subf %62, %357 : vector<16x128xf32>
    %c127_i32_63 = arith.constant 127 : i32
    %359 = tpu.dynamic_rotate %88 by %c127_i32_63 dim 1 : vector<16x128xf32>, i32 -> vector<16x128xf32>
    %360 = arith.select %52, %88, %359 : vector<16x128xi1>, vector<16x128xf32>
    %361 = arith.subf %64, %360 : vector<16x128xf32>
    %c127_i32_64 = arith.constant 127 : i32
    %362 = tpu.dynamic_rotate %90 by %c127_i32_64 dim 1 : vector<16x128xf32>, i32 -> vector<16x128xf32>
    %363 = arith.select %52, %90, %362 : vector<16x128xi1>, vector<16x128xf32>
    %364 = arith.subf %66, %363 : vector<16x128xf32>
    %c127_i32_65 = arith.constant 127 : i32
    %365 = tpu.dynamic_rotate %92 by %c127_i32_65 dim 1 : vector<16x128xf32>, i32 -> vector<16x128xf32>
    %366 = arith.select %52, %92, %365 : vector<16x128xi1>, vector<16x128xf32>
    %367 = arith.subf %68, %366 : vector<16x128xf32>
    %c127_i32_66 = arith.constant 127 : i32
    %368 = tpu.dynamic_rotate %94 by %c127_i32_66 dim 1 : vector<16x128xf32>, i32 -> vector<16x128xf32>
    %369 = arith.select %52, %94, %368 : vector<16x128xi1>, vector<16x128xf32>
    %370 = arith.subf %70, %369 : vector<16x128xf32>
    %c127_i32_67 = arith.constant 127 : i32
    %371 = tpu.dynamic_rotate %96 by %c127_i32_67 dim 1 : vector<16x128xf32>, i32 -> vector<16x128xf32>
    %372 = arith.select %52, %96, %371 : vector<16x128xi1>, vector<16x128xf32>
    %373 = arith.subf %72, %372 : vector<16x128xf32>
    %374 = vector.broadcast %5 : f32 to vector<16x128xf32>
    %375 = vector.broadcast %17 : f32 to vector<16x128xf32>
    %376 = arith.mulf %358, %374 : vector<16x128xf32>
    %377 = arith.mulf %361, %374 : vector<16x128xf32>
    %378 = arith.mulf %364, %374 : vector<16x128xf32>
    %379 = arith.mulf %367, %374 : vector<16x128xf32>
    %380 = arith.mulf %370, %374 : vector<16x128xf32>
    %381 = arith.mulf %373, %374 : vector<16x128xf32>
    %382 = arith.mulf %376, %376 : vector<16x128xf32>
    %383 = arith.mulf %377, %377 : vector<16x128xf32>
    %384 = arith.addf %382, %383 : vector<16x128xf32>
    %385 = arith.mulf %378, %378 : vector<16x128xf32>
    %386 = arith.addf %384, %385 : vector<16x128xf32>
    %cst_68 = arith.constant 9.99999971E-10 : f32
    %387 = vector.broadcast %cst_68 : f32 to vector<16x128xf32>
    %388 = arith.addf %386, %387 : vector<16x128xf32>
    %389 = math.rsqrt %388 : vector<16x128xf32>
    %390 = arith.mulf %376, %389 : vector<16x128xf32>
    %391 = arith.mulf %377, %389 : vector<16x128xf32>
    %392 = arith.mulf %378, %389 : vector<16x128xf32>
    %393 = arith.mulf %379, %390 : vector<16x128xf32>
    %394 = arith.mulf %380, %391 : vector<16x128xf32>
    %395 = arith.addf %393, %394 : vector<16x128xf32>
    %396 = arith.mulf %381, %392 : vector<16x128xf32>
    %397 = arith.addf %395, %396 : vector<16x128xf32>
    %398 = arith.mulf %40, %397 : vector<16x128xf32>
    %399 = arith.addf %398, %39 : vector<16x128xf32>
    %400 = arith.mulf %376, %375 : vector<16x128xf32>
    %401 = arith.addf %347, %400 : vector<16x128xf32>
    %402 = arith.mulf %390, %399 : vector<16x128xf32>
    %403 = arith.addf %401, %402 : vector<16x128xf32>
    %404 = arith.mulf %377, %375 : vector<16x128xf32>
    %405 = arith.addf %351, %404 : vector<16x128xf32>
    %406 = arith.mulf %391, %399 : vector<16x128xf32>
    %407 = arith.addf %405, %406 : vector<16x128xf32>
    %408 = arith.mulf %378, %375 : vector<16x128xf32>
    %409 = arith.addf %355, %408 : vector<16x128xf32>
    %410 = arith.mulf %392, %399 : vector<16x128xf32>
    %411 = arith.addf %409, %410 : vector<16x128xf32>
    %c127_i32_69 = arith.constant 127 : i32
    %412 = tpu.dynamic_rotate %62 by %c127_i32_69 dim 1 : vector<16x128xf32>, i32 -> vector<16x128xf32>
    %413 = arith.select %52, %62, %412 : vector<16x128xi1>, vector<16x128xf32>
    %414 = arith.subf %62, %413 : vector<16x128xf32>
    %c127_i32_70 = arith.constant 127 : i32
    %415 = tpu.dynamic_rotate %64 by %c127_i32_70 dim 1 : vector<16x128xf32>, i32 -> vector<16x128xf32>
    %416 = arith.select %52, %64, %415 : vector<16x128xi1>, vector<16x128xf32>
    %417 = arith.subf %64, %416 : vector<16x128xf32>
    %c127_i32_71 = arith.constant 127 : i32
    %418 = tpu.dynamic_rotate %66 by %c127_i32_71 dim 1 : vector<16x128xf32>, i32 -> vector<16x128xf32>
    %419 = arith.select %52, %66, %418 : vector<16x128xi1>, vector<16x128xf32>
    %420 = arith.subf %66, %419 : vector<16x128xf32>
    %c127_i32_72 = arith.constant 127 : i32
    %421 = tpu.dynamic_rotate %68 by %c127_i32_72 dim 1 : vector<16x128xf32>, i32 -> vector<16x128xf32>
    %422 = arith.select %52, %68, %421 : vector<16x128xi1>, vector<16x128xf32>
    %423 = arith.subf %68, %422 : vector<16x128xf32>
    %c127_i32_73 = arith.constant 127 : i32
    %424 = tpu.dynamic_rotate %70 by %c127_i32_73 dim 1 : vector<16x128xf32>, i32 -> vector<16x128xf32>
    %425 = arith.select %52, %70, %424 : vector<16x128xi1>, vector<16x128xf32>
    %426 = arith.subf %70, %425 : vector<16x128xf32>
    %c127_i32_74 = arith.constant 127 : i32
    %427 = tpu.dynamic_rotate %72 by %c127_i32_74 dim 1 : vector<16x128xf32>, i32 -> vector<16x128xf32>
    %428 = arith.select %52, %72, %427 : vector<16x128xi1>, vector<16x128xf32>
    %429 = arith.subf %72, %428 : vector<16x128xf32>
    %430 = vector.broadcast %6 : f32 to vector<16x128xf32>
    %431 = vector.broadcast %18 : f32 to vector<16x128xf32>
    %432 = arith.mulf %414, %430 : vector<16x128xf32>
    %433 = arith.mulf %417, %430 : vector<16x128xf32>
    %434 = arith.mulf %420, %430 : vector<16x128xf32>
    %435 = arith.mulf %423, %430 : vector<16x128xf32>
    %436 = arith.mulf %426, %430 : vector<16x128xf32>
    %437 = arith.mulf %429, %430 : vector<16x128xf32>
    %438 = arith.mulf %432, %432 : vector<16x128xf32>
    %439 = arith.mulf %433, %433 : vector<16x128xf32>
    %440 = arith.addf %438, %439 : vector<16x128xf32>
    %441 = arith.mulf %434, %434 : vector<16x128xf32>
    %442 = arith.addf %440, %441 : vector<16x128xf32>
    %cst_75 = arith.constant 9.99999971E-10 : f32
    %443 = vector.broadcast %cst_75 : f32 to vector<16x128xf32>
    %444 = arith.addf %442, %443 : vector<16x128xf32>
    %445 = math.rsqrt %444 : vector<16x128xf32>
    %446 = arith.mulf %432, %445 : vector<16x128xf32>
    %447 = arith.mulf %433, %445 : vector<16x128xf32>
    %448 = arith.mulf %434, %445 : vector<16x128xf32>
    %449 = arith.mulf %435, %446 : vector<16x128xf32>
    %450 = arith.mulf %436, %447 : vector<16x128xf32>
    %451 = arith.addf %449, %450 : vector<16x128xf32>
    %452 = arith.mulf %437, %448 : vector<16x128xf32>
    %453 = arith.addf %451, %452 : vector<16x128xf32>
    %454 = arith.mulf %40, %453 : vector<16x128xf32>
    %455 = arith.addf %454, %39 : vector<16x128xf32>
    %456 = arith.mulf %432, %431 : vector<16x128xf32>
    %457 = arith.addf %403, %456 : vector<16x128xf32>
    %458 = arith.mulf %446, %455 : vector<16x128xf32>
    %459 = arith.addf %457, %458 : vector<16x128xf32>
    %460 = arith.mulf %433, %431 : vector<16x128xf32>
    %461 = arith.addf %407, %460 : vector<16x128xf32>
    %462 = arith.mulf %447, %455 : vector<16x128xf32>
    %463 = arith.addf %461, %462 : vector<16x128xf32>
    %464 = arith.mulf %434, %431 : vector<16x128xf32>
    %465 = arith.addf %411, %464 : vector<16x128xf32>
    %466 = arith.mulf %448, %455 : vector<16x128xf32>
    %467 = arith.addf %465, %466 : vector<16x128xf32>
    %c127_i32_76 = arith.constant 127 : i32
    %468 = tpu.dynamic_rotate %74 by %c127_i32_76 dim 1 : vector<16x128xf32>, i32 -> vector<16x128xf32>
    %469 = arith.select %52, %74, %468 : vector<16x128xi1>, vector<16x128xf32>
    %470 = arith.subf %62, %469 : vector<16x128xf32>
    %c127_i32_77 = arith.constant 127 : i32
    %471 = tpu.dynamic_rotate %76 by %c127_i32_77 dim 1 : vector<16x128xf32>, i32 -> vector<16x128xf32>
    %472 = arith.select %52, %76, %471 : vector<16x128xi1>, vector<16x128xf32>
    %473 = arith.subf %64, %472 : vector<16x128xf32>
    %c127_i32_78 = arith.constant 127 : i32
    %474 = tpu.dynamic_rotate %78 by %c127_i32_78 dim 1 : vector<16x128xf32>, i32 -> vector<16x128xf32>
    %475 = arith.select %52, %78, %474 : vector<16x128xi1>, vector<16x128xf32>
    %476 = arith.subf %66, %475 : vector<16x128xf32>
    %c127_i32_79 = arith.constant 127 : i32
    %477 = tpu.dynamic_rotate %80 by %c127_i32_79 dim 1 : vector<16x128xf32>, i32 -> vector<16x128xf32>
    %478 = arith.select %52, %80, %477 : vector<16x128xi1>, vector<16x128xf32>
    %479 = arith.subf %68, %478 : vector<16x128xf32>
    %c127_i32_80 = arith.constant 127 : i32
    %480 = tpu.dynamic_rotate %82 by %c127_i32_80 dim 1 : vector<16x128xf32>, i32 -> vector<16x128xf32>
    %481 = arith.select %52, %82, %480 : vector<16x128xi1>, vector<16x128xf32>
    %482 = arith.subf %70, %481 : vector<16x128xf32>
    %c127_i32_81 = arith.constant 127 : i32
    %483 = tpu.dynamic_rotate %84 by %c127_i32_81 dim 1 : vector<16x128xf32>, i32 -> vector<16x128xf32>
    %484 = arith.select %52, %84, %483 : vector<16x128xi1>, vector<16x128xf32>
    %485 = arith.subf %72, %484 : vector<16x128xf32>
    %486 = vector.broadcast %7 : f32 to vector<16x128xf32>
    %487 = vector.broadcast %19 : f32 to vector<16x128xf32>
    %488 = arith.mulf %470, %486 : vector<16x128xf32>
    %489 = arith.mulf %473, %486 : vector<16x128xf32>
    %490 = arith.mulf %476, %486 : vector<16x128xf32>
    %491 = arith.mulf %479, %486 : vector<16x128xf32>
    %492 = arith.mulf %482, %486 : vector<16x128xf32>
    %493 = arith.mulf %485, %486 : vector<16x128xf32>
    %494 = arith.mulf %488, %488 : vector<16x128xf32>
    %495 = arith.mulf %489, %489 : vector<16x128xf32>
    %496 = arith.addf %494, %495 : vector<16x128xf32>
    %497 = arith.mulf %490, %490 : vector<16x128xf32>
    %498 = arith.addf %496, %497 : vector<16x128xf32>
    %cst_82 = arith.constant 9.99999971E-10 : f32
    %499 = vector.broadcast %cst_82 : f32 to vector<16x128xf32>
    %500 = arith.addf %498, %499 : vector<16x128xf32>
    %501 = math.rsqrt %500 : vector<16x128xf32>
    %502 = arith.mulf %488, %501 : vector<16x128xf32>
    %503 = arith.mulf %489, %501 : vector<16x128xf32>
    %504 = arith.mulf %490, %501 : vector<16x128xf32>
    %505 = arith.mulf %491, %502 : vector<16x128xf32>
    %506 = arith.mulf %492, %503 : vector<16x128xf32>
    %507 = arith.addf %505, %506 : vector<16x128xf32>
    %508 = arith.mulf %493, %504 : vector<16x128xf32>
    %509 = arith.addf %507, %508 : vector<16x128xf32>
    %510 = arith.mulf %40, %509 : vector<16x128xf32>
    %511 = arith.addf %510, %39 : vector<16x128xf32>
    %512 = arith.mulf %488, %487 : vector<16x128xf32>
    %513 = arith.addf %459, %512 : vector<16x128xf32>
    %514 = arith.mulf %502, %511 : vector<16x128xf32>
    %515 = arith.addf %513, %514 : vector<16x128xf32>
    %516 = arith.mulf %489, %487 : vector<16x128xf32>
    %517 = arith.addf %463, %516 : vector<16x128xf32>
    %518 = arith.mulf %503, %511 : vector<16x128xf32>
    %519 = arith.addf %517, %518 : vector<16x128xf32>
    %520 = arith.mulf %490, %487 : vector<16x128xf32>
    %521 = arith.addf %467, %520 : vector<16x128xf32>
    %522 = arith.mulf %504, %511 : vector<16x128xf32>
    %523 = arith.addf %521, %522 : vector<16x128xf32>
    %c2_i32_83 = arith.constant 2 : i32
    %524 = tpu.dynamic_rotate %62 by %c2_i32_83 dim 0 : vector<16x128xf32>, i32 -> vector<16x128xf32>
    %525 = arith.subf %62, %524 : vector<16x128xf32>
    %cst_84 = arith.constant 0.000000e+00 : f32
    %526 = vector.broadcast %cst_84 : f32 to vector<16x128xf32>
    %527 = arith.select %54, %526, %525 : vector<16x128xi1>, vector<16x128xf32>
    %c2_i32_85 = arith.constant 2 : i32
    %528 = tpu.dynamic_rotate %64 by %c2_i32_85 dim 0 : vector<16x128xf32>, i32 -> vector<16x128xf32>
    %529 = arith.subf %64, %528 : vector<16x128xf32>
    %cst_86 = arith.constant 0.000000e+00 : f32
    %530 = vector.broadcast %cst_86 : f32 to vector<16x128xf32>
    %531 = arith.select %54, %530, %529 : vector<16x128xi1>, vector<16x128xf32>
    %c2_i32_87 = arith.constant 2 : i32
    %532 = tpu.dynamic_rotate %66 by %c2_i32_87 dim 0 : vector<16x128xf32>, i32 -> vector<16x128xf32>
    %533 = arith.subf %66, %532 : vector<16x128xf32>
    %cst_88 = arith.constant 0.000000e+00 : f32
    %534 = vector.broadcast %cst_88 : f32 to vector<16x128xf32>
    %535 = arith.select %54, %534, %533 : vector<16x128xi1>, vector<16x128xf32>
    %c2_i32_89 = arith.constant 2 : i32
    %536 = tpu.dynamic_rotate %68 by %c2_i32_89 dim 0 : vector<16x128xf32>, i32 -> vector<16x128xf32>
    %537 = arith.subf %68, %536 : vector<16x128xf32>
    %cst_90 = arith.constant 0.000000e+00 : f32
    %538 = vector.broadcast %cst_90 : f32 to vector<16x128xf32>
    %539 = arith.select %54, %538, %537 : vector<16x128xi1>, vector<16x128xf32>
    %c2_i32_91 = arith.constant 2 : i32
    %540 = tpu.dynamic_rotate %70 by %c2_i32_91 dim 0 : vector<16x128xf32>, i32 -> vector<16x128xf32>
    %541 = arith.subf %70, %540 : vector<16x128xf32>
    %cst_92 = arith.constant 0.000000e+00 : f32
    %542 = vector.broadcast %cst_92 : f32 to vector<16x128xf32>
    %543 = arith.select %54, %542, %541 : vector<16x128xi1>, vector<16x128xf32>
    %c2_i32_93 = arith.constant 2 : i32
    %544 = tpu.dynamic_rotate %72 by %c2_i32_93 dim 0 : vector<16x128xf32>, i32 -> vector<16x128xf32>
    %545 = arith.subf %72, %544 : vector<16x128xf32>
    %cst_94 = arith.constant 0.000000e+00 : f32
    %546 = vector.broadcast %cst_94 : f32 to vector<16x128xf32>
    %547 = arith.select %54, %546, %545 : vector<16x128xi1>, vector<16x128xf32>
    %548 = vector.broadcast %8 : f32 to vector<16x128xf32>
    %549 = vector.broadcast %20 : f32 to vector<16x128xf32>
    %550 = arith.mulf %527, %548 : vector<16x128xf32>
    %551 = arith.mulf %531, %548 : vector<16x128xf32>
    %552 = arith.mulf %535, %548 : vector<16x128xf32>
    %553 = arith.mulf %539, %548 : vector<16x128xf32>
    %554 = arith.mulf %543, %548 : vector<16x128xf32>
    %555 = arith.mulf %547, %548 : vector<16x128xf32>
    %556 = arith.mulf %550, %550 : vector<16x128xf32>
    %557 = arith.mulf %551, %551 : vector<16x128xf32>
    %558 = arith.addf %556, %557 : vector<16x128xf32>
    %559 = arith.mulf %552, %552 : vector<16x128xf32>
    %560 = arith.addf %558, %559 : vector<16x128xf32>
    %cst_95 = arith.constant 9.99999971E-10 : f32
    %561 = vector.broadcast %cst_95 : f32 to vector<16x128xf32>
    %562 = arith.addf %560, %561 : vector<16x128xf32>
    %563 = math.rsqrt %562 : vector<16x128xf32>
    %564 = arith.mulf %550, %563 : vector<16x128xf32>
    %565 = arith.mulf %551, %563 : vector<16x128xf32>
    %566 = arith.mulf %552, %563 : vector<16x128xf32>
    %567 = arith.mulf %553, %564 : vector<16x128xf32>
    %568 = arith.mulf %554, %565 : vector<16x128xf32>
    %569 = arith.addf %567, %568 : vector<16x128xf32>
    %570 = arith.mulf %555, %566 : vector<16x128xf32>
    %571 = arith.addf %569, %570 : vector<16x128xf32>
    %572 = arith.mulf %40, %571 : vector<16x128xf32>
    %573 = arith.addf %572, %39 : vector<16x128xf32>
    %574 = arith.mulf %550, %549 : vector<16x128xf32>
    %575 = arith.addf %515, %574 : vector<16x128xf32>
    %576 = arith.mulf %564, %573 : vector<16x128xf32>
    %577 = arith.addf %575, %576 : vector<16x128xf32>
    %578 = arith.mulf %551, %549 : vector<16x128xf32>
    %579 = arith.addf %519, %578 : vector<16x128xf32>
    %580 = arith.mulf %565, %573 : vector<16x128xf32>
    %581 = arith.addf %579, %580 : vector<16x128xf32>
    %582 = arith.mulf %552, %549 : vector<16x128xf32>
    %583 = arith.addf %523, %582 : vector<16x128xf32>
    %584 = arith.mulf %566, %573 : vector<16x128xf32>
    %585 = arith.addf %583, %584 : vector<16x128xf32>
    %c2_i32_96 = arith.constant 2 : i32
    %586 = tpu.dynamic_rotate %62 by %c2_i32_96 dim 1 : vector<16x128xf32>, i32 -> vector<16x128xf32>
    %587 = arith.subf %62, %586 : vector<16x128xf32>
    %cst_97 = arith.constant 0.000000e+00 : f32
    %588 = vector.broadcast %cst_97 : f32 to vector<16x128xf32>
    %589 = arith.select %58, %588, %587 : vector<16x128xi1>, vector<16x128xf32>
    %c2_i32_98 = arith.constant 2 : i32
    %590 = tpu.dynamic_rotate %64 by %c2_i32_98 dim 1 : vector<16x128xf32>, i32 -> vector<16x128xf32>
    %591 = arith.subf %64, %590 : vector<16x128xf32>
    %cst_99 = arith.constant 0.000000e+00 : f32
    %592 = vector.broadcast %cst_99 : f32 to vector<16x128xf32>
    %593 = arith.select %58, %592, %591 : vector<16x128xi1>, vector<16x128xf32>
    %c2_i32_100 = arith.constant 2 : i32
    %594 = tpu.dynamic_rotate %66 by %c2_i32_100 dim 1 : vector<16x128xf32>, i32 -> vector<16x128xf32>
    %595 = arith.subf %66, %594 : vector<16x128xf32>
    %cst_101 = arith.constant 0.000000e+00 : f32
    %596 = vector.broadcast %cst_101 : f32 to vector<16x128xf32>
    %597 = arith.select %58, %596, %595 : vector<16x128xi1>, vector<16x128xf32>
    %c2_i32_102 = arith.constant 2 : i32
    %598 = tpu.dynamic_rotate %68 by %c2_i32_102 dim 1 : vector<16x128xf32>, i32 -> vector<16x128xf32>
    %599 = arith.subf %68, %598 : vector<16x128xf32>
    %cst_103 = arith.constant 0.000000e+00 : f32
    %600 = vector.broadcast %cst_103 : f32 to vector<16x128xf32>
    %601 = arith.select %58, %600, %599 : vector<16x128xi1>, vector<16x128xf32>
    %c2_i32_104 = arith.constant 2 : i32
    %602 = tpu.dynamic_rotate %70 by %c2_i32_104 dim 1 : vector<16x128xf32>, i32 -> vector<16x128xf32>
    %603 = arith.subf %70, %602 : vector<16x128xf32>
    %cst_105 = arith.constant 0.000000e+00 : f32
    %604 = vector.broadcast %cst_105 : f32 to vector<16x128xf32>
    %605 = arith.select %58, %604, %603 : vector<16x128xi1>, vector<16x128xf32>
    %c2_i32_106 = arith.constant 2 : i32
    %606 = tpu.dynamic_rotate %72 by %c2_i32_106 dim 1 : vector<16x128xf32>, i32 -> vector<16x128xf32>
    %607 = arith.subf %72, %606 : vector<16x128xf32>
    %cst_107 = arith.constant 0.000000e+00 : f32
    %608 = vector.broadcast %cst_107 : f32 to vector<16x128xf32>
    %609 = arith.select %58, %608, %607 : vector<16x128xi1>, vector<16x128xf32>
    %610 = vector.broadcast %9 : f32 to vector<16x128xf32>
    %611 = vector.broadcast %21 : f32 to vector<16x128xf32>
    %612 = arith.mulf %589, %610 : vector<16x128xf32>
    %613 = arith.mulf %593, %610 : vector<16x128xf32>
    %614 = arith.mulf %597, %610 : vector<16x128xf32>
    %615 = arith.mulf %601, %610 : vector<16x128xf32>
    %616 = arith.mulf %605, %610 : vector<16x128xf32>
    %617 = arith.mulf %609, %610 : vector<16x128xf32>
    %618 = arith.mulf %612, %612 : vector<16x128xf32>
    %619 = arith.mulf %613, %613 : vector<16x128xf32>
    %620 = arith.addf %618, %619 : vector<16x128xf32>
    %621 = arith.mulf %614, %614 : vector<16x128xf32>
    %622 = arith.addf %620, %621 : vector<16x128xf32>
    %cst_108 = arith.constant 9.99999971E-10 : f32
    %623 = vector.broadcast %cst_108 : f32 to vector<16x128xf32>
    %624 = arith.addf %622, %623 : vector<16x128xf32>
    %625 = math.rsqrt %624 : vector<16x128xf32>
    %626 = arith.mulf %612, %625 : vector<16x128xf32>
    %627 = arith.mulf %613, %625 : vector<16x128xf32>
    %628 = arith.mulf %614, %625 : vector<16x128xf32>
    %629 = arith.mulf %615, %626 : vector<16x128xf32>
    %630 = arith.mulf %616, %627 : vector<16x128xf32>
    %631 = arith.addf %629, %630 : vector<16x128xf32>
    %632 = arith.mulf %617, %628 : vector<16x128xf32>
    %633 = arith.addf %631, %632 : vector<16x128xf32>
    %634 = arith.mulf %40, %633 : vector<16x128xf32>
    %635 = arith.addf %634, %39 : vector<16x128xf32>
    %636 = arith.mulf %612, %611 : vector<16x128xf32>
    %637 = arith.addf %577, %636 : vector<16x128xf32>
    %638 = arith.mulf %626, %635 : vector<16x128xf32>
    %639 = arith.addf %637, %638 : vector<16x128xf32>
    %640 = arith.mulf %613, %611 : vector<16x128xf32>
    %641 = arith.addf %581, %640 : vector<16x128xf32>
    %642 = arith.mulf %627, %635 : vector<16x128xf32>
    %643 = arith.addf %641, %642 : vector<16x128xf32>
    %644 = arith.mulf %614, %611 : vector<16x128xf32>
    %645 = arith.addf %585, %644 : vector<16x128xf32>
    %646 = arith.mulf %628, %635 : vector<16x128xf32>
    %647 = arith.addf %645, %646 : vector<16x128xf32>
    %c14_i32_109 = arith.constant 14 : i32
    %648 = tpu.dynamic_rotate %62 by %c14_i32_109 dim 0 : vector<16x128xf32>, i32 -> vector<16x128xf32>
    %649 = arith.subf %62, %648 : vector<16x128xf32>
    %cst_110 = arith.constant 0.000000e+00 : f32
    %650 = vector.broadcast %cst_110 : f32 to vector<16x128xf32>
    %651 = arith.select %56, %650, %649 : vector<16x128xi1>, vector<16x128xf32>
    %c14_i32_111 = arith.constant 14 : i32
    %652 = tpu.dynamic_rotate %64 by %c14_i32_111 dim 0 : vector<16x128xf32>, i32 -> vector<16x128xf32>
    %653 = arith.subf %64, %652 : vector<16x128xf32>
    %cst_112 = arith.constant 0.000000e+00 : f32
    %654 = vector.broadcast %cst_112 : f32 to vector<16x128xf32>
    %655 = arith.select %56, %654, %653 : vector<16x128xi1>, vector<16x128xf32>
    %c14_i32_113 = arith.constant 14 : i32
    %656 = tpu.dynamic_rotate %66 by %c14_i32_113 dim 0 : vector<16x128xf32>, i32 -> vector<16x128xf32>
    %657 = arith.subf %66, %656 : vector<16x128xf32>
    %cst_114 = arith.constant 0.000000e+00 : f32
    %658 = vector.broadcast %cst_114 : f32 to vector<16x128xf32>
    %659 = arith.select %56, %658, %657 : vector<16x128xi1>, vector<16x128xf32>
    %c14_i32_115 = arith.constant 14 : i32
    %660 = tpu.dynamic_rotate %68 by %c14_i32_115 dim 0 : vector<16x128xf32>, i32 -> vector<16x128xf32>
    %661 = arith.subf %68, %660 : vector<16x128xf32>
    %cst_116 = arith.constant 0.000000e+00 : f32
    %662 = vector.broadcast %cst_116 : f32 to vector<16x128xf32>
    %663 = arith.select %56, %662, %661 : vector<16x128xi1>, vector<16x128xf32>
    %c14_i32_117 = arith.constant 14 : i32
    %664 = tpu.dynamic_rotate %70 by %c14_i32_117 dim 0 : vector<16x128xf32>, i32 -> vector<16x128xf32>
    %665 = arith.subf %70, %664 : vector<16x128xf32>
    %cst_118 = arith.constant 0.000000e+00 : f32
    %666 = vector.broadcast %cst_118 : f32 to vector<16x128xf32>
    %667 = arith.select %56, %666, %665 : vector<16x128xi1>, vector<16x128xf32>
    %c14_i32_119 = arith.constant 14 : i32
    %668 = tpu.dynamic_rotate %72 by %c14_i32_119 dim 0 : vector<16x128xf32>, i32 -> vector<16x128xf32>
    %669 = arith.subf %72, %668 : vector<16x128xf32>
    %cst_120 = arith.constant 0.000000e+00 : f32
    %670 = vector.broadcast %cst_120 : f32 to vector<16x128xf32>
    %671 = arith.select %56, %670, %669 : vector<16x128xi1>, vector<16x128xf32>
    %672 = vector.broadcast %10 : f32 to vector<16x128xf32>
    %673 = vector.broadcast %22 : f32 to vector<16x128xf32>
    %674 = arith.mulf %651, %672 : vector<16x128xf32>
    %675 = arith.mulf %655, %672 : vector<16x128xf32>
    %676 = arith.mulf %659, %672 : vector<16x128xf32>
    %677 = arith.mulf %663, %672 : vector<16x128xf32>
    %678 = arith.mulf %667, %672 : vector<16x128xf32>
    %679 = arith.mulf %671, %672 : vector<16x128xf32>
    %680 = arith.mulf %674, %674 : vector<16x128xf32>
    %681 = arith.mulf %675, %675 : vector<16x128xf32>
    %682 = arith.addf %680, %681 : vector<16x128xf32>
    %683 = arith.mulf %676, %676 : vector<16x128xf32>
    %684 = arith.addf %682, %683 : vector<16x128xf32>
    %cst_121 = arith.constant 9.99999971E-10 : f32
    %685 = vector.broadcast %cst_121 : f32 to vector<16x128xf32>
    %686 = arith.addf %684, %685 : vector<16x128xf32>
    %687 = math.rsqrt %686 : vector<16x128xf32>
    %688 = arith.mulf %674, %687 : vector<16x128xf32>
    %689 = arith.mulf %675, %687 : vector<16x128xf32>
    %690 = arith.mulf %676, %687 : vector<16x128xf32>
    %691 = arith.mulf %677, %688 : vector<16x128xf32>
    %692 = arith.mulf %678, %689 : vector<16x128xf32>
    %693 = arith.addf %691, %692 : vector<16x128xf32>
    %694 = arith.mulf %679, %690 : vector<16x128xf32>
    %695 = arith.addf %693, %694 : vector<16x128xf32>
    %696 = arith.mulf %40, %695 : vector<16x128xf32>
    %697 = arith.addf %696, %39 : vector<16x128xf32>
    %698 = arith.mulf %674, %673 : vector<16x128xf32>
    %699 = arith.addf %639, %698 : vector<16x128xf32>
    %700 = arith.mulf %688, %697 : vector<16x128xf32>
    %701 = arith.addf %699, %700 : vector<16x128xf32>
    %702 = arith.mulf %675, %673 : vector<16x128xf32>
    %703 = arith.addf %643, %702 : vector<16x128xf32>
    %704 = arith.mulf %689, %697 : vector<16x128xf32>
    %705 = arith.addf %703, %704 : vector<16x128xf32>
    %706 = arith.mulf %676, %673 : vector<16x128xf32>
    %707 = arith.addf %647, %706 : vector<16x128xf32>
    %708 = arith.mulf %690, %697 : vector<16x128xf32>
    %709 = arith.addf %707, %708 : vector<16x128xf32>
    %c126_i32_122 = arith.constant 126 : i32
    %710 = tpu.dynamic_rotate %62 by %c126_i32_122 dim 1 : vector<16x128xf32>, i32 -> vector<16x128xf32>
    %711 = arith.subf %62, %710 : vector<16x128xf32>
    %cst_123 = arith.constant 0.000000e+00 : f32
    %712 = vector.broadcast %cst_123 : f32 to vector<16x128xf32>
    %713 = arith.select %60, %712, %711 : vector<16x128xi1>, vector<16x128xf32>
    %c126_i32_124 = arith.constant 126 : i32
    %714 = tpu.dynamic_rotate %64 by %c126_i32_124 dim 1 : vector<16x128xf32>, i32 -> vector<16x128xf32>
    %715 = arith.subf %64, %714 : vector<16x128xf32>
    %cst_125 = arith.constant 0.000000e+00 : f32
    %716 = vector.broadcast %cst_125 : f32 to vector<16x128xf32>
    %717 = arith.select %60, %716, %715 : vector<16x128xi1>, vector<16x128xf32>
    %c126_i32_126 = arith.constant 126 : i32
    %718 = tpu.dynamic_rotate %66 by %c126_i32_126 dim 1 : vector<16x128xf32>, i32 -> vector<16x128xf32>
    %719 = arith.subf %66, %718 : vector<16x128xf32>
    %cst_127 = arith.constant 0.000000e+00 : f32
    %720 = vector.broadcast %cst_127 : f32 to vector<16x128xf32>
    %721 = arith.select %60, %720, %719 : vector<16x128xi1>, vector<16x128xf32>
    %c126_i32_128 = arith.constant 126 : i32
    %722 = tpu.dynamic_rotate %68 by %c126_i32_128 dim 1 : vector<16x128xf32>, i32 -> vector<16x128xf32>
    %723 = arith.subf %68, %722 : vector<16x128xf32>
    %cst_129 = arith.constant 0.000000e+00 : f32
    %724 = vector.broadcast %cst_129 : f32 to vector<16x128xf32>
    %725 = arith.select %60, %724, %723 : vector<16x128xi1>, vector<16x128xf32>
    %c126_i32_130 = arith.constant 126 : i32
    %726 = tpu.dynamic_rotate %70 by %c126_i32_130 dim 1 : vector<16x128xf32>, i32 -> vector<16x128xf32>
    %727 = arith.subf %70, %726 : vector<16x128xf32>
    %cst_131 = arith.constant 0.000000e+00 : f32
    %728 = vector.broadcast %cst_131 : f32 to vector<16x128xf32>
    %729 = arith.select %60, %728, %727 : vector<16x128xi1>, vector<16x128xf32>
    %c126_i32_132 = arith.constant 126 : i32
    %730 = tpu.dynamic_rotate %72 by %c126_i32_132 dim 1 : vector<16x128xf32>, i32 -> vector<16x128xf32>
    %731 = arith.subf %72, %730 : vector<16x128xf32>
    %cst_133 = arith.constant 0.000000e+00 : f32
    %732 = vector.broadcast %cst_133 : f32 to vector<16x128xf32>
    %733 = arith.select %60, %732, %731 : vector<16x128xi1>, vector<16x128xf32>
    %734 = vector.broadcast %11 : f32 to vector<16x128xf32>
    %735 = vector.broadcast %23 : f32 to vector<16x128xf32>
    %736 = arith.mulf %713, %734 : vector<16x128xf32>
    %737 = arith.mulf %717, %734 : vector<16x128xf32>
    %738 = arith.mulf %721, %734 : vector<16x128xf32>
    %739 = arith.mulf %725, %734 : vector<16x128xf32>
    %740 = arith.mulf %729, %734 : vector<16x128xf32>
    %741 = arith.mulf %733, %734 : vector<16x128xf32>
    %742 = arith.mulf %736, %736 : vector<16x128xf32>
    %743 = arith.mulf %737, %737 : vector<16x128xf32>
    %744 = arith.addf %742, %743 : vector<16x128xf32>
    %745 = arith.mulf %738, %738 : vector<16x128xf32>
    %746 = arith.addf %744, %745 : vector<16x128xf32>
    %cst_134 = arith.constant 9.99999971E-10 : f32
    %747 = vector.broadcast %cst_134 : f32 to vector<16x128xf32>
    %748 = arith.addf %746, %747 : vector<16x128xf32>
    %749 = math.rsqrt %748 : vector<16x128xf32>
    %750 = arith.mulf %736, %749 : vector<16x128xf32>
    %751 = arith.mulf %737, %749 : vector<16x128xf32>
    %752 = arith.mulf %738, %749 : vector<16x128xf32>
    %753 = arith.mulf %739, %750 : vector<16x128xf32>
    %754 = arith.mulf %740, %751 : vector<16x128xf32>
    %755 = arith.addf %753, %754 : vector<16x128xf32>
    %756 = arith.mulf %741, %752 : vector<16x128xf32>
    %757 = arith.addf %755, %756 : vector<16x128xf32>
    %758 = arith.mulf %40, %757 : vector<16x128xf32>
    %759 = arith.addf %758, %39 : vector<16x128xf32>
    %760 = arith.mulf %736, %735 : vector<16x128xf32>
    %761 = arith.addf %701, %760 : vector<16x128xf32>
    %762 = arith.mulf %750, %759 : vector<16x128xf32>
    %763 = arith.addf %761, %762 : vector<16x128xf32>
    %764 = arith.mulf %737, %735 : vector<16x128xf32>
    %765 = arith.addf %705, %764 : vector<16x128xf32>
    %766 = arith.mulf %751, %759 : vector<16x128xf32>
    %767 = arith.addf %765, %766 : vector<16x128xf32>
    %768 = arith.mulf %738, %735 : vector<16x128xf32>
    %769 = arith.addf %709, %768 : vector<16x128xf32>
    %770 = arith.mulf %752, %759 : vector<16x128xf32>
    %771 = arith.addf %769, %770 : vector<16x128xf32>
    %772 = vector.broadcast %26 : f32 to vector<16x128xf32>
    %773 = arith.addf %763, %772 : vector<16x128xf32>
    %774 = arith.mulf %773, %41 : vector<16x128xf32>
    %775 = vector.broadcast %27 : f32 to vector<16x128xf32>
    %776 = arith.addf %767, %775 : vector<16x128xf32>
    %777 = arith.mulf %776, %41 : vector<16x128xf32>
    %778 = vector.broadcast %28 : f32 to vector<16x128xf32>
    %779 = arith.addf %771, %778 : vector<16x128xf32>
    %780 = arith.mulf %779, %41 : vector<16x128xf32>
    %781 = arith.mulf %101, %420 : vector<16x128xf32>
    %782 = arith.mulf %102, %417 : vector<16x128xf32>
    %783 = arith.subf %781, %782 : vector<16x128xf32>
    %784 = arith.mulf %102, %414 : vector<16x128xf32>
    %785 = arith.mulf %100, %420 : vector<16x128xf32>
    %786 = arith.subf %784, %785 : vector<16x128xf32>
    %787 = arith.mulf %100, %417 : vector<16x128xf32>
    %788 = arith.mulf %101, %414 : vector<16x128xf32>
    %789 = arith.subf %787, %788 : vector<16x128xf32>
    %790 = arith.mulf %417, %314 : vector<16x128xf32>
    %791 = arith.mulf %420, %313 : vector<16x128xf32>
    %792 = arith.subf %790, %791 : vector<16x128xf32>
    %793 = arith.mulf %420, %312 : vector<16x128xf32>
    %794 = arith.mulf %414, %314 : vector<16x128xf32>
    %795 = arith.subf %793, %794 : vector<16x128xf32>
    %796 = arith.mulf %414, %313 : vector<16x128xf32>
    %797 = arith.mulf %417, %312 : vector<16x128xf32>
    %798 = arith.subf %796, %797 : vector<16x128xf32>
    %799 = arith.mulf %313, %208 : vector<16x128xf32>
    %800 = arith.mulf %314, %205 : vector<16x128xf32>
    %801 = arith.subf %799, %800 : vector<16x128xf32>
    %802 = arith.mulf %314, %202 : vector<16x128xf32>
    %803 = arith.mulf %312, %208 : vector<16x128xf32>
    %804 = arith.subf %802, %803 : vector<16x128xf32>
    %805 = arith.mulf %312, %205 : vector<16x128xf32>
    %806 = arith.mulf %313, %202 : vector<16x128xf32>
    %807 = arith.subf %805, %806 : vector<16x128xf32>
    %808 = arith.mulf %205, %102 : vector<16x128xf32>
    %809 = arith.mulf %208, %101 : vector<16x128xf32>
    %810 = arith.subf %808, %809 : vector<16x128xf32>
    %811 = arith.mulf %208, %100 : vector<16x128xf32>
    %812 = arith.mulf %202, %102 : vector<16x128xf32>
    %813 = arith.subf %811, %812 : vector<16x128xf32>
    %814 = arith.mulf %202, %101 : vector<16x128xf32>
    %815 = arith.mulf %205, %100 : vector<16x128xf32>
    %816 = arith.subf %814, %815 : vector<16x128xf32>
    %817 = arith.addf %783, %792 : vector<16x128xf32>
    %818 = arith.addf %817, %801 : vector<16x128xf32>
    %819 = arith.addf %818, %810 : vector<16x128xf32>
    %820 = vector.broadcast %37 : f32 to vector<16x128xf32>
    %821 = arith.mulf %819, %820 : vector<16x128xf32>
    %822 = arith.addf %774, %821 : vector<16x128xf32>
    %823 = arith.addf %786, %795 : vector<16x128xf32>
    %824 = arith.addf %823, %804 : vector<16x128xf32>
    %825 = arith.addf %824, %813 : vector<16x128xf32>
    %826 = vector.broadcast %37 : f32 to vector<16x128xf32>
    %827 = arith.mulf %825, %826 : vector<16x128xf32>
    %828 = arith.addf %777, %827 : vector<16x128xf32>
    %829 = arith.addf %789, %798 : vector<16x128xf32>
    %830 = arith.addf %829, %807 : vector<16x128xf32>
    %831 = arith.addf %830, %816 : vector<16x128xf32>
    %832 = vector.broadcast %37 : f32 to vector<16x128xf32>
    %833 = arith.mulf %831, %832 : vector<16x128xf32>
    %834 = arith.addf %780, %833 : vector<16x128xf32>
    %835 = arith.mulf %68, %42 : vector<16x128xf32>
    %836 = arith.addf %835, %822 : vector<16x128xf32>
    %837 = arith.mulf %70, %42 : vector<16x128xf32>
    %838 = arith.addf %837, %828 : vector<16x128xf32>
    %839 = arith.mulf %72, %42 : vector<16x128xf32>
    %840 = arith.addf %839, %834 : vector<16x128xf32>
    %841 = vector.broadcast %33 : f32 to vector<16x128xf32>
    %842 = arith.subf %62, %841 : vector<16x128xf32>
    %843 = vector.broadcast %34 : f32 to vector<16x128xf32>
    %844 = arith.subf %64, %843 : vector<16x128xf32>
    %845 = vector.broadcast %35 : f32 to vector<16x128xf32>
    %846 = arith.subf %66, %845 : vector<16x128xf32>
    %847 = arith.mulf %842, %842 : vector<16x128xf32>
    %848 = arith.mulf %844, %844 : vector<16x128xf32>
    %849 = arith.addf %847, %848 : vector<16x128xf32>
    %850 = arith.mulf %846, %846 : vector<16x128xf32>
    %851 = arith.addf %849, %850 : vector<16x128xf32>
    %cst_135 = arith.constant 1.000000e-10 : f32
    %852 = vector.broadcast %cst_135 : f32 to vector<16x128xf32>
    %853 = arith.addf %851, %852 : vector<16x128xf32>
    %854 = math.rsqrt %853 : vector<16x128xf32>
    %855 = arith.mulf %842, %854 : vector<16x128xf32>
    %856 = arith.mulf %844, %854 : vector<16x128xf32>
    %857 = arith.mulf %846, %854 : vector<16x128xf32>
    %858 = vector.broadcast %38 : f32 to vector<16x128xf32>
    %859 = arith.cmpf ole, %853, %858 : vector<16x128xf32>
    %860 = arith.extui %859 : vector<16x128xi1> to vector<16x128xi32>
    %861 = arith.sitofp %860 : vector<16x128xi32> to vector<16x128xf32>
    %862 = arith.mulf %836, %855 : vector<16x128xf32>
    %863 = arith.mulf %838, %856 : vector<16x128xf32>
    %864 = arith.addf %862, %863 : vector<16x128xf32>
    %865 = arith.mulf %840, %857 : vector<16x128xf32>
    %866 = arith.addf %864, %865 : vector<16x128xf32>
    %cst_136 = arith.constant 0.000000e+00 : f32
    %867 = vector.broadcast %cst_136 : f32 to vector<16x128xf32>
    %868 = arith.cmpf olt, %866, %867 : vector<16x128xf32>
    %869 = arith.extui %868 : vector<16x128xi1> to vector<16x128xi32>
    %870 = arith.sitofp %869 : vector<16x128xi32> to vector<16x128xf32>
    %871 = arith.mulf %861, %870 : vector<16x128xf32>
    %872 = arith.mulf %871, %866 : vector<16x128xf32>
    %873 = arith.mulf %872, %855 : vector<16x128xf32>
    %874 = arith.subf %836, %873 : vector<16x128xf32>
    %875 = arith.mulf %871, %866 : vector<16x128xf32>
    %876 = arith.mulf %875, %856 : vector<16x128xf32>
    %877 = arith.subf %838, %876 : vector<16x128xf32>
    %878 = arith.mulf %871, %866 : vector<16x128xf32>
    %879 = arith.mulf %878, %857 : vector<16x128xf32>
    %880 = arith.subf %840, %879 : vector<16x128xf32>
    %cst_137 = arith.constant 5.000000e-02 : f32
    %881 = vector.broadcast %cst_137 : f32 to vector<16x128xf32>
    %882 = arith.mulf %881, %871 : vector<16x128xf32>
    %cst_138 = arith.constant 1.000000e+00 : f32
    %883 = vector.broadcast %cst_138 : f32 to vector<16x128xf32>
    %884 = arith.subf %883, %882 : vector<16x128xf32>
    %885 = arith.mulf %874, %884 : vector<16x128xf32>
    %cst_139 = arith.constant 5.000000e-02 : f32
    %886 = vector.broadcast %cst_139 : f32 to vector<16x128xf32>
    %887 = arith.mulf %886, %871 : vector<16x128xf32>
    %cst_140 = arith.constant 1.000000e+00 : f32
    %888 = vector.broadcast %cst_140 : f32 to vector<16x128xf32>
    %889 = arith.subf %888, %887 : vector<16x128xf32>
    %890 = arith.mulf %877, %889 : vector<16x128xf32>
    %cst_141 = arith.constant 5.000000e-02 : f32
    %891 = vector.broadcast %cst_141 : f32 to vector<16x128xf32>
    %892 = arith.mulf %891, %871 : vector<16x128xf32>
    %cst_142 = arith.constant 1.000000e+00 : f32
    %893 = vector.broadcast %cst_142 : f32 to vector<16x128xf32>
    %894 = arith.subf %893, %892 : vector<16x128xf32>
    %895 = arith.mulf %880, %894 : vector<16x128xf32>
    %896 = arith.mulf %41, %885 : vector<16x128xf32>
    %897 = arith.addf %62, %896 : vector<16x128xf32>
    %c0_143 = arith.constant 0 : index
    %c0_144 = arith.constant 0 : index
    %c0_145 = arith.constant 0 : index
    %c0_146 = arith.constant 0 : index
    %898 = vector.load %arg3[%c0_143, %c0_144, %c0_145, %c0_146] : memref<1x6x16x128xf32, #tpu.memory_space<vmem>>, vector<1x1x16x128xf32>
    %899 = vector.shape_cast %898 : vector<1x1x16x128xf32> to vector<16x128xf32>
    %900 = vector.shape_cast %897 : vector<16x128xf32> to vector<1x1x16x128xf32>
    tpu.vector_store %arg3[%c0_143, %c0_144, %c0_145, %c0_146], %900 {strides = array<i32>} : memref<1x6x16x128xf32, #tpu.memory_space<vmem>>, vector<1x1x16x128xf32>,
    %c0_147 = arith.constant 0 : index
    %c3_148 = arith.constant 3 : index
    %c0_149 = arith.constant 0 : index
    %c0_150 = arith.constant 0 : index
    %901 = vector.load %arg3[%c0_147, %c3_148, %c0_149, %c0_150] : memref<1x6x16x128xf32, #tpu.memory_space<vmem>>, vector<1x1x16x128xf32>
    %902 = vector.shape_cast %901 : vector<1x1x16x128xf32> to vector<16x128xf32>
    %903 = vector.shape_cast %885 : vector<16x128xf32> to vector<1x1x16x128xf32>
    tpu.vector_store %arg3[%c0_147, %c3_148, %c0_149, %c0_150], %903 {strides = array<i32>} : memref<1x6x16x128xf32, #tpu.memory_space<vmem>>, vector<1x1x16x128xf32>,
    %904 = arith.mulf %41, %890 : vector<16x128xf32>
    %905 = arith.addf %64, %904 : vector<16x128xf32>
    %c0_151 = arith.constant 0 : index
    %c1_152 = arith.constant 1 : index
    %c0_153 = arith.constant 0 : index
    %c0_154 = arith.constant 0 : index
    %906 = vector.load %arg3[%c0_151, %c1_152, %c0_153, %c0_154] : memref<1x6x16x128xf32, #tpu.memory_space<vmem>>, vector<1x1x16x128xf32>
    %907 = vector.shape_cast %906 : vector<1x1x16x128xf32> to vector<16x128xf32>
    %908 = vector.shape_cast %905 : vector<16x128xf32> to vector<1x1x16x128xf32>
    tpu.vector_store %arg3[%c0_151, %c1_152, %c0_153, %c0_154], %908 {strides = array<i32>} : memref<1x6x16x128xf32, #tpu.memory_space<vmem>>, vector<1x1x16x128xf32>,
    %c0_155 = arith.constant 0 : index
    %c4_156 = arith.constant 4 : index
    %c0_157 = arith.constant 0 : index
    %c0_158 = arith.constant 0 : index
    %909 = vector.load %arg3[%c0_155, %c4_156, %c0_157, %c0_158] : memref<1x6x16x128xf32, #tpu.memory_space<vmem>>, vector<1x1x16x128xf32>
    %910 = vector.shape_cast %909 : vector<1x1x16x128xf32> to vector<16x128xf32>
    %911 = vector.shape_cast %890 : vector<16x128xf32> to vector<1x1x16x128xf32>
    tpu.vector_store %arg3[%c0_155, %c4_156, %c0_157, %c0_158], %911 {strides = array<i32>} : memref<1x6x16x128xf32, #tpu.memory_space<vmem>>, vector<1x1x16x128xf32>,
    %912 = arith.mulf %41, %895 : vector<16x128xf32>
    %913 = arith.addf %66, %912 : vector<16x128xf32>
    %c0_159 = arith.constant 0 : index
    %c2_160 = arith.constant 2 : index
    %c0_161 = arith.constant 0 : index
    %c0_162 = arith.constant 0 : index
    %914 = vector.load %arg3[%c0_159, %c2_160, %c0_161, %c0_162] : memref<1x6x16x128xf32, #tpu.memory_space<vmem>>, vector<1x1x16x128xf32>
    %915 = vector.shape_cast %914 : vector<1x1x16x128xf32> to vector<16x128xf32>
    %916 = vector.shape_cast %913 : vector<16x128xf32> to vector<1x1x16x128xf32>
    tpu.vector_store %arg3[%c0_159, %c2_160, %c0_161, %c0_162], %916 {strides = array<i32>} : memref<1x6x16x128xf32, #tpu.memory_space<vmem>>, vector<1x1x16x128xf32>,
    %c0_163 = arith.constant 0 : index
    %c5_164 = arith.constant 5 : index
    %c0_165 = arith.constant 0 : index
    %c0_166 = arith.constant 0 : index
    %917 = vector.load %arg3[%c0_163, %c5_164, %c0_165, %c0_166] : memref<1x6x16x128xf32, #tpu.memory_space<vmem>>, vector<1x1x16x128xf32>
    %918 = vector.shape_cast %917 : vector<1x1x16x128xf32> to vector<16x128xf32>
    %919 = vector.shape_cast %895 : vector<16x128xf32> to vector<1x1x16x128xf32>
    tpu.vector_store %arg3[%c0_163, %c5_164, %c0_165, %c0_166], %919 {strides = array<i32>} : memref<1x6x16x128xf32, #tpu.memory_space<vmem>>, vector<1x1x16x128xf32>,
    return
  }
  func.func @transform_0(%arg0: i32) -> i32 {
    %c0_i32 = arith.constant 0 : i32
    %c0_i32_0 = arith.constant 0 : i32
    return %c0_i32 : i32
  }
  func.func @transform_1(%arg0: i32) -> (i32, i32, i32, i32) {
    %c0_i32 = arith.constant 0 : i32
    %c0_i32_0 = arith.constant 0 : i32
    %c0_i32_1 = arith.constant 0 : i32
    %c0_i32_2 = arith.constant 0 : i32
    return %arg0, %c0_i32, %c0_i32_0, %c0_i32_1 : i32, i32, i32, i32
  }
  func.func @transform_2(%arg0: i32) -> (i32, i32, i32, i32) {
    %c0_i32 = arith.constant 0 : i32
    %c0_i32_0 = arith.constant 0 : i32
    %c0_i32_1 = arith.constant 0 : i32
    %c0_i32_2 = arith.constant 0 : i32
    return %arg0, %c0_i32, %c0_i32_0, %c0_i32_1 : i32, i32, i32, i32
  }
}

</mosaic_0001>

<bundles_post_ra>
// kernel: cloth_net.1
= control target key start
LH: loop header
LB: loop body
LE: loop exit
PB: predicated region body
PF: predicated region fallthrough
CT: control target
= control target key end

     0   :  { %7 = vsyncpa [#allocation5], 0  ;;  %s6059_s0 = inlined_call_operand.vmem [shape: f32[40], index: 0, kind: input, shape index: {}]   ;;  %s6060_s1 = inlined_call_operand.hbm [shape: f32[2,6,16,128], index: 1, kind: input, shape index: {}, may-alias: {1,2}]   ;;  %s6061_s2 = inlined_call_operand.hbm [shape: f32[2,6,16,128], index: 2, kind: output, shape index: {}, may-alias: {1,2}]  }
   0x1   :  { %8 = vsyncpa [#allocation3], 0 }
   0x2   :  { %10 = vsyncpa [#allocation3 + $0x1], 0 }
   0x3   :  { %11 = vsyncpa [#allocation4], 0 }
   0x4   :  { %13 = vsyncpa [#allocation4 + $0x1], 0  ;;  %s2639_s9 = smov 0   ;;  %s2641_s10 = smov 0  }
   0x5   :  { %s2643_s11 = smov 0   ;;  %s2645_s12 = smov 0  }
   0x6 LB: > { %s2660_s13 = sadd.s32 4294967295, %s2612_s12   ;;  %s2270_s14 = sadd.s32 4294967294, %s2612_s12   ;;  %s2612_s12 = sphi %s2645_s12, %s6726_s12   ;;  %s2608_s11 = sphi %s2643_s11, %s6725_s11   ;;  %s2604_s10 = sphi %s2641_s10, %s6724_s10   ;;  %s2600_s9 = sphi %s2639_s9, %s6723_s9  }
   0x7   : > { %s2664_s15 = sadd.s32 1, %s2612_s12   ;;  %s47_s16 = sadd.s32 1, %s2608_s11 }
   0x8   : > { %s44_s17 = ssub.s32 %s2612_s12, %s2664_s15  ;;  %p54_p0 = scmp.ne.s32.totalorder %s2608_s11, %s2604_s10 }
   0x9   : > { %p45_p1 = scmp.eq.s32.totalorder %s44_s17, 0  ;;  %p55_p2 = scmp.eq.s32.totalorder %s2612_s12, 0 }
   0xa   : > { %p60_p3 = scmp.ne.s32.totalorder %s2604_s10, %s2600_s9  ;;  %p61_p4 = scmp.eq.s32.totalorder %s2660_s13, 0 }
   0xb   : > { %s2676_s18 = scalar_select %p45_p1, %s2608_s11, %s47_s16  }
   0xc   : > { %p2678_p5 = por %p55_p2, %p54_p0  ;;  %p2684_p6 = por %p61_p4, %p60_p3 }
   0xd   : > { %p84_p7 = scmp.eq.s32.totalorder %s2660_s13, 1  ;;  %p90_p8 = scmp.eq.s32.totalorder %s2270_s14, 1 }
   0xe   : > { %p2271_p9 = scmp.ge.s32.totalorder %s2612_s12, 1  ;;  %p97_p10 = scmp.lt.s32.totalorder %s2612_s12, 3 }
   0xf   : > { %p2691_p11 = por %p84_p7, %p54_p0  ;;  %p2695_p12 = por %p90_p8, %p60_p3 }
  0x10   : > { %p2699_p13 = pnand %p2271_p9, %p97_p10  ;;  %s109_s26 = sshll.u32 %s6059_s0, 4  ;;  %s110_s26 = int_to_ptr.vmem [resolvable:$true] %s109_s26 }
  0x11   : > { %p2364_p2 = scmp.lt.s32.totalorder %s2612_s12, 2  ;;  %s120_s27 = sand.u32 1, %s2608_s11  }
  0x12   : > { %p2351_p1 = pneg %p2699_p13  ;;  %s2339_s29 = smul.u32 96, %s120_s27 }
  0x13   : > { %p2715_p3 = pnand %p2364_p2, %p2678_p5  ;;  %s2614_s30 = smov [#allocation2]  }
  0x14   : > { %p2352_p7 = pnand %p2351_p1, %p61_p4  ;;  %s2340_s3 = smul.u32 96, %s2612_s12 }
  0x15   : > { %s124_s4 = scalar_lea.vmem [#allocation6], %s2339_s29  ;;  %s121_s16 = scalar_lea.sflag [#allocation3], %s120_s27 }
  0x16   : > { %2354 = dma.vmem_to_smem (!%p2352_p7), %s110_s26, 16, %s2614_s30, [#allocation5]  }
  0x17   : > { %s132_s5 = sshll.u32 %s124_s4, 4  ;;  %s129_s8 = scalar_lea.hbm %s6060_s1, %s2340_s3  ;;  %s133_s5 = int_to_ptr.vmem [resolvable:$true] %s132_s5 }
  0x18   : > { %s130_s14 = sshll.u32 %s129_s8, 4  ;;  %p2516_p8 = pneg %p2715_p3  ;;  %s131_s14 = int_to_ptr.hbm [resolvable:$true] %s130_s14 }
  0x19   : > { %s2512_s17 = sshra.s32 %s131_s14, 4  ;;  %s2519_s26 = scalar_lea.hbm %s6060_s1, 192  ;;  %s2513_s17 = int_to_ptr.hbm [resolvable:$true] %s2512_s17 }
  0x1a   : > { %s2514_s19 = scalar_lea.hbm %s2513_s17, 96  ;;  %p2520_p1 = scmp.lt.s32.totalorder %s2513_s17, %s6060_s1 }
  0x1b   : > { %p2515_p5 = scmp.ne.s32.totalorder %s2513_s17, %s2514_s19  ;;  %p2521_p2 = scmp.lt.s32.totalorder %s2519_s26, %s2514_s19 }
  0x1d   : > { %p2517_p9 = pnand %p2516_p8, %p2515_p5  ;;  %p2522_p7 = por %p2521_p2, %p2520_p1 }
  0x1f   : > { %p2518_p10 = pneg %p2517_p9 }
  0x21   : > { %p2523_p0 = pnand %p2522_p7, %p2518_p10 }
  0x23   : > { %2526 = shalt.err (!%p2523_p0)
}
  0x24   : > { %s2615_s27 = smov 128   ;;  %s2616_s3 = smov 8  }
  0x25   : > { %2358 = dma.hbm_to_vmem [thread:$0]  (!%p2715_p3), %s131_s14, 1536, %s133_s5, %s121_s16, %s2615_s27, %s2615_s27, %s2616_s3  }
  0x26   : > { %144 = sbr.rel (%p2699_p13) target bundleno = 571 (0x23b), region = 28 }
  0x2b   : > { %2587 = dma.done.wait (%p61_p4), [#allocation5], 16  }
  0x2c   : > { %2589 = vsyncadd (%p61_p4), [#allocation5], 4294967280  ;;  %s2740_s4 = sand.u32 1, %s2604_s10  }
  0x2d   : > { %s2341_s6 = smul.u32 96, %s2740_s4  ;;  %s152_s7 = scalar_lea.sflag [#allocation3], %s2740_s4 }
  0x2f   : > { %s2746_s28 = scalar_lea.vmem [#allocation6], %s2341_s6 }
  0x30   : > { %2591 = dma.done.wait (%p2684_p6), %s152_s7, 1536  }
  0x31   : > { %2593 = vsyncadd (%p2684_p6), %s152_s7, 4294965760 }
  0x32   : > { %161 = sfence }
  0x33   : > { %v6068_v0 = vlaneseq  ;;  %v2753_v1 = vld [vmem:[%s2746_s28 + $0x20] sm:$0xff]  ;;  %v2756_v2 = vld [vmem:[%s2746_s28 + $0x28] sm:$0xff]  ;;  %v2759_v3 = vld [vmem:[%s2746_s28 + $0x10] sm:$0xff]  ;;  %s2617_s20 = smov 1   ;;  %s178_s23 = sld [smem:[#allocation2]] }
  0x34   : > { %v268_v4 = vrot.slane %v2753_v1, 7  ;;  %v269_v5 = vrot.slane %v2756_v2, 7  ;;  %v2764_v6 = vld [vmem:[%s2746_s28 + $0x18] sm:$0xff]  ;;  %v2767_v7 = vld [vmem:[%s2746_s28] sm:$0xff]  ;;  %v2770_v8 = vld [vmem:[%s2746_s28 + $0x8] sm:$0xff]  ;;  %v262_v10 = vrot.slane %v2759_v3, 7 }
  0x35   : > { %6296 = vst [vmem:[#allocation11_spill] sm:$0xff] %v2764_v6  ;;  %v2773_v9 = vshrl.u32 %v6068_v0, 7  ;;  %v263_v11 = vrot.slane %v2764_v6, 7  ;;  %v255_v12 = vrot.slane %v2767_v7, 7  ;;  %v256_v13 = vrot.slane %v2770_v8, 7  ;;  %v2809_v20 = vld [vmem:[%s2746_s28 + $0x40] sm:$0xff] }
  0x36   : > { %6297 = vst [vmem:[#allocation12_spill] sm:$0xff] %v2767_v7  ;;  %v2812_v21 = vld [vmem:[%s2746_s28 + $0x48] sm:$0xff]  ;;  %v2815_v22 = vld [vmem:[%s2746_s28 + $0x30] sm:$0xff]  ;;  %v2818_v23 = vld [vmem:[%s2746_s28 + $0x38] sm:$0xff]  ;;  %v280_v27 = vrot.slane %v2809_v20, 7  ;;  %v6066_v44 = vrot.slane %v2767_v7, 2 }
  0x37   : > { %6298 = vst [vmem:[#allocation13_spill] sm:$0xff] %v2770_v8  ;;  %vm226_vm0 = vcmp.eq.s32.totalorder %v2773_v9, 0  ;;  %vm257_vm1 = vcmp.lt.s32.totalorder %v2773_v9, 1  ;;  %v281_v28 = vrot.slane %v2812_v21, 7  ;;  %v274_v29 = vrot.slane %v2815_v22, 7  ;;  %v2847_v33 = vld [vmem:[%s2746_s28 + $0x50] sm:$0xff] }
  0x38   : > { %6299 = vst [vmem:[#allocation14_spill] sm:$0xff] %v2773_v9  ;;  %v271_v14 = vsel %vm257_vm1, %v269_v5, %v268_v4  ;;  %v265_v15 = vsel %vm257_vm1, %v263_v11, %v262_v10  ;;  %v259_v16 = vsel %vm257_vm1, %v256_v13, %v255_v12  ;;  %v2822_v24 = vsel %vm257_vm1, %v268_v4, %v269_v5  ;;  %v2850_v34 = vld [vmem:[%s2746_s28 + $0x58] sm:$0xff]  ;;  %s2280_s5 = sld [smem:[#allocation2 + $0x4]]  ;;  %s2618_s8 = smov 127  }
  0x39   : > { %v2790_v17 = vsel %vm226_vm0, %v2753_v1, %v271_v14  ;;  %v2795_v18 = vsel %vm226_vm0, %v2759_v3, %v265_v15  ;;  %v2800_v19 = vsel %vm226_vm0, %v2767_v7, %v259_v16  ;;  %6303 = vst [vmem:[#allocation18_spill] sm:$0xff] %v2812_v21  ;;  %v2826_v25 = vsel %vm257_vm1, %v262_v10, %v263_v11  ;;  %s2301_s14 = sld [smem:[#allocation2 + $0x19]]  ;;  %s2619_s29 = smov 2  }
  0x3a   : > { %6300 = vst [vmem:[#allocation15_spill] sm:$0xff] %v2790_v17  ;;  %447 = vrot.lane.b32.xlu2 %v2790_v17, %s2617_s20  ;;  %439 = vrot.lane.b32.xlu1 %v2795_v18, %s2617_s20  ;;  %v2830_v26 = vsel %vm257_vm1, %v255_v12, %v256_v13  ;;  %v275_v30 = vrot.slane %v2818_v23, 7  ;;  %v283_v31 = vsel %vm257_vm1, %v281_v28, %v280_v27  ;;  %v286_v38 = vrot.slane %v2847_v33, 7  ;;  %s2277_s16 = sld [smem:[#allocation2 + $0x1]]  ;;  %s2620_s27 = smov 126  }
  0x3b   : > { %6301 = vst [vmem:[#allocation16_spill] sm:$0xff] %v2795_v18  ;;  %431 = vrot.lane.b32.xlu0 %v2800_v19, %s2617_s20  ;;  %v2855_v35 = vsel %vm226_vm0, %v2809_v20, %v283_v31  ;;  %v287_v39 = vrot.slane %v2850_v34, 7  ;;  %v2887_v43 = vsel %vm257_vm1, %v280_v27, %v281_v28  ;;  %vm1639_vm2 = vcmp.lt.s32.totalorder %v2773_v9, 6  ;;  %s3300_s17 = sld [smem:[#allocation2 + $0x18]] }
  0x3c   : > { %6302 = vst [vmem:[#allocation17_spill] sm:$0xff] %v2800_v19  ;;  %v277_v32 = vsel %vm257_vm1, %v275_v30, %v274_v29  ;;  %v2859_v36 = vsel %vm257_vm1, %v274_v29, %v275_v30  ;;  %v2904_v45 = vadd.s32 8, %v2773_v9  ;;  %v6067_v46 = vrot.slane %v2770_v8, 2  ;;  %s3313_s19 = sld [smem:[#allocation2 + $0xc]] }
  0x3d   : > { %6304 = vst [vmem:[#allocation19_spill] sm:$0xff] %v2815_v22  ;;  %v2864_v37 = vsel %vm226_vm0, %v2815_v22, %v277_v32  ;;  %v289_v40 = vsel %vm257_vm1, %v287_v39, %v286_v38  ;;  %v2878_v41 = vsel %vm257_vm1, %v286_v38, %v287_v39  ;;  %v6064_v47 = vrot.slane %v2815_v22, 2  ;;  %s3373_s24 = sld [smem:[#allocation2 + $0xd]] }
  0x3e   : > { %6305 = vst [vmem:[#allocation20_spill] sm:$0xff] %v2818_v23  ;;  %v2883_v42 = vsel %vm226_vm0, %v2847_v33, %v289_v40  ;;  %v6065_v48 = vrot.slane %v2818_v23, 2  ;;  %v6062_v49 = vrot.slane %v2847_v33, 2  ;;  %v6063_v50 = vrot.slane %v2850_v34, 2  ;;  %s3462_s25 = sld [smem:[#allocation2 + $0x2]] }
  0x3f   : > { %6306 = vst [vmem:[#allocation21_spill] sm:$0xff] %v2822_v24  ;;  %vm235_vm3 = vcmp.ge.s32.totalorder %v2904_v45, 14  ;;  %v1641_v51 = vsel %vm1639_vm2, %v6067_v46, %v6066_v44  ;;  %v2932_v55 = vsub.f32 %v2759_v3, %v2795_v18  ;;  %v2936_v56 = vsub.f32 %v2767_v7, %v2800_v19  ;;  %s3485_s26 = sld [smem:[#allocation2 + $0xe]] }
  0x40   : > { %6307 = vst [vmem:[#allocation22_spill] sm:$0xff] %v2826_v25  ;;  %v1665_v52 = vsel %vm1639_vm2, %v6065_v48, %v6064_v47  ;;  %v1643_v53 = vsub.f32 %v2770_v8, %v1641_v51  ;;  %v1681_v57 = vsel %vm1639_vm2, %v6063_v50, %v6062_v49  ;;  %v2946_v58 = vstv %s178_s23  ;;  %s3808_s30 = sld [smem:[#allocation2 + $0x3]] }
  0x41   : > { %6308 = vst [vmem:[#allocation23_spill] sm:$0xff] %v2830_v26  ;;  %v1667_v54 = vsub.f32 %v2818_v23, %v1665_v52  ;;  %v1683_v61 = vsub.f32 %v2850_v34, %v1681_v57  ;;  %v2963_v63 = vsub.f32 %v2753_v1, %v2790_v17  ;;  %v2967_v4 = vmul.f32 %v2946_v58, %v2936_v56  ;;  %s4032_s3 = sld [smem:[#allocation2 + $0xf]] }
  0x42   : > { %449 = vrot.lane.b32.xlu2 %v2822_v24, %s2617_s20  ;;  %441 = vrot.lane.b32.xlu1 %v2826_v25, %s2617_s20  ;;  %6309 = vst [vmem:[#allocation24_spill] sm:$0xff] %v2847_v33  ;;  %v2950_v59 = vsel %vm235_vm3, 0.0, %v1643_v53  ;;  %v2971_v5 = vmul.f32 %v2946_v58, %v2932_v55  ;;  %v2975_v10 = vsub.f32 %v2764_v6, %v2826_v25  ;;  %v292_v38 = vrot.slane %v2767_v7, 1  ;;  %s4054_s7 = sld [smem:[#allocation2 + $0x5]] }
  0x43   : > { %433 = vrot.lane.b32.xlu0 %v2830_v26, %s2617_s20  ;;  %6310 = vst [vmem:[#allocation25_spill] sm:$0xff] %v2850_v34  ;;  %v2954_v60 = vsel %vm235_vm3, 0.0, %v1667_v54  ;;  %v2959_v62 = vsel %vm235_vm3, 0.0, %v1683_v61  ;;  %v2979_v11 = vsub.f32 %v2770_v8, %v2830_v26  ;;  %v2987_v12 = vmul.f32 %v2946_v58, %v2963_v63  ;;  %s4164_s23 = sld [smem:[#allocation2 + $0x10]] }
  0x44   : > { %6311 = vst [vmem:[#allocation26_spill] sm:$0xff] %v2855_v35  ;;  %v355_v13 = vmul.f32 %v2967_v4, %v2967_v4  ;;  %v2993_v14 = vsub.f32 %v2756_v2, %v2822_v24  ;;  %v357_v15 = vmul.f32 %v2971_v5, %v2971_v5  ;;  %v3001_v16 = vmul.f32 %v2946_v58, %v2975_v10 }
  0x45   : > { %6312 = vst [vmem:[#allocation27_spill] sm:$0xff] %v2859_v36  ;;  %v3005_v27 = vmul.f32 %v2946_v58, %v2979_v11  ;;  %v361_v28 = vmul.f32 %v2987_v12, %v2987_v12  ;;  %v293_v39 = vrot.slane %v2770_v8, 1  ;;  %vm294_vm4 = vcmp.lt.s32.totalorder %v2773_v9, 7 }
  0x46   : > { %6313 = vst [vmem:[#allocation28_spill] sm:$0xff] %v2864_v37  ;;  %v3011_v29 = vmul.f32 %v2946_v58, %v2993_v14  ;;  %v359_v30 = vadd.f32 %v357_v15, %v355_v13  ;;  %v358_v31 = vmul.f32 %v3001_v16, %v3001_v16  ;;  %v299_v51 = vrot.slane %v2759_v3, 1 }
  0x47   : > { %6314 = vst [vmem:[#allocation29_spill] sm:$0xff] %v2878_v41  ;;  %v356_v32 = vmul.f32 %v3005_v27, %v3005_v27  ;;  %v300_v52 = vrot.slane %v2764_v6, 1  ;;  %vm229_vm5 = vcmp.eq.s32.totalorder %v2904_v45, 15  ;;  %v296_v57 = vsel %vm294_vm4, %v293_v39, %v292_v38 }
  0x48   : > { %6315 = vst [vmem:[#allocation30_spill] sm:$0xff] %v2883_v42  ;;  %v363_v40 = vadd.f32 %v361_v28, %v359_v30  ;;  %v362_v53 = vmul.f32 %v3011_v29, %v3011_v29  ;;  %v3042_v15 = vsel %vm229_vm5, %v2770_v8, %v296_v57  ;;  %v3046_v30 = vsel %vm294_vm4, %v292_v38, %v293_v39 }
  0x49   : > { %6316 = vst [vmem:[#allocation31_spill] sm:$0xff] %v2887_v43  ;;  %v360_v54 = vadd.f32 %v358_v31, %v356_v32  ;;  %v3037_v13 = vsel %vm294_vm4, %v299_v51, %v300_v52  ;;  %v305_v31 = vrot.slane %v2753_v1, 1  ;;  %v306_v32 = vrot.slane %v2756_v2, 1 }
  0x4a   : > { %463 = vrot.lane.b32.xlu2 %v2855_v35, %s2617_s20  ;;  %457 = vrot.lane.b32.xlu1 %v2859_v36, %s2617_s20  ;;  %6317 = vst [vmem:[#allocation32_spill] sm:$0xff] %v2904_v45  ;;  %v3033_v61 = vadd.f32 1e-09, %v363_v40  ;;  %v302_v39 = vsel %vm294_vm4, %v300_v52, %v299_v51  ;;  %v312_v51 = vrot.slane %v2818_v23, 1  ;;  %v3098_v49 = vsub.f32 %v2767_v7, %v3046_v30 }
  0x4b   : > { %455 = vrot.lane.b32.xlu0 %v2864_v37, %s2617_s20  ;;  %6318 = vst [vmem:[#allocation33_spill] sm:$0xff] %v2932_v55  ;;  %v364_v28 = vadd.f32 %v362_v53, %v360_v54  ;;  %v308_v38 = vsel %vm294_vm4, %v306_v32, %v305_v31  ;;  %v3070_v54 = vsel %vm294_vm4, %v305_v31, %v306_v32  ;;  %v3086_v31 = vstv %s2280_s5  ;;  %s4377_s5 = sld [smem:[#allocation2 + $0x7]] }
  0x4c   : > { %6319 = vst [vmem:[#allocation34_spill] sm:$0xff] %v2936_v56  ;;  %2409 = vrsqrt.f32 %v3033_v61  ;;  %v3066_v53 = vsel %vm229_vm5, %v2756_v2, %v308_v38  ;;  %v3076_v57 = vsel %vm229_vm5, %v2764_v6, %v302_v39  ;;  %v317_v32 = vrot.slane %v2809_v20, 1 }
  0x4d   : > { %6320 = vst [vmem:[#allocation35_spill] sm:$0xff] %v2950_v59  ;;  %v3057_v40 = vadd.f32 1e-09, %v364_v28  ;;  %v311_v28 = vrot.slane %v2815_v22, 1  ;;  %v318_v38 = vrot.slane %v2812_v21, 1  ;;  %v3094_v39 = vsub.f32 %v2759_v3, %v3037_v13 }
  0x4e   : > { %6321 = vst [vmem:[#allocation36_spill] sm:$0xff] %v2954_v60  ;;  %v3108_v44 = vmul.f32 %v3086_v31, %v3098_v49  ;;  %v3125_v60 = vsub.f32 %v2753_v1, %v3070_v54  ;;  %v323_v55 = vrot.slane %v2847_v33, 1  ;;  %vm373_vm6 = vweird.f32 %v3033_v61 }
  0x4f   : > { %6322 = vst [vmem:[#allocation37_spill] sm:$0xff] %v2959_v62  ;;  %2411 = vrsqrt.f32 %v3057_v40  ;;  %v314_v50 = vsel %vm294_vm4, %v312_v51, %v311_v28  ;;  %v3112_v46 = vmul.f32 %v3086_v31, %v3094_v39  ;;  %v3116_v0 = vsel %vm294_vm4, %v317_v32, %v318_v38 }
  0x50   : > { %6323 = vst [vmem:[#allocation38_spill] sm:$0xff] %v2963_v63  ;;  %v3121_v62 = vsel %vm229_vm5, %v2818_v23, %v314_v50  ;;  %v3129_v59 = vsel %vm294_vm4, %v311_v28, %v312_v51  ;;  %v3138_v50 = vsub.f32 %v2770_v8, %v3042_v15  ;;  %v871_v28 = vmul.f32 %v3108_v44, %v3108_v44 }
  0x51   : > { %6324 = vst [vmem:[#allocation39_spill] sm:$0xff] %v2975_v10  ;;  %v3148_v51 = vmul.f32 %v3086_v31, %v3125_v60  ;;  %vm383_vm10 = vweird.f32 %v3057_v40 }
  0x52   : > { %473 = vrot.lane.b32.xlu2 %v2878_v41, %s2617_s20  ;;  %471 = vrot.lane.b32.xlu1 %v2883_v42, %s2617_s20  ;;  %6325 = vst [vmem:[#allocation40_spill] sm:$0xff] %v2979_v11  ;;  %v3080_v52 = vpop.eup %2409  ;;  %v3142_v11 = vsub.f32 %v2764_v6, %v3076_v57  ;;  %v3164_v63 = vmul.f32 %v3086_v31, %v3138_v50 }
  0x53   : > { %465 = vrot.lane.b32.xlu0 %v2887_v43, %s2617_s20  ;;  %6326 = vst [vmem:[#allocation41_spill] sm:$0xff] %v2993_v14  ;;  %v368_v47 = vmul.f32 %v3080_v52, %v3033_v61  ;;  %vm374_vm7 = vweird.f32 %v3080_v52 }
  0x54   : > { %6327 = vst [vmem:[#allocation42_spill] sm:$0xff] %v3037_v13  ;;  %v3158_v56 = vmul.f32 %v3086_v31, %v3142_v11  ;;  %v872_v25 = vmul.f32 %v3164_v63, %v3164_v63  ;;  %vm375_vm9 = vmor %vm373_vm6, %vm374_vm7 }
  0x55   : > { %6328 = vst [vmem:[#allocation43_spill] sm:$0xff] %v3042_v15  ;;  %v3104_v48 = vpop.eup %2411  ;;  %v369_v14 = vmul.f32 %v3080_v52, %v368_v47  ;;  %v873_v47 = vmul.f32 %v3112_v46, %v3112_v46 }
  0x56   : > { %6329 = vst [vmem:[#allocation44_spill] sm:$0xff] %v3046_v30  ;;  %v378_v10 = vmul.f32 %v3104_v48, %v3057_v40  ;;  %vm384_vm11 = vweird.f32 %v3104_v48  ;;  %v338_v40 = vsub.f32 %v2812_v21, %v2887_v43 }
  0x57   : > { %6330 = vst [vmem:[#allocation45_spill] sm:$0xff] %v3066_v53  ;;  %v875_v26 = vadd.f32 %v873_v47, %v871_v28  ;;  %vm385_vm12 = vmor %vm383_vm10, %vm384_vm11 }
  0x58   : > { %6331 = vst [vmem:[#allocation46_spill] sm:$0xff] %v3070_v54 }
  0x59   : > { %6332 = vst [vmem:[#allocation47_spill] sm:$0xff] %v3076_v57 }
  0x5a   : > { %577 = vrot.lane.b32.xlu2 %v2759_v3, %s2617_s20  ;;  %571 = vrot.lane.b32.xlu1 %v2770_v8, %s2617_s20  ;;  %6333 = vst [vmem:[#allocation48_spill] sm:$0xff] %v3094_v39  ;;  %v324_v39 = vrot.slane %v2850_v34, 1 }
  0x5b   : > { %569 = vrot.lane.b32.xlu0 %v2767_v7, %s2617_s20  ;;  %6334 = vst [vmem:[#allocation49_spill] sm:$0xff] %v3098_v49  ;;  %v3168_v49 = vsub.f32 %v2756_v2, %v3066_v53 }
  0x5c   : > { %6335 = vst [vmem:[#allocation50_spill] sm:$0xff] %v3108_v44  ;;  %v326_v44 = vsel %vm294_vm4, %v324_v39, %v323_v55 }
  0x5d   : > { %6336 = vst [vmem:[#allocation51_spill] sm:$0xff] %v3112_v46  ;;  %v370_v46 = vmul.f32 0.5, %v369_v14  ;;  %v3177_v8 = vmul.f32 %v3086_v31, %v3168_v49  ;;  %v3192_v14 = vsel %vm294_vm4, %v323_v55, %v324_v39  ;;  %v335_v39 = vsub.f32 %v2815_v22, %v2864_v37 }
  0x5e   : > { %6337 = vst [vmem:[#allocation52_spill] sm:$0xff] %v3116_v0 }
  0x5f   : > { %6338 = vst [vmem:[#allocation53_spill] sm:$0xff] %v3121_v62  ;;  %v371_v47 = vsub.f32 1.5, %v370_v46 }
  0x60   : > { %6339 = vst [vmem:[#allocation54_spill] sm:$0xff] %v3125_v60  ;;  %v379_v60 = vmul.f32 %v3104_v48, %v378_v10  ;;  %v3188_v10 = vsel %vm229_vm5, %v2850_v34, %v326_v44  ;;  %v878_v44 = vmul.f32 %v3177_v8, %v3177_v8 }
  0x61   : > { %6340 = vst [vmem:[#allocation55_spill] sm:$0xff] %v3129_v59  ;;  %v372_v46 = vmul.f32 %v3080_v52, %v371_v47 }
  0x62   : > { %587 = vrot.lane.b32.xlu2 %v2756_v2, %s2617_s20  ;;  %585 = vrot.lane.b32.xlu1 %v2753_v1, %s2617_s20  ;;  %6341 = vst [vmem:[#allocation56_spill] sm:$0xff] %v3138_v50  ;;  %v877_v50 = vmul.f32 %v3148_v51, %v3148_v51 }
  0x63   : > { %579 = vrot.lane.b32.xlu0 %v2764_v6, %s2617_s20  ;;  %6342 = vst [vmem:[#allocation57_spill] sm:$0xff] %v3142_v11  ;;  %v320_v11 = vsel %vm294_vm4, %v318_v38, %v317_v32  ;;  %v874_v6 = vmul.f32 %v3158_v56, %v3158_v56  ;;  %v6350_v32 = vlaneseq }
  0x64   : > { %6343 = vst [vmem:[#allocation58_spill] sm:$0xff] %v3148_v51  ;;  %v3200_v28 = vsel %vm229_vm5, %v2812_v21, %v320_v11 }
  0x65   : > { %6344 = vst [vmem:[#allocation59_spill] sm:$0xff] %v3158_v56  ;;  %v3195_v38 = vand.u32 127, %v6350_v32  ;;  %v879_v56 = vadd.f32 %v877_v50, %v875_v26  ;;  %v876_v55 = vadd.f32 %v874_v6, %v872_v25  ;;  %v337_v25 = vsub.f32 %v2809_v20, %v2855_v35 }
  0x66   : > { %6345 = vst [vmem:[#allocation60_spill] sm:$0xff] %v3164_v63  ;;  %v336_v32 = vsub.f32 %v2818_v23, %v2859_v36 }
  0x67   : > { %6346 = vst [vmem:[#allocation61_spill] sm:$0xff] %v3168_v49  ;;  %v380_v49 = vmul.f32 0.5, %v379_v60  ;;  %vm230_vm8 = vcmp.eq.s32.totalorder %v3195_v38, 0  ;;  %v3219_v61 = vadd.f32 1e-09, %v879_v56  ;;  %v880_v6 = vadd.f32 %v878_v44, %v876_v55 }
  0x68   : > { %6347 = vst [vmem:[#allocation62_spill] sm:$0xff] %v3177_v8  ;;  %v339_v56 = vsub.f32 %v2847_v33, %v2883_v42  ;;  %v351_v47 = vmul.f32 %v2946_v58, %v337_v25  ;;  %v349_v55 = vmul.f32 %v2946_v58, %v335_v39  ;;  %v350_v45 = vmul.f32 %v2946_v58, %v336_v32 }
  0x69   : > { %6348 = vst [vmem:[#allocation63_spill] sm:$0xff] %v3188_v10  ;;  %v381_v60 = vsub.f32 1.5, %v380_v49  ;;  %v376_v49 = vsel %vm375_vm9, %v3080_v52, %v372_v46  ;;  %2413 = vrsqrt.f32 %v3219_v61  ;;  %v3240_v52 = vadd.f32 1e-09, %v880_v6 }
  0x6a   : > { %601 = vrot.lane.b32.xlu2 %v2809_v20, %s2617_s20  ;;  %595 = vrot.lane.b32.xlu1 %v2818_v23, %s2617_s20  ;;  %6349 = vst [vmem:[#allocation64_spill] sm:$0xff] %v3192_v14  ;;  %v3246_v44 = vmul.f32 %v376_v49, %v2971_v5  ;;  %v340_v25 = vsub.f32 %v2850_v34, %v2878_v41  ;;  %vm889_vm13 = vweird.f32 %v3219_v61 }
  0x6b   : > { %593 = vrot.lane.b32.xlu0 %v2815_v22, %s2617_s20  ;;  %6351 = vst [vmem:[#allocation65_spill] sm:$0xff] %v3200_v28  ;;  %v382_v50 = vmul.f32 %v3104_v48, %v381_v60  ;;  %v353_v9 = vmul.f32 %v2946_v58, %v339_v56  ;;  %v3263_v39 = vmul.f32 %v376_v49, %v2987_v12  ;;  %2415 = vrsqrt.f32 %v3240_v52 }
  0x6c   : > { %vm899_vm15 = vweird.f32 %v3240_v52 }
  0x6d   : > { %v386_v60 = vsel %vm385_vm12, %v3104_v48, %v382_v50  ;;  %v395_v50 = vmul.f32 %v3246_v44, %v351_v47  ;;  %vm231_vm12 = vcmp.eq.s32.totalorder %v3195_v38, 127 }
  0x6e   : > { %v3283_v56 = vmul.f32 %v386_v60, %v3011_v29 }
  0x6f   : > { %v3267_v48 = vpop.eup %2413 }
  0x70   : > { %vm890_vm14 = vweird.f32 %v3267_v48 }
  0x71   : > { %vm3398_vm0 = vmor %vm889_vm13, %vm890_vm14 }
  0x72   : > { %611 = vrot.lane.b32.xlu2 %v2850_v34, %s2617_s20  ;;  %609 = vrot.lane.b32.xlu1 %v2847_v33, %s2617_s20 }
  0x73   : > { %603 = vrot.lane.b32.xlu0 %v2812_v21, %s2617_s20 }
  0x7a   : > { %715 = vrot.lane.b32.xlu2 %v3037_v13, %s2617_s20  ;;  %709 = vrot.lane.b32.xlu1 %v3042_v15, %s2617_s20 }
  0x7b   : > { %707 = vrot.lane.b32.xlu0 %v3046_v30, %s2617_s20 }
  0x82   : > { %725 = vrot.lane.b32.xlu2 %v3066_v53, %s2617_s20  ;;  %723 = vrot.lane.b32.xlu1 %v3070_v54, %s2617_s20 }
  0x83   : > { %717 = vrot.lane.b32.xlu0 %v3076_v57, %s2617_s20 }
  0x8a   : > { %739 = vrot.lane.b32.xlu2 %v3116_v0, %s2617_s20  ;;  %733 = vrot.lane.b32.xlu1 %v3121_v62, %s2617_s20 }
  0x8b   : > { %731 = vrot.lane.b32.xlu0 %v3129_v59, %s2617_s20 }
  0x92   : > { %749 = vrot.lane.b32.xlu2 %v3188_v10, %s2617_s20  ;;  %747 = vrot.lane.b32.xlu1 %v3192_v14, %s2617_s20 }
  0x93   : > { %741 = vrot.lane.b32.xlu0 %v3200_v28, %s2617_s20  ;;  %s4070_s20 = sld [smem:[#allocation2 + $0x11]] }
  0x94   : > { %v448_v26 = vpop.permute.xlu2 %447 }
  0x95   : > { %v3217_v11 = vsel %vm230_vm8, %v2790_v17, %v448_v26  ;;  %v3250_v26 = vmul.f32 %v376_v49, %v2967_v4  ;;  %v354_v49 = vmul.f32 %v2946_v58, %v340_v25 }
  0x97   : > { %v393_v32 = vmul.f32 %v3250_v26, %v349_v55 }
  0x99   : > { %v397_v55 = vadd.f32 %v395_v50, %v393_v32  ;;  %v853_v32 = vsub.f32 %v2809_v20, %v3116_v0 }
  0x9a   : > { %955 = vrot.lane.b32.xlu2 %v3037_v13, %s2618_s8  ;;  %949 = vrot.lane.b32.xlu1 %v3042_v15, %s2618_s8  ;;  %v3275_v15 = vmul.f32 %v386_v60, %v3001_v16  ;;  %v399_v13 = vmul.f32 %v3263_v39, %v353_v9 }
  0x9b   : > { %947 = vrot.lane.b32.xlu0 %v3046_v30, %s2618_s8  ;;  %v352_v30 = vmul.f32 %v2946_v58, %v338_v40  ;;  %v884_v40 = vmul.f32 %v3267_v48, %v3219_v61 }
  0x9c   : > { %v450_v46 = vpop.permute.xlu2 %449  ;;  %v401_v25 = vadd.f32 %v399_v13, %v397_v55 }
  0x9d   : > { %v3256_v6 = vsel %vm230_vm8, %v2822_v24, %v450_v46  ;;  %v3271_v46 = vmul.f32 %v386_v60, %v3005_v27  ;;  %v885_v60 = vmul.f32 %v3267_v48, %v884_v40  ;;  %v852_v40 = vsub.f32 %v2818_v23, %v3121_v62  ;;  %v6360_v23 = vld [vmem:[#allocation22_spill] sm:$0xff] }
  0x9f   : > { %v394_v47 = vmul.f32 %v3271_v46, %v350_v45  ;;  %v400_v45 = vmul.f32 %v3283_v56, %v354_v49  ;;  %v886_v13 = vmul.f32 0.5, %v885_v60  ;;  %v3330_v60 = vstv %s2277_s16  ;;  %s4503_s16 = sld [smem:[#allocation2 + $0x12]] }
  0xa2   : > { %965 = vrot.lane.b32.xlu2 %v3066_v53, %s2618_s8  ;;  %963 = vrot.lane.b32.xlu1 %v3070_v54, %s2618_s8  ;;  %v396_v53 = vmul.f32 %v3275_v15, %v352_v30  ;;  %v3292_v54 = vpop.eup %2415  ;;  %v3305_v30 = vstv %s2301_s14  ;;  %s4493_s14 = sld [smem:[#allocation2 + $0x6]] }
  0xa3   : > { %957 = vrot.lane.b32.xlu0 %v3076_v57, %s2618_s8  ;;  %v894_v9 = vmul.f32 %v3292_v54, %v3240_v52  ;;  %6352 = vst [vmem:[#allocation66_spill] sm:$0xff] %v3305_v30  ;;  %v403_v49 = vmul.f32 %v401_v25, %v3305_v30  ;;  %vm900_vm1 = vweird.f32 %v3292_v54 }
  0xa4   : > { %v464_v17 = vpop.permute.xlu2 %463  ;;  %v398_v50 = vadd.f32 %v396_v53, %v394_v47  ;;  %v453_v53 = vsub.f32 %v2753_v1, %v3217_v11  ;;  %vm3441_vm4 = vmor %vm899_vm15, %vm900_vm1 }
  0xa5   : > { %v3297_v58 = vsel %vm230_vm8, %v2855_v35, %v464_v17  ;;  %v851_v17 = vsub.f32 %v2815_v22, %v3129_v59  ;;  %v895_v55 = vmul.f32 %v3292_v54, %v894_v9  ;;  %v856_v35 = vsub.f32 %v2850_v34, %v3188_v10 }
  0xa6   : > { %v402_v47 = vadd.f32 %v400_v45, %v398_v50  ;;  %v3344_v9 = vmul.f32 %v3086_v31, %v852_v40  ;;  %v3354_v24 = vmul.f32 %v3330_v60, %v453_v53  ;;  %v854_v40 = vsub.f32 %v2812_v21, %v3200_v28 }
  0xa7   : > { %v3341_v50 = vmul.f32 %v3086_v31, %v851_v17  ;;  %v896_v17 = vmul.f32 0.5, %v895_v55 }
  0xa8   : > { %6354 = vst [vmem:[#allocation68_spill] sm:$0xff] %v3344_v9 }
  0xa9   : > { %6353 = vst [vmem:[#allocation67_spill] sm:$0xff] %v3341_v50  ;;  %v3358_v50 = vmul.f32 %v3086_v31, %v856_v35  ;;  %v3376_v35 = vstv %s3313_s19  ;;  %s4593_s19 = sld [smem:[#allocation2 + $0x1f]] }
  0xaa   : > { %979 = vrot.lane.b32.xlu2 %v3116_v0, %s2618_s8  ;;  %973 = vrot.lane.b32.xlu1 %v3121_v62, %s2618_s8  ;;  %v3328_v62 = vmul.f32 %v3086_v31, %v853_v32  ;;  %v424_v52 = vmul.f32 %v3011_v29, %v3376_v35 }
  0xab   : > { %971 = vrot.lane.b32.xlu0 %v3129_v59, %s2618_s8  ;;  %6356 = vst [vmem:[#allocation70_spill] sm:$0xff] %v3358_v50  ;;  %v404_v50 = vmul.f32 %v402_v47, %v3305_v30  ;;  %v6361_v47 = vld [vmem:[#allocation11_spill] sm:$0xff] }
  0xac   : > { %v474_v57 = vpop.permute.xlu2 %473  ;;  %v440_v0 = vpop.permute.xlu1 %439  ;;  %v6362_v30 = vld [vmem:[#allocation23_spill] sm:$0xff] }
  0xad   : > { %v3335_v11 = vsel %vm230_vm8, %v2878_v41, %v474_v57  ;;  %v443_v45 = vsel %vm230_vm8, %v2795_v18, %v440_v0  ;;  %v432_v25 = vpop.permute.xlu0 %431  ;;  %v887_v57 = vsub.f32 1.5, %v886_v13  ;;  %v3351_v41 = vstv %s3300_s17  ;;  %s4582_s17 = sld [smem:[#allocation2 + $0x1d]] }
  0xae   : > { %v445_v32 = vsub.f32 %v2759_v3, %v443_v45  ;;  %v435_v59 = vsel %vm230_vm8, %v2800_v19, %v432_v25  ;;  %6355 = vst [vmem:[#allocation69_spill] sm:$0xff] %v3351_v41  ;;  %v855_v13 = vsub.f32 %v2847_v33, %v3192_v14  ;;  %v6365_v33 = vld [vmem:[#allocation54_spill] sm:$0xff] }
  0xaf   : > { %v437_v0 = vsub.f32 %v2767_v7, %v435_v59  ;;  %v405_v59 = vadd.f32 %v403_v49, %v3351_v41  ;;  %v888_v25 = vmul.f32 %v3267_v48, %v887_v57  ;;  %v897_v57 = vsub.f32 1.5, %v896_v17 }
  0xb0   : > { %v3363_v45 = vmul.f32 %v3330_v60, %v445_v32  ;;  %v499_v32 = vmul.f32 %v3354_v24, %v3354_v24  ;;  %v3432_v18 = vmul.f32 %v3086_v31, %v855_v13 }
  0xb1   : > { %v3370_v53 = vmul.f32 %v3330_v60, %v437_v0  ;;  %v454_v0 = vsub.f32 %v2756_v2, %v3256_v6  ;;  %v423_v6 = vmul.f32 %v2987_v12, %v3376_v35 }
  0xb2   : > { %v495_v55 = vmul.f32 %v3363_v45, %v3363_v45  ;;  %989 = vrot.lane.b32.xlu2 %v3188_v10, %s2618_s8  ;;  %987 = vrot.lane.b32.xlu1 %v3192_v14, %s2618_s8  ;;  %v3403_v10 = vmul.f32 %v3086_v31, %v854_v40  ;;  %6364 = vst [vmem:[#allocation11_spill] sm:$0xff] %v3432_v18 }
  0xb3   : > { %v493_v49 = vmul.f32 %v3370_v53, %v3370_v53  ;;  %981 = vrot.lane.b32.xlu0 %v3200_v28, %s2618_s8  ;;  %v427_v28 = vmul.f32 %v405_v59, %v3263_v39 }
  0xb4   : > { %6359 = vst [vmem:[#allocation71_spill] sm:$0xff] %v3403_v10  ;;  %v578_v9 = vpop.permute.xlu2 %577  ;;  %v442_v21 = vpop.permute.xlu1 %441 }
  0xb5   : > { %v497_v19 = vadd.f32 %v495_v55, %v493_v49  ;;  %v581_v61 = vsel %vm230_vm8, %v2759_v3, %v578_v9  ;;  %v444_v17 = vsel %vm230_vm8, %v6360_v23, %v442_v21  ;;  %v434_v40 = vpop.permute.xlu0 %433  ;;  %v892_v9 = vsel %vm3398_vm0, %v3267_v48, %v888_v25  ;;  %v6363_v49 = vld [vmem:[#allocation13_spill] sm:$0xff] }
  0xb6   : > { %v3417_v12 = vsub.f32 %v2759_v3, %v581_v61  ;;  %v446_v10 = vsub.f32 %v6361_v47, %v444_v17  ;;  %v436_v39 = vsel %vm230_vm8, %v6362_v30, %v434_v40  ;;  %v3427_v55 = vmul.f32 %v3330_v60, %v454_v0 }
  0xb7   : > { %v501_v21 = vadd.f32 %v499_v32, %v497_v19  ;;  %v438_v23 = vsub.f32 %v6363_v49, %v436_v39  ;;  %v898_v61 = vmul.f32 %v3292_v54, %v897_v57  ;;  %v406_v17 = vadd.f32 %v404_v50, %v3351_v41  ;;  %v6369_v50 = vld [vmem:[#allocation51_spill] sm:$0xff] }
  0xb8   : > { %v3437_v40 = vmul.f32 %v6365_v33, %v3417_v12  ;;  %v429_v19 = vadd.f32 %v427_v28, %v423_v6  ;;  %v3448_v25 = vmul.f32 %v3330_v60, %v446_v10  ;;  %v3454_v13 = vmul.f32 %v892_v9, %v6369_v50 }
  0xb9   : > { %v3445_v48 = vadd.f32 1e-09, %v501_v21  ;;  %v3451_v31 = vmul.f32 %v3330_v60, %v438_v23  ;;  %v3457_v32 = vstv %s3373_s24  ;;  %v428_v0 = vmul.f32 %v406_v17, %v3283_v56  ;;  %s4601_s24 = sld [smem:[#allocation2 + $0x9]] }
  0xba   : > { %6366 = vst [vmem:[#allocation72_spill] sm:$0xff] %v3437_v40  ;;  %1093 = vrot.lane.b32.xlu2 %v2759_v3, %s2618_s8  ;;  %1087 = vrot.lane.b32.xlu1 %v6363_v49, %s2618_s8  ;;  %v500_v23 = vmul.f32 %v3427_v55, %v3427_v55  ;;  %v496_v10 = vmul.f32 %v3448_v25, %v3448_v25 }
  0xbb   : > { %6370 = vst [vmem:[#allocation73_spill] sm:$0xff] %v3454_v13  ;;  %2417 = vrsqrt.f32 %v3445_v48  ;;  %v494_v29 = vmul.f32 %v3451_v31, %v3451_v31  ;;  %1085 = vrot.lane.b32.xlu0 %v2767_v7, %s2618_s8  ;;  %v902_v28 = vsel %vm3441_vm4, %v3292_v54, %v898_v61  ;;  %v415_v56 = vmul.f32 %v2971_v5, %v3376_v35 }
  0xbc   : > { %6371 = vst [vmem:[#allocation74_spill] sm:$0xff] %v3457_v32  ;;  %v419_v57 = vmul.f32 %v405_v59, %v3246_v44  ;;  %v407_v6 = vmul.f32 %v2967_v4, %v3376_v35  ;;  %v588_v39 = vpop.permute.xlu2 %587  ;;  %v458_v21 = vpop.permute.xlu1 %457  ;;  %v411_v50 = vmul.f32 %v405_v59, %v3250_v26  ;;  %v6372_v44 = vld [vmem:[#allocation50_spill] sm:$0xff]  ;;  %v3500_v4 = vmul.f32 %v892_v9, %v3148_v51 }
  0xbd   : > { %v498_v18 = vadd.f32 %v496_v10, %v494_v29  ;;  %v590_v14 = vsel %vm230_vm8, %v2756_v2, %v588_v39  ;;  %v3494_v5 = vsel %vm230_vm8, %v2859_v36, %v458_v21  ;;  %v456_v54 = vpop.permute.xlu0 %455  ;;  %v3497_v61 = vmul.f32 %v892_v9, %v6372_v44  ;;  %v6377_v29 = vld [vmem:[#allocation59_spill] sm:$0xff]  ;;  %v6395_v36 = vld [vmem:[#allocation16_spill] sm:$0xff] }
  0xbe   : > { %6374 = vst [vmem:[#allocation76_spill] sm:$0xff] %v3500_v4  ;;  %v430_v40 = vadd.f32 %v428_v0, %v424_v52  ;;  %v3505_v26 = vsel %vm230_vm8, %v2864_v37, %v456_v54  ;;  %v3508_v59 = vmul.f32 %v902_v28, %v3164_v63  ;;  %v3511_v10 = vmul.f32 %v902_v28, %v3177_v8 }
  0xbf   : > { %6373 = vst [vmem:[#allocation75_spill] sm:$0xff] %v3497_v61  ;;  %v3514_v39 = vmul.f32 %v902_v28, %v6377_v29  ;;  %v502_v21 = vadd.f32 %v500_v23, %v498_v18  ;;  %v3518_v9 = vmul.f32 %v3454_v13, %v3328_v62  ;;  %v561_v52 = vmul.f32 %v3354_v24, %v3457_v32 }
  0xc0   : > { %6375 = vst [vmem:[#allocation77_spill] sm:$0xff] %v3508_v59  ;;  %v416_v0 = vmul.f32 %v3001_v16, %v3376_v35  ;;  %v420_v54 = vmul.f32 %v406_v17, %v3275_v15  ;;  %v562_v44 = vmul.f32 %v3427_v55, %v3457_v32  ;;  %v421_v28 = vadd.f32 %v419_v57, %v415_v56 }
  0xc1   : > { %6376 = vst [vmem:[#allocation78_spill] sm:$0xff] %v3511_v10  ;;  %v2418_v63 = vpop.eup %2417  ;;  %v3527_v51 = vadd.f32 %v411_v50, %v407_v6  ;;  %v3529_v18 = vadd.f32 1e-09, %v502_v21  ;;  %v469_v62 = vsub.f32 %v2809_v20, %v3297_v58  ;;  %v478_v23 = vsub.f32 %v2850_v34, %v3335_v11  ;;  %v6400_v10 = vld [vmem:[#allocation20_spill] sm:$0xff] }
  0xc2   : > { %6378 = vst [vmem:[#allocation79_spill] sm:$0xff] %v3514_v39  ;;  %v506_v16 = vmul.f32 %v2418_v63, %v3445_v48  ;;  %v3537_v13 = vstv %s3462_s25  ;;  %1103 = vrot.lane.b32.xlu2 %v2756_v2, %s2618_s8  ;;  %1101 = vrot.lane.b32.xlu1 %v2753_v1, %s2618_s8  ;;  %v553_v15 = vmul.f32 %v3363_v45, %v3457_v32  ;;  %v3558_v56 = vstv %s3485_s26  ;;  %s4616_s25 = sld [smem:[#allocation2 + $0x1e]] }
  0xc3   : > { %6379 = vst [vmem:[#allocation80_spill] sm:$0xff] %v3518_v9  ;;  %v3547_v50 = vmul.f32 %v3005_v27, %v3376_v35  ;;  %v3550_v58 = vmul.f32 %v406_v17, %v3271_v46  ;;  %2419 = vrsqrt.f32 %v3529_v18  ;;  %1095 = vrot.lane.b32.xlu0 %v6361_v47, %s2618_s8  ;;  %v3555_v11 = vadd.f32 %v561_v52, %v429_v19  ;;  %s4634_s26 = sld [smem:[#allocation2 + $0x15]] }
  0xc4   : > { %6380 = vst [vmem:[#allocation81_spill] sm:$0xff] %v3527_v51  ;;  %v3560_v57 = vadd.f32 %v420_v54, %v416_v0  ;;  %v507_v6 = vmul.f32 %v2418_v63, %v506_v16  ;;  %v602_v21 = vpop.permute.xlu2 %601  ;;  %v472_v8 = vpop.permute.xlu1 %471  ;;  %v3562_v29 = vadd.f32 %v562_v44, %v430_v40  ;;  %v3566_v27 = vmul.f32 %v3537_v13, %v3417_v12 }
  0xc5   : > { %6381 = vst [vmem:[#allocation82_spill] sm:$0xff] %v3558_v56  ;;  %v3571_v46 = vsel %vm230_vm8, %v2809_v20, %v602_v21  ;;  %v475_v35 = vsel %vm230_vm8, %v2883_v42, %v472_v8  ;;  %v466_v17 = vpop.permute.xlu0 %465  ;;  %v489_v19 = vmul.f32 %v3330_v60, %v469_v62  ;;  %v3578_v52 = vmul.f32 %v3330_v60, %v478_v23  ;;  %v6386_v8 = vld [vmem:[#allocation49_spill] sm:$0xff]  ;;  %v6391_v42 = vld [vmem:[#allocation38_spill] sm:$0xff] }
  0xc6   : > { %6382 = vst [vmem:[#allocation83_spill] sm:$0xff] %v3562_v29  ;;  %v508_v40 = vmul.f32 0.5, %v507_v6  ;;  %v3583_v44 = vsel %vm230_vm8, %v2887_v43, %v466_v17  ;;  %v3585_v0 = vadd.f32 %v553_v15, %v421_v28  ;;  %v3589_v20 = vmul.f32 %v3370_v53, %v3457_v32  ;;  %v6388_v6 = vld [vmem:[#allocation24_spill] sm:$0xff] }
  0xc7   : > { %6383 = vst [vmem:[#allocation84_spill] sm:$0xff] %v3566_v27  ;;  %v3593_v54 = vmul.f32 %v6386_v8, %v3417_v12  ;;  %v592_v62 = vsub.f32 %v2756_v2, %v590_v14  ;;  %v461_v23 = vsub.f32 %v2815_v22, %v3505_v26  ;;  %vm512_vm5 = vweird.f32 %v2418_v63  ;;  %v6393_v2 = vld [vmem:[#allocation34_spill] sm:$0xff] }
  0xc8   : > { %6384 = vst [vmem:[#allocation85_spill] sm:$0xff] %v3571_v46  ;;  %v509_v16 = vsub.f32 1.5, %v508_v40  ;;  %v477_v21 = vsub.f32 %v6388_v6, %v475_v35  ;;  %v3601_v28 = vmul.f32 %v3566_v27, %v3566_v27  ;;  %v3605_v15 = vmul.f32 %v3566_v27, %v3558_v56  ;;  %v6398_v46 = vld [vmem:[#allocation56_spill] sm:$0xff] }
  0xc9   : > { %6385 = vst [vmem:[#allocation86_spill] sm:$0xff] %v3589_v20  ;;  %v2420_v17 = vpop.eup %2419  ;;  %v3609_v43 = vmul.f32 %v3417_v12, %v6391_v42  ;;  %v3613_v14 = vmul.f32 %v3417_v12, %v6393_v2  ;;  %v3617_v26 = vmul.f32 %v3448_v25, %v3457_v32  ;;  %vm511_vm6 = vweird.f32 %v3445_v48  ;;  %v6396_v12 = vld [vmem:[#allocation57_spill] sm:$0xff] }
  0xca   : > { %6387 = vst [vmem:[#allocation87_spill] sm:$0xff] %v3593_v54  ;;  %v516_v35 = vmul.f32 %v2420_v17, %v3529_v18  ;;  %v510_v40 = vmul.f32 %v2418_v63, %v509_v16  ;;  %1231 = vrot.lane.b32.xlu2 %v6395_v36, %s2618_s8  ;;  %1225 = vrot.lane.b32.xlu1 %v6362_v30, %s2618_s8  ;;  %vm513_vm7 = vmor %vm511_vm6, %vm512_vm5  ;;  %v6401_v48 = vld [vmem:[#allocation17_spill] sm:$0xff]  ;;  %vm522_vm9 = vweird.f32 %v2420_v17  ;;  %vm521_vm10 = vweird.f32 %v3529_v18 }
  0xcb   : > { %6389 = vst [vmem:[#allocation88_spill] sm:$0xff] %v3601_v28  ;;  %v3626_v37 = vmul.f32 %v3537_v13, %v592_v62  ;;  %v3629_v27 = vmul.f32 %v6396_v12, %v592_v62  ;;  %v3632_v4 = vmul.f32 %v6398_v46, %v592_v62  ;;  %v462_v16 = vsub.f32 %v6400_v10, %v3494_v5  ;;  %vm523_vm11 = vmor %vm521_vm10, %vm522_vm9 }
  0xcc   : > { %6390 = vst [vmem:[#allocation89_spill] sm:$0xff] %v3605_v15  ;;  %1223 = vrot.lane.b32.xlu0 %v6401_v48, %s2618_s8  ;;  %v517_v36 = vmul.f32 %v2420_v17, %v516_v35  ;;  %v487_v30 = vmul.f32 %v3330_v60, %v461_v23  ;;  %v514_v9 = vsel %vm513_vm7, %v2418_v63, %v510_v40  ;;  %v612_v59 = vpop.permute.xlu2 %611  ;;  %v572_v28 = vpop.permute.xlu1 %571  ;;  %v6403_v35 = vld [vmem:[#allocation40_spill] sm:$0xff]  ;;  %v6405_v40 = vld [vmem:[#allocation18_spill] sm:$0xff]  ;;  %v6408_v15 = vld [vmem:[#allocation61_spill] sm:$0xff] }
  0xcd   : > { %6392 = vst [vmem:[#allocation90_spill] sm:$0xff] %v3609_v43  ;;  %v491_v39 = vmul.f32 %v3330_v60, %v477_v21  ;;  %v525_v32 = vmul.f32 %v514_v9, %v3370_v53  ;;  %v527_v20 = vmul.f32 %v514_v9, %v3363_v45  ;;  %v529_v51 = vmul.f32 %v514_v9, %v3354_v24  ;;  %v570_v48 = vpop.permute.xlu0 %569 }
  0xce   : > { %6394 = vst [vmem:[#allocation91_spill] sm:$0xff] %v3613_v14  ;;  %v3647_v5 = vsel %vm230_vm8, %v2850_v34, %v612_v59  ;;  %v3650_v6 = vmul.f32 %v592_v62, %v6403_v35  ;;  %v518_v63 = vmul.f32 0.5, %v517_v36  ;;  %v574_v23 = vsel %vm230_vm8, %v6363_v49, %v572_v28 }
  0xcf   : > { %6397 = vst [vmem:[#allocation92_spill] sm:$0xff] %v3629_v27  ;;  %v573_v45 = vsel %vm230_vm8, %v2767_v7, %v570_v48  ;;  %v531_v53 = vmul.f32 %v525_v32, %v487_v30  ;;  %v533_v24 = vmul.f32 %v527_v20, %v489_v19  ;;  %v537_v9 = vmul.f32 %v529_v51, %v491_v39  ;;  %v6410_v30 = vld [vmem:[#allocation41_spill] sm:$0xff] }
  0xd0   : > { %6399 = vst [vmem:[#allocation93_spill] sm:$0xff] %v3632_v4  ;;  %v576_v21 = vsub.f32 %v6363_v49, %v574_v23  ;;  %v519_v59 = vsub.f32 1.5, %v518_v63  ;;  %v470_v34 = vsub.f32 %v6405_v40, %v3583_v44  ;;  %v3662_v36 = vsub.f32 %v2767_v7, %v573_v45  ;;  %v6413_v44 = vld [vmem:[#allocation48_spill] sm:$0xff]  ;;  %v6447_v27 = vld [vmem:[#allocation77_spill] sm:$0xff] }
  0xd1   : > { %6402 = vst [vmem:[#allocation94_spill] sm:$0xff] %v3647_v5  ;;  %v6406_v5 = vld [vmem:[#allocation39_spill] sm:$0xff]  ;;  %v535_v28 = vadd.f32 %v533_v24, %v531_v53  ;;  %v488_v23 = vmul.f32 %v3330_v60, %v462_v16  ;;  %v6416_v24 = vld [vmem:[#allocation22_spill] sm:$0xff]  ;;  %v638_v14 = vmul.f32 %v3626_v37, %v3626_v37 }
  0xd2   : > { %6404 = vst [vmem:[#allocation95_spill] sm:$0xff] %v3650_v6  ;;  %v3665_v56 = vmul.f32 %v592_v62, %v6406_v5  ;;  %v3668_v29 = vmul.f32 %v6408_v15, %v576_v21  ;;  %v3671_v19 = vmul.f32 %v576_v21, %v6410_v30  ;;  %v520_v39 = vmul.f32 %v2420_v17, %v519_v59  ;;  %v6415_v62 = vld [vmem:[#allocation21_spill] sm:$0xff]  ;;  %v6421_v6 = vld [vmem:[#allocation42_spill] sm:$0xff] }
  0xd3   : > { %v3676_v48 = vmul.f32 %v6365_v33, %v3662_v36  ;;  %v3680_v63 = vmul.f32 %v6413_v44, %v3662_v36  ;;  %1241 = vrot.lane.b32.xlu2 %v6415_v62, %s2618_s8  ;;  %v539_v45 = vadd.f32 %v537_v9, %v535_v28  ;;  %v490_v40 = vmul.f32 %v3330_v60, %v470_v34  ;;  %v6417_v62 = vld [vmem:[#allocation33_spill] sm:$0xff]  ;;  %v6419_v9 = vld [vmem:[#allocation15_spill] sm:$0xff] }
  0xd4   : > { %6407 = vst [vmem:[#allocation18_spill] sm:$0xff] %v3665_v56  ;;  %1233 = vrot.lane.b32.xlu0 %v6416_v24, %s2618_s8  ;;  %v524_v59 = vsel %vm523_vm11, %v2420_v17, %v520_v39  ;;  %v3696_v16 = vmul.f32 %v3662_v36, %v6417_v62  ;;  %1239 = vrot.lane.b32.xlu1 %v6419_v9, %s2618_s8  ;;  %v716_v28 = vpop.permute.xlu2 %715  ;;  %v586_v53 = vpop.permute.xlu1 %585  ;;  %v6420_v17 = vld [vmem:[#allocation66_spill] sm:$0xff] }
  0xd5   : > { %6409 = vst [vmem:[#allocation96_spill] sm:$0xff] %v3668_v29  ;;  %v3701_v18 = vmul.f32 %v524_v59, %v3451_v31  ;;  %v541_v39 = vmul.f32 %v539_v45, %v6420_v17  ;;  %v528_v34 = vmul.f32 %v524_v59, %v3448_v25  ;;  %v580_v60 = vpop.permute.xlu0 %579  ;;  %v3711_v24 = vsel %vm230_vm8, %v6421_v6, %v716_v28 }
  0xd6   : > { %6411 = vst [vmem:[#allocation97_spill] sm:$0xff] %v3671_v19  ;;  %v530_v19 = vmul.f32 %v524_v59, %v3427_v55  ;;  %v589_v9 = vsel %vm230_vm8, %v2753_v1, %v586_v53  ;;  %v582_v55 = vsel %vm230_vm8, %v6361_v47, %v580_v60  ;;  %v3725_v28 = vmul.f32 %v6396_v12, %v576_v21 }
  0xd7   : > { %6412 = vst [vmem:[#allocation98_spill] sm:$0xff] %v3676_v48  ;;  %v532_v45 = vmul.f32 %v3701_v18, %v488_v23  ;;  %v543_v25 = vadd.f32 %v541_v39, %v3351_v41  ;;  %v534_v59 = vmul.f32 %v528_v34, %v490_v40  ;;  %v3729_v53 = vmul.f32 %v3537_v13, %v576_v21 }
  0xd8   : > { %6414 = vst [vmem:[#allocation99_spill] sm:$0xff] %v3680_v63  ;;  %v538_v33 = vmul.f32 %v530_v19, %v3578_v52  ;;  %v3734_v40 = vmul.f32 %v576_v21, %v6406_v5  ;;  %v584_v63 = vsub.f32 %v6361_v47, %v582_v55  ;;  %v3754_v21 = vmul.f32 %v3662_v36, %v6391_v42  ;;  %v6462_v5 = vld [vmem:[#allocation44_spill] sm:$0xff] }
  0xd9   : > { %6418 = vst [vmem:[#allocation100_spill] sm:$0xff] %v3696_v16  ;;  %v591_v16 = vsub.f32 %v2753_v1, %v589_v9  ;;  %v3731_v4 = vmul.f32 %v543_v25, %v525_v32  ;;  %v557_v60 = vmul.f32 %v543_v25, %v527_v20  ;;  %v565_v23 = vmul.f32 %v543_v25, %v529_v51 }
  0xda   : > { %6422 = vst [vmem:[#allocation42_spill] sm:$0xff] %v3725_v28  ;;  %v536_v29 = vadd.f32 %v534_v59, %v532_v45  ;;  %v3817_v45 = vmul.f32 %v3537_v13, %v3662_v36  ;;  %v3872_v28 = vld [vmem:[%s2746_s28 + $0x48] sm:$0xff] }
  0xdb   : > { %6423 = vst [vmem:[#allocation101_spill] sm:$0xff] %v3734_v40  ;;  %v3737_v52 = vmul.f32 %v6413_v44, %v591_v16  ;;  %v3740_v39 = vmul.f32 %v6386_v8, %v591_v16  ;;  %1507 = vrot.lane.b32.xlu2 %v2759_v3, %s2619_s29  ;;  %v559_v1 = vadd.f32 %v557_v60, %v3585_v0  ;;  %v6456_v44 = vld [vmem:[#allocation52_spill] sm:$0xff] }
  0xdc   : > { %v567_v51 = vadd.f32 %v565_v23, %v3555_v11  ;;  %v540_v32 = vadd.f32 %v538_v33, %v536_v29  ;;  %v3748_v20 = vmul.f32 %v591_v16, %v6417_v62  ;;  %1499 = vrot.lane.b32.xlu0 %v2767_v7, %s2619_s29  ;;  %6427 = vst [vmem:[#allocation105_spill] sm:$0xff] %v3754_v21  ;;  %v596_v33 = vpop.permute.xlu1 %595  ;;  %v726_v11 = vpop.permute.xlu2 %725  ;;  %v6459_v62 = vld [vmem:[#allocation43_spill] sm:$0xff] }
  0xdd   : > { %6424 = vst [vmem:[#allocation102_spill] sm:$0xff] %v3737_v52  ;;  %v3757_v47 = vmul.f32 %v3537_v13, %v591_v16  ;;  %1501 = vrot.lane.b32.xlu1 %v6363_v49, %s2619_s29  ;;  %v632_v29 = vmul.f32 %v3729_v53, %v3729_v53  ;;  %v3771_v25 = vmul.f32 %v591_v16, %v6393_v2  ;;  %v594_v59 = vpop.permute.xlu0 %593  ;;  %v6442_v52 = vld [vmem:[#allocation81_spill] sm:$0xff] }
  0xde   : > { %6425 = vst [vmem:[#allocation103_spill] sm:$0xff] %v3740_v39  ;;  %v542_v0 = vmul.f32 %v540_v32, %v6420_v17  ;;  %v3774_v60 = vmul.f32 %v3537_v13, %v584_v63  ;;  %v3777_v23 = vmul.f32 %v6408_v15, %v584_v63  ;;  %v3780_v3 = vmul.f32 %v6398_v46, %v584_v63  ;;  %v6441_v39 = vld [vmem:[#allocation24_spill] sm:$0xff]  ;;  %v3910_v15 = vld [vmem:[%s2746_s28] sm:$0xff] }
  0xdf   : > { %6426 = vst [vmem:[#allocation104_spill] sm:$0xff] %v3748_v20  ;;  %v3783_v32 = vmul.f32 %v584_v63, %v6410_v30  ;;  %v3789_v16 = vmul.f32 %v584_v63, %v6403_v35  ;;  %v3794_v7 = vsel %vm230_vm8, %v6400_v10, %v596_v33  ;;  %v556_v63 = vadd.f32 %v3617_v26, %v3560_v57  ;;  %v6434_v20 = vld [vmem:[#allocation45_spill] sm:$0xff]  ;;  %v3825_v26 = vld [vmem:[%s2746_s28 + $0x28] sm:$0xff]  ;;  %v3835_v33 = vld [vmem:[%s2746_s28 + $0x18] sm:$0xff] }
  0xe0   : > { %6429 = vst [vmem:[#allocation106_spill] sm:$0xff] %v3771_v25  ;;  %v544_v55 = vadd.f32 %v542_v0, %v3351_v41  ;;  %v634_v49 = vmul.f32 %v3774_v60, %v3774_v60  ;;  %v3813_v0 = vsel %vm230_vm8, %v2815_v22, %v594_v59  ;;  %v3822_v57 = vsel %vm230_vm8, %v6434_v20, %v726_v11  ;;  %v6436_v59 = vld [vmem:[#allocation83_spill] sm:$0xff]  ;;  %v3939_v35 = vld [vmem:[%s2746_s28 + $0x58] sm:$0xff] }
  0xe1   : > { %6430 = vst [vmem:[#allocation107_spill] sm:$0xff] %v3777_v23  ;;  %v637_v11 = vmul.f32 %v3757_v47, %v3757_v47  ;;  %v631_v43 = vmul.f32 %v3817_v45, %v3817_v45 }
  0xe2   : > { %6431 = vst [vmem:[#allocation108_spill] sm:$0xff] %v3780_v3  ;;  %v558_v21 = vmul.f32 %v544_v55, %v528_v34  ;;  %v566_v25 = vmul.f32 %v544_v55, %v530_v19  ;;  %v636_v10 = vadd.f32 %v634_v49, %v632_v29  ;;  %v6435_v49 = vld [vmem:[#allocation67_spill] sm:$0xff]  ;;  %v414_v34 = vadd.f32 %v3550_v58, %v3547_v50  ;;  %v6439_v58 = vld [vmem:[#allocation89_spill] sm:$0xff] }
  0xe3   : > { %6432 = vst [vmem:[#allocation109_spill] sm:$0xff] %v3783_v32  ;;  %1517 = vrot.lane.b32.xlu2 %v3825_v26, %s2619_s29  ;;  %v909_v19 = vmul.f32 %v3497_v61, %v6435_v49  ;;  %v3844_v49 = vld [vmem:[%s2746_s28 + $0x20] sm:$0xff]  ;;  %v6445_v32 = vld [vmem:[#allocation88_spill] sm:$0xff] }
  0xe4   : > { %6433 = vst [vmem:[#allocation110_spill] sm:$0xff] %v3789_v16  ;;  %v560_v29 = vadd.f32 %v558_v21, %v556_v63  ;;  %v568_v36 = vadd.f32 %v566_v25, %v6436_v59  ;;  %1509 = vrot.lane.b32.xlu0 %v3835_v33, %s2619_s29  ;;  %v640_v22 = vadd.f32 %v638_v14, %v636_v10  ;;  %v610_v50 = vpop.permute.xlu1 %609  ;;  %v740_v25 = vpop.permute.xlu2 %739  ;;  %v6440_v63 = vld [vmem:[#allocation82_spill] sm:$0xff] }
  0xe5   : > { %6437 = vst [vmem:[#allocation45_spill] sm:$0xff] %v3835_v33  ;;  %1515 = vrot.lane.b32.xlu1 %v3844_v49, %s2619_s29  ;;  %v3849_v21 = vadd.f32 %v6439_v58, %v559_v1  ;;  %v700_v59 = vmul.f32 %v3626_v37, %v6440_v63  ;;  %v3856_v10 = vsel %vm230_vm8, %v6441_v39, %v610_v50  ;;  %v604_v48 = vpop.permute.xlu0 %603  ;;  %v6443_v1 = vld [vmem:[#allocation86_spill] sm:$0xff] }
  0xe6   : > { %6438 = vst [vmem:[#allocation67_spill] sm:$0xff] %v3844_v49  ;;  %v699_v14 = vmul.f32 %v3757_v47, %v6440_v63  ;;  %v692_v9 = vmul.f32 %v3774_v60, %v6440_v63  ;;  %v547_v58 = vadd.f32 %v6443_v1, %v6442_v52  ;;  %v6444_v16 = vld [vmem:[#allocation74_spill] sm:$0xff]  ;;  %v3866_v56 = vadd.f32 1e-09, %v640_v22  ;;  %v6446_v1 = vld [vmem:[#allocation68_spill] sm:$0xff]  ;;  %v6448_v22 = vld [vmem:[#allocation71_spill] sm:$0xff] }
  0xe7   : > { %v546_v40 = vmul.f32 %v3451_v31, %v6444_v16  ;;  %v635_v50 = vadd.f32 %v6445_v32, %v631_v43  ;;  %v3877_v3 = vsel %vm230_vm8, %v3872_v28, %v604_v48  ;;  %v3881_v52 = vadd.f32 %v700_v59, %v568_v36  ;;  %v6449_v16 = vld [vmem:[#allocation79_spill] sm:$0xff]  ;;  %v6450_v59 = vld [vmem:[#allocation80_spill] sm:$0xff]  ;;  %6455 = vst [vmem:[#allocation83_spill] sm:$0xff] %v3910_v15 }
  0xe8   : > { %v3869_v39 = vadd.f32 %v699_v14, %v567_v51  ;;  %v3879_v23 = vadd.f32 %v692_v9, %v560_v29  ;;  %v910_v31 = vmul.f32 %v6447_v27, %v6446_v1  ;;  %v912_v54 = vmul.f32 %v6449_v16, %v6448_v22  ;;  %v3889_v51 = vld [vmem:[%s2746_s28 + $0x10] sm:$0xff]  ;;  %v6454_v1 = vld [vmem:[#allocation76_spill] sm:$0xff]  ;;  %6460 = vst [vmem:[#allocation82_spill] sm:$0xff] %v3939_v35 }
  0xe9   : > { %2421 = vrsqrt.f32 %v3866_v56  ;;  %v639_v43 = vadd.f32 %v637_v11, %v635_v50  ;;  %v721_v48 = vsub.f32 %v3889_v51, %v3711_v24  ;;  %v551_v9 = vadd.f32 %v3731_v4, %v547_v58  ;;  %v6451_v24 = vld [vmem:[#allocation70_spill] sm:$0xff]  ;;  %v6453_v58 = vld [vmem:[#allocation11_spill] sm:$0xff] }
  0xea   : > { %v3895_v32 = vstv %s3808_s30  ;;  %v683_v36 = vmul.f32 %v3817_v45, %v6440_v63  ;;  %v550_v11 = vmul.f32 %v544_v55, %v3701_v18  ;;  %v913_v14 = vadd.f32 %v6450_v59, %v909_v19  ;;  %v6452_v50 = vld [vmem:[#allocation78_spill] sm:$0xff]  ;;  %v3921_v55 = vld [vmem:[%s2746_s28 + $0x8] sm:$0xff]  ;;  %v3928_v59 = vld [vmem:[%s2746_s28 + $0x40] sm:$0xff] }
  0xeb   : > { %v3897_v29 = vadd.f32 1e-09, %v639_v43  ;;  %1784 = vrot.lane.b32.xlu2 %v3889_v51, %s2620_s27  ;;  %v916_v4 = vmul.f32 %v6452_v50, %v6451_v24  ;;  %v915_v22 = vmul.f32 %v6454_v1, %v6453_v58  ;;  %v548_v43 = vadd.f32 %v546_v40, %v414_v34  ;;  %6457 = vst [vmem:[#allocation89_spill] sm:$0xff] %v3921_v55 }
  0xec   : > { %1776 = vrot.lane.b32.xlu0 %v3910_v15, %s2620_s27  ;;  %v914_v30 = vadd.f32 %v912_v54, %v910_v31  ;;  %v3918_v18 = vsel %vm230_vm8, %v6456_v44, %v740_v25  ;;  %v3925_v40 = vadd.f32 %v683_v36, %v551_v9  ;;  %v750_v19 = vpop.permute.xlu2 %749  ;;  %v710_v34 = vpop.permute.xlu1 %709  ;;  %v6458_v54 = vld [vmem:[#allocation85_spill] sm:$0xff]  ;;  %v3933_v24 = vmul.f32 %v3895_v32, %v721_v48  ;;  %v6461_v9 = vld [vmem:[#allocation94_spill] sm:$0xff] }
  0xed   : > { %2423 = vrsqrt.f32 %v3897_v29  ;;  %1778 = vrot.lane.b32.xlu1 %v3921_v55, %s2620_s27  ;;  %v607_v31 = vsub.f32 %v3928_v59, %v6458_v54  ;;  %v708_v25 = vpop.permute.xlu0 %707  ;;  %v552_v58 = vadd.f32 %v550_v11, %v548_v43  ;;  %v712_v46 = vsel %vm230_vm8, %v6459_v62, %v710_v34  ;;  %v6463_v54 = vld [vmem:[#allocation63_spill] sm:$0xff]  ;;  %v3954_v43 = vld [vmem:[%s2746_s28 + $0x38] sm:$0xff] }
  0xee   : > { %v616_v36 = vsub.f32 %v3939_v35, %v6461_v9  ;;  %v711_v8 = vsel %vm230_vm8, %v6462_v5, %v708_v25  ;;  %v3949_v48 = vsel %vm230_vm8, %v6463_v54, %v750_v19  ;;  %v684_v11 = vmul.f32 %v3729_v53, %v6440_v63 }
  0xef   : > { %v2422_v12 = vpop.eup %2421  ;;  %v600_v34 = vsub.f32 %v3954_v43, %v3794_v7  ;;  %v713_v9 = vsub.f32 %v3910_v15, %v711_v8  ;;  %v730_v25 = vsub.f32 %v3825_v26, %v3822_v57  ;;  %v3965_v19 = vadd.f32 %v915_v22, %v913_v14 }
  0xf0   : > { %v654_v2 = vmul.f32 %v2422_v12, %v3866_v56  ;;  %v3963_v42 = vadd.f32 %v684_v11, %v552_v58  ;;  %v771_v63 = vmul.f32 %v3933_v24, %v3933_v24  ;;  %v3974_v8 = vadd.f32 %v916_v4, %v914_v30  ;;  %v3992_v4 = vld [vmem:[%s2746_s28 + $0x30] sm:$0xff] }
  0xf1   : > { %v3970_v7 = vmul.f32 %v3895_v32, %v713_v9  ;;  %v3977_v27 = vmul.f32 %v3537_v13, %v607_v31  ;;  %v630_v57 = vmul.f32 %v3537_v13, %v616_v36  ;;  %v714_v14 = vsub.f32 %v3921_v55, %v712_v46  ;;  %v6465_v55 = vld [vmem:[#allocation47_spill] sm:$0xff] }
  0xf2   : > { %v655_v16 = vmul.f32 %v2422_v12, %v654_v2  ;;  %6464 = vst [vmem:[#allocation81_spill] sm:$0xff] %v3974_v8  ;;  %v626_v22 = vmul.f32 %v3537_v13, %v600_v34  ;;  %vm659_vm13 = vweird.f32 %v3866_v56  ;;  %vm660_vm14 = vweird.f32 %v2422_v12  ;;  %v6466_v8 = vld [vmem:[#allocation46_spill] sm:$0xff] }
  0xf3   : > { %v3972_v50 = vpop.eup %2423  ;;  %1794 = vrot.lane.b32.xlu2 %v3825_v26, %s2620_s27  ;;  %v769_v30 = vmul.f32 %v3970_v7, %v3970_v7  ;;  %v599_v46 = vsub.f32 %v3992_v4, %v3813_v0  ;;  %v3997_v31 = vmul.f32 %v3895_v32, %v730_v25  ;;  %v608_v0 = vsub.f32 %v3872_v28, %v3877_v3  ;;  %vm661_vm15 = vmor %vm659_vm13, %vm660_vm14 }
  0xf4   : > { %v656_v2 = vmul.f32 0.5, %v655_v16  ;;  %v644_v58 = vmul.f32 %v3972_v50, %v3897_v29  ;;  %1786 = vrot.lane.b32.xlu0 %v3835_v33, %s2620_s27  ;;  %v956_v16 = vpop.permute.xlu2 %955  ;;  %v724_v36 = vpop.permute.xlu1 %723  ;;  %v4010_v25 = vmul.f32 %v3895_v32, %v714_v14  ;;  %vm650_vm0 = vweird.f32 %v3972_v50  ;;  %v4028_v14 = vld [vmem:[%s2746_s28 + $0x50] sm:$0xff] }
  0xf5   : > { %1792 = vrot.lane.b32.xlu1 %v3844_v49, %s2620_s27  ;;  %v773_v9 = vadd.f32 %v771_v63, %v769_v30  ;;  %v4005_v1 = vsel %vm231_vm12, %v6421_v6, %v956_v16  ;;  %v718_v61 = vpop.permute.xlu0 %717  ;;  %v727_v63 = vsel %vm230_vm8, %v6466_v8, %v724_v36  ;;  %v625_v3 = vmul.f32 %v3537_v13, %v599_v46 }
  0xf6   : > { %v657_v11 = vsub.f32 1.5, %v656_v2  ;;  %v645_v34 = vmul.f32 %v3972_v50, %v644_v58  ;;  %v720_v2 = vsel %vm230_vm8, %v6465_v55, %v718_v61  ;;  %v729_v16 = vsub.f32 %v3844_v49, %v727_v63 }
  0xf7   : > { %v722_v6 = vsub.f32 %v3835_v33, %v720_v2  ;;  %v776_v61 = vmul.f32 %v3997_v31, %v3997_v31  ;;  %v615_v36 = vsub.f32 %v4028_v14, %v3856_v10  ;;  %v628_v49 = vmul.f32 %v3537_v13, %v608_v0  ;;  %v6467_v33 = vld [vmem:[#allocation84_spill] sm:$0xff] }
  0xf8   : > { %v658_v58 = vmul.f32 %v2422_v12, %v657_v11  ;;  %v646_v30 = vmul.f32 0.5, %v645_v34  ;;  %v4038_v56 = vmul.f32 %v3895_v32, %v729_v16  ;;  %vm649_vm1 = vweird.f32 %v3897_v29 }
  0xf9   : > { %v4035_v2 = vmul.f32 %v3895_v32, %v722_v6  ;;  %vm651_vm4 = vmor %vm649_vm1, %vm650_vm0 }
  0xfa   : > { %v662_v11 = vsel %vm661_vm15, %v2422_v12, %v658_v58  ;;  %v647_v34 = vsub.f32 1.5, %v646_v30  ;;  %v770_v58 = vmul.f32 %v4010_v25, %v4010_v25  ;;  %v775_v29 = vmul.f32 %v4038_v56, %v4038_v56 }
  0xfb   : > { %v4041_v46 = vmul.f32 %v662_v11, %v3729_v53  ;;  %v4044_v63 = vmul.f32 %v662_v11, %v3626_v37  ;;  %v666_v10 = vmul.f32 %v662_v11, %v3774_v60  ;;  %1117 = vrot.lane.b32.xlu2 %v3928_v59, %s2618_s8  ;;  %v772_v37 = vmul.f32 %v4035_v2, %v4035_v2 }
  0xfc   : > { %v648_v12 = vmul.f32 %v3972_v50, %v647_v34  ;;  %1109 = vrot.lane.b32.xlu0 %v3992_v4, %s2618_s8  ;;  %v966_v30 = vpop.permute.xlu2 %965  ;;  %v734_v6 = vpop.permute.xlu1 %733  ;;  %v629_v11 = vmul.f32 %v3537_v13, %v615_v36  ;;  %v777_v36 = vadd.f32 %v775_v29, %v773_v9 }
  0xfd   : > { %v670_v53 = vmul.f32 %v4041_v46, %v626_v22  ;;  %v672_v60 = vmul.f32 %v666_v10, %v628_v49  ;;  %v676_v0 = vmul.f32 %v4044_v63, %v630_v57  ;;  %1111 = vrot.lane.b32.xlu1 %v3954_v43, %s2618_s8  ;;  %v774_v22 = vadd.f32 %v772_v37, %v770_v58  ;;  %v732_v57 = vpop.permute.xlu0 %731 }
  0xfe   : > { %v652_v16 = vsel %vm651_vm4, %v3972_v50, %v648_v12  ;;  %v968_v49 = vsel %vm231_vm12, %v6434_v20, %v966_v30  ;;  %v745_v50 = vsub.f32 %v3928_v59, %v3918_v18  ;;  %v6468_v12 = vld [vmem:[#allocation55_spill] sm:$0xff]  ;;  %v4093_v18 = vadd.f32 1e-09, %v777_v36 }
  0xff   : > { %v663_v34 = vmul.f32 %v652_v16, %v3817_v45  ;;  %v665_v8 = vmul.f32 %v652_v16, %v6467_v33  ;;  %v667_v55 = vmul.f32 %v652_v16, %v3757_v47  ;;  %v674_v62 = vadd.f32 %v672_v60, %v670_v53 }
 0x100   : > { %v778_v13 = vadd.f32 %v776_v61, %v774_v22  ;;  %v4083_v58 = vsel %vm230_vm8, %v6468_v12, %v732_v57  ;;  %v4088_v47 = vmul.f32 %v3965_v19, %v6420_v17  ;;  %v756_v33 = vstv %s4032_s3  ;;  %s4870_s3 = sld [smem:[#allocation2 + $0x17]] }
 0x101   : > { %v669_v20 = vmul.f32 %v663_v34, %v625_v3  ;;  %v671_v37 = vmul.f32 %v665_v8, %v3977_v27  ;;  %v675_v45 = vmul.f32 %v667_v55, %v629_v11  ;;  %v678_v30 = vadd.f32 %v676_v0, %v674_v62  ;;  %v6469_v3 = vld [vmem:[#allocation53_spill] sm:$0xff] }
 0x102   : > { %v4091_v53 = vadd.f32 1e-09, %v778_v13  ;;  %v4096_v9 = vmul.f32 %v3933_v24, %v756_v33  ;;  %v4102_v27 = vsel %vm230_vm8, %v6469_v3, %v734_v6  ;;  %v838_v62 = vmul.f32 %v3997_v31, %v756_v33 }
 0x103   : > { %v673_v61 = vadd.f32 %v671_v37, %v669_v20  ;;  %v680_v60 = vmul.f32 %v678_v30, %v6420_v17  ;;  %1127 = vrot.lane.b32.xlu2 %v3939_v35, %s2618_s8  ;;  %v754_v19 = vsub.f32 %v3939_v35, %v3949_v48  ;;  %v4110_v0 = vstv %s4054_s7  ;;  %s5213_s7 = sld [smem:[#allocation2 + $0x8]] }
 0x104   : > { %2425 = vrsqrt.f32 %v4091_v53  ;;  %1119 = vrot.lane.b32.xlu0 %v3872_v28, %s2618_s8  ;;  %v4117_v6 = vmul.f32 %v3895_v32, %v745_v50  ;;  %v980_v11 = vpop.permute.xlu2 %979  ;;  %v748_v48 = vpop.permute.xlu1 %747  ;;  %v961_v22 = vsub.f32 %v3889_v51, %v4005_v1  ;;  %v4125_v57 = vstv %s4070_s20  ;;  %s5224_s20 = sld [smem:[#allocation2 + $0x14]] }
 0x105   : > { %v677_v29 = vadd.f32 %v675_v45, %v673_v61  ;;  %v682_v16 = vadd.f32 %v680_v60, %v3351_v41  ;;  %2427 = vrsqrt.f32 %v4093_v18  ;;  %1125 = vrot.lane.b32.xlu1 %v4028_v14, %s2618_s8  ;;  %v970_v13 = vsub.f32 %v3825_v26, %v968_v49  ;;  %v742_v50 = vpop.permute.xlu0 %741  ;;  %v6470_v60 = vld [vmem:[#allocation65_spill] sm:$0xff] }
 0x106   : > { %v4131_v36 = vsel %vm231_vm12, %v6456_v44, %v980_v11  ;;  %v821_v61 = vmul.f32 %v3970_v7, %v756_v33  ;;  %v4138_v1 = vmul.f32 %v3895_v32, %v754_v19  ;;  %v822_v49 = vmul.f32 %v4010_v25, %v756_v33 }
 0x107   : > { %v679_v20 = vmul.f32 %v677_v29, %v6420_v17  ;;  %v696_v37 = vmul.f32 %v682_v16, %v666_v10  ;;  %v704_v45 = vmul.f32 %v682_v16, %v4044_v63  ;;  %v688_v30 = vmul.f32 %v682_v16, %v4041_v46 }
 0x108   : > { %v4144_v44 = vsel %vm230_vm8, %v6470_v60, %v742_v50  ;;  %v4153_v19 = vmul.f32 %v4110_v0, %v961_v22  ;;  %v830_v16 = vmul.f32 %v4035_v2, %v756_v33  ;;  %v4157_v35 = vmul.f32 %v4110_v0, %v970_v13  ;;  %v6471_v50 = vld [vmem:[#allocation64_spill] sm:$0xff] }
 0x109   : > { %v681_v11 = vadd.f32 %v679_v20, %v3351_v41  ;;  %v698_v10 = vadd.f32 %v696_v37, %v3879_v23  ;;  %v706_v63 = vadd.f32 %v704_v45, %v3881_v52  ;;  %v690_v46 = vadd.f32 %v688_v30, %v3963_v42  ;;  %v6472_v42 = vld [vmem:[#allocation26_spill] sm:$0xff] }
 0x10a   : > { %v4150_v29 = vpop.eup %2425  ;;  %v751_v20 = vsel %vm230_vm8, %v6471_v50, %v748_v48  ;;  %v737_v48 = vsub.f32 %v3992_v4, %v4083_v58  ;;  %vm787_vm6 = vweird.f32 %v4093_v18  ;;  %vm797_vm7 = vweird.f32 %v4091_v53 }
 0x10b   : > { %v2428_v60 = vpop.eup %2427  ;;  %v695_v23 = vmul.f32 %v681_v11, %v665_v8  ;;  %v703_v37 = vmul.f32 %v681_v11, %v667_v55  ;;  %v687_v52 = vmul.f32 %v681_v11, %v663_v34  ;;  %v4162_v45 = vadd.f32 %v822_v49, %v690_v46  ;;  %1255 = vrot.lane.b32.xlu2 %v6472_v42, %s2618_s8  ;;  %v6473_v55 = vld [vmem:[#allocation28_spill] sm:$0xff]  ;;  %v6474_v46 = vld [vmem:[#allocation27_spill] sm:$0xff] }
 0x10c   : > { %v792_v22 = vmul.f32 %v4150_v29, %v4091_v53  ;;  %v4170_v13 = vadd.f32 %v830_v16, %v698_v10  ;;  %v782_v30 = vmul.f32 %v2428_v60, %v4093_v18  ;;  %1247 = vrot.lane.b32.xlu0 %v6473_v55, %s2618_s8  ;;  %v837_v11 = vmul.f32 %v4038_v56, %v756_v33  ;;  %v990_v10 = vpop.permute.xlu2 %989  ;;  %v950_v16 = vpop.permute.xlu1 %949 }
 0x10d   : > { %v697_v8 = vadd.f32 %v695_v23, %v3849_v21  ;;  %v705_v34 = vadd.f32 %v703_v37, %v3869_v39  ;;  %v689_v49 = vadd.f32 %v687_v52, %v3925_v40  ;;  %1249 = vrot.lane.b32.xlu1 %v6474_v46, %s2618_s8  ;;  %v1011_v42 = vmul.f32 %v4153_v19, %v4153_v19  ;;  %v948_v21 = vpop.permute.xlu0 %947 }
 0x10e   : > { %v783_v58 = vmul.f32 %v2428_v60, %v782_v30  ;;  %v793_v50 = vmul.f32 %v4150_v29, %v792_v22  ;;  %v4186_v55 = vadd.f32 %v838_v62, %v706_v63  ;;  %v4194_v40 = vmul.f32 %v4157_v35, %v4157_v35 }
 0x10f   : > { %v4188_v23 = vadd.f32 %v821_v61, %v689_v49  ;;  %v4190_v39 = vadd.f32 %v837_v11, %v705_v34  ;;  %v4197_v33 = vadd.f32 %v4096_v9, %v697_v8  ;;  %v763_v37 = vmul.f32 %v3895_v32, %v737_v48 }
 0x110   : > { %v784_v52 = vmul.f32 0.5, %v783_v58  ;;  %v738_v62 = vsub.f32 %v3954_v43, %v4102_v27  ;;  %v794_v63 = vmul.f32 0.5, %v793_v50  ;;  %vm788_vm8 = vweird.f32 %v2428_v60 }
 0x111   : > { %v746_v61 = vsub.f32 %v3872_v28, %v4144_v44  ;;  %v753_v22 = vsub.f32 %v4028_v14, %v751_v20  ;;  %v4208_v30 = vsel %vm231_vm12, %v6463_v54, %v990_v10  ;;  %vm798_vm5 = vweird.f32 %v4150_v29  ;;  %v6475_v20 = vld [vmem:[#allocation29_spill] sm:$0xff]  ;;  %vm789_vm9 = vmor %vm787_vm6, %vm788_vm8  ;;  %v6477_v10 = vld [vmem:[#allocation43_spill] sm:$0xff] }
 0x112   : > { %v785_v9 = vsub.f32 1.5, %v784_v52  ;;  %v795_v8 = vsub.f32 1.5, %v794_v63  ;;  %v951_v27 = vsel %vm231_vm12, %v6462_v5, %v948_v21  ;;  %v858_v44 = vstv %s4164_s23  ;;  %v6476_v5 = vld [vmem:[#allocation31_spill] sm:$0xff]  ;;  %vm799_vm10 = vmor %vm797_vm7, %vm798_vm5  ;;  %v6478_v21 = vld [vmem:[#allocation30_spill] sm:$0xff]  ;;  %s5399_s23 = sld [smem:[#allocation2 + $0xa]] }
 0x113   : > { %v953_v50 = vsub.f32 %v3910_v15, %v951_v27  ;;  %1265 = vrot.lane.b32.xlu2 %v6475_v20, %s2618_s8  ;;  %v764_v48 = vmul.f32 %v3895_v32, %v738_v62  ;;  %v766_v53 = vmul.f32 %v3895_v32, %v746_v61  ;;  %v767_v18 = vmul.f32 %v3895_v32, %v753_v22 }
 0x114   : > { %v786_v54 = vmul.f32 %v2428_v60, %v785_v9  ;;  %v796_v34 = vmul.f32 %v4150_v29, %v795_v8  ;;  %1257 = vrot.lane.b32.xlu0 %v6476_v5, %s2618_s8  ;;  %v952_v58 = vsel %vm231_vm12, %v6477_v10, %v950_v16  ;;  %v1094_v52 = vpop.permute.xlu2 %1093  ;;  %v964_v62 = vpop.permute.xlu1 %963  ;;  %v921_v61 = vadd.f32 %v4088_v47, %v3351_v41  ;;  %v6482_v5 = vld [vmem:[#allocation62_spill] sm:$0xff] }
 0x115   : > { %v4229_v11 = vmul.f32 %v4110_v0, %v953_v50  ;;  %1263 = vrot.lane.b32.xlu1 %v6478_v21, %s2618_s8  ;;  %v4242_v32 = vsel %vm231_vm12, %v3889_v51, %v1094_v52  ;;  %v958_v22 = vpop.permute.xlu0 %957  ;;  %v4263_v46 = vmul.f32 %v6482_v5, %v858_v44  ;;  %s4487_s8 = sld [smem:[#allocation2 + $0x13]]  ;;  %vm236_vm4 = vcmp.lt.s32.totalorder %v3195_v38, 2 }
 0x116   : > { %v790_v63 = vsel %vm789_vm9, %v2428_v60, %v786_v54  ;;  %v800_v9 = vsel %vm799_vm10, %v4150_v29, %v796_v34  ;;  %v6479_v54 = vld [vmem:[#allocation81_spill] sm:$0xff]  ;;  %vm237_vm8 = vcmp.ge.s32.totalorder %v3195_v38, 126 }
 0x117   : > { %v801_v8 = vmul.f32 %v790_v63, %v3970_v7  ;;  %v803_v16 = vmul.f32 %v790_v63, %v3933_v24  ;;  %v802_v27 = vmul.f32 %v800_v9, %v4010_v25  ;;  %v806_v50 = vmul.f32 %v800_v9, %v3997_v31  ;;  %v6480_v31 = vld [vmem:[#allocation89_spill] sm:$0xff] }
 0x118   : > { %v804_v60 = vmul.f32 %v800_v9, %v4035_v2  ;;  %v805_v29 = vmul.f32 %v790_v63, %v4038_v56  ;;  %v1009_v47 = vmul.f32 %v4229_v11, %v4229_v11  ;;  %v920_v34 = vmul.f32 %v6479_v54, %v6420_v17  ;;  %v6481_v56 = vld [vmem:[#allocation59_spill] sm:$0xff] }
 0x119   : > { %v807_v10 = vmul.f32 %v801_v8, %v763_v37  ;;  %v809_v52 = vmul.f32 %v803_v16, %v4117_v6  ;;  %v808_v7 = vmul.f32 %v802_v27, %v764_v48  ;;  %v814_v24 = vmul.f32 %v806_v50, %v4138_v1  ;;  %v6483_v54 = vld [vmem:[#allocation51_spill] sm:$0xff]  ;;  %v6484_v1 = vld [vmem:[#allocation58_spill] sm:$0xff] }
 0x11a   : > { %v810_v49 = vmul.f32 %v804_v60, %v766_v53  ;;  %v813_v25 = vmul.f32 %v805_v29, %v767_v18  ;;  %v4256_v21 = vadd.f32 %v1011_v42, %v1009_v47  ;;  %v954_v2 = vsub.f32 %v6480_v31, %v952_v58  ;;  %v6485_v42 = vld [vmem:[#allocation47_spill] sm:$0xff]  ;;  %v6486_v18 = vld [vmem:[#allocation46_spill] sm:$0xff] }
 0x11b   : > { %v811_v9 = vadd.f32 %v809_v52, %v807_v10  ;;  %v4260_v63 = vmul.f32 %v6481_v56, %v858_v44  ;;  %v4266_v37 = vmul.f32 %v6483_v54, %v858_v44  ;;  %1531 = vrot.lane.b32.xlu2 %v3928_v59, %s2619_s29  ;;  %v939_v48 = vmul.f32 %v6484_v1, %v858_v44  ;;  %v6487_v47 = vld [vmem:[#allocation50_spill] sm:$0xff]  ;;  %v6488_v52 = vld [vmem:[#allocation75_spill] sm:$0xff]  ;;  %v6489_v1 = vld [vmem:[#allocation73_spill] sm:$0xff] }
 0x11c   : > { %v812_v6 = vadd.f32 %v810_v49, %v808_v7  ;;  %v960_v53 = vsel %vm231_vm12, %v6485_v42, %v958_v22  ;;  %v967_v58 = vsel %vm231_vm12, %v6486_v18, %v964_v62  ;;  %1523 = vrot.lane.b32.xlu0 %v3992_v4, %s2619_s29  ;;  %v923_v10 = vmul.f32 %v6487_v47, %v858_v44  ;;  %v1104_v7 = vpop.permute.xlu2 %1103  ;;  %v974_v54 = vpop.permute.xlu1 %973  ;;  %v6490_v62 = vld [vmem:[#allocation60_spill] sm:$0xff]  ;;  %v6491_v47 = vld [vmem:[#allocation45_spill] sm:$0xff] }
 0x11d   : > { %v815_v5 = vadd.f32 %v813_v25, %v811_v9  ;;  %v927_v56 = vmul.f32 %v921_v61, %v6488_v52  ;;  %v922_v49 = vadd.f32 %v920_v34, %v3351_v41  ;;  %1525 = vrot.lane.b32.xlu1 %v3954_v43, %s2619_s29  ;;  %v4285_v42 = vmul.f32 %v921_v61, %v6489_v1  ;;  %v972_v25 = vpop.permute.xlu0 %971  ;;  %v6492_v34 = vld [vmem:[#allocation67_spill] sm:$0xff] }
 0x11e   : > { %v816_v22 = vadd.f32 %v814_v24, %v812_v6  ;;  %v924_v18 = vmul.f32 %v6490_v62, %v858_v44  ;;  %v4289_v20 = vmul.f32 %v4110_v0, %v954_v2  ;;  %v962_v52 = vsub.f32 %v6491_v47, %v960_v53  ;;  %v6493_v6 = vld [vmem:[#allocation76_spill] sm:$0xff]  ;;  %v6495_v62 = vld [vmem:[#allocation78_spill] sm:$0xff] }
 0x11f   : > { %v817_v9 = vmul.f32 %v815_v5, %v6420_v17  ;;  %v969_v31 = vsub.f32 %v6492_v34, %v967_v58  ;;  %v4297_v15 = vsel %vm231_vm12, %v3825_v26, %v1104_v7  ;;  %v943_v1 = vmul.f32 %v921_v61, %v6493_v6  ;;  %v6494_v5 = vld [vmem:[#allocation77_spill] sm:$0xff] }
 0x120   : > { %v818_v24 = vmul.f32 %v816_v22, %v6420_v17  ;;  %v4304_v44 = vsel %vm231_vm12, %v6468_v12, %v972_v25  ;;  %v4309_v2 = vsel %vm231_vm12, %v6469_v3, %v974_v54  ;;  %v1061_v58 = vmul.f32 %v4229_v11, %v4125_v57 }
 0x121   : > { %v819_v53 = vadd.f32 %v817_v9, %v3351_v41  ;;  %v928_v7 = vmul.f32 %v922_v49, %v6494_v5  ;;  %v4316_v22 = vmul.f32 %v4110_v0, %v962_v52  ;;  %v944_v12 = vmul.f32 %v922_v49, %v6495_v62  ;;  %v6496_v5 = vld [vmem:[#allocation82_spill] sm:$0xff] }
 0x122   : > { %v820_v61 = vadd.f32 %v818_v24, %v3351_v41  ;;  %v1010_v25 = vmul.f32 %v4289_v20, %v4289_v20  ;;  %v4323_v3 = vmul.f32 %v4110_v0, %v969_v31  ;;  %v6497_v41 = vld [vmem:[#allocation79_spill] sm:$0xff] }
 0x123   : > { %v825_v54 = vmul.f32 %v819_v53, %v801_v8  ;;  %v833_v9 = vmul.f32 %v819_v53, %v803_v16  ;;  %v841_v6 = vmul.f32 %v819_v53, %v805_v29  ;;  %v1012_v17 = vmul.f32 %v4316_v22, %v4316_v22  ;;  %1541 = vrot.lane.b32.xlu2 %v6496_v5, %s2619_s29 }
 0x124   : > { %v834_v52 = vmul.f32 %v820_v61, %v804_v60  ;;  %v842_v34 = vmul.f32 %v820_v61, %v806_v50  ;;  %v826_v24 = vmul.f32 %v820_v61, %v802_v27  ;;  %v936_v62 = vmul.f32 %v922_v49, %v6497_v41  ;;  %1533 = vrot.lane.b32.xlu0 %v3872_v28, %s2619_s29  ;;  %v1232_v53 = vpop.permute.xlu2 %1231  ;;  %v988_v47 = vpop.permute.xlu1 %987 }
 0x125   : > { %v835_v31 = vadd.f32 %v833_v9, %v4197_v33  ;;  %v843_v8 = vadd.f32 %v841_v6, %v4190_v39  ;;  %v827_v16 = vadd.f32 %v825_v54, %v4188_v23  ;;  %v1014_v29 = vadd.f32 %v1012_v17, %v1010_v25  ;;  %1539 = vrot.lane.b32.xlu1 %v4028_v14, %s2619_s29  ;;  %v982_v33 = vpop.permute.xlu0 %981  ;;  %s214_s29 = smul.f32 %s4593_s19, %s4582_s17  ;;  %s5826_s19 = sld [smem:[#allocation2 + $0x1a]] }
 0x126   : > { %v836_v50 = vadd.f32 %v834_v52, %v4170_v13  ;;  %v844_v27 = vadd.f32 %v842_v34, %v4186_v55  ;;  %v828_v41 = vadd.f32 %v826_v24, %v4162_v45  ;;  %v1015_v60 = vmul.f32 %v4323_v3, %v4323_v3 }
 0x127   : > { %v941_v49 = vadd.f32 %v939_v48, %v843_v8  ;;  %v925_v39 = vadd.f32 %v923_v10, %v827_v16  ;;  %v1062_v17 = vmul.f32 %v4289_v20, %v4125_v57  ;;  %v1018_v23 = vadd.f32 %v4194_v40, %v1014_v29  ;;  %s215_s30 = smul.f32 %s4616_s25, %s214_s29 }
 0x128   : > { %v934_v61 = vadd.f32 %v4260_v63, %v836_v50  ;;  %v926_v25 = vadd.f32 %v924_v18, %v828_v41  ;;  %v1070_v13 = vmul.f32 %v4316_v22, %v4125_v57  ;;  %v1017_v55 = vadd.f32 %v1015_v60, %v4256_v21 }
 0x129   : > { %v929_v45 = vadd.f32 %v927_v56, %v925_v39  ;;  %v4349_v34 = vadd.f32 1e-09, %v1018_v23  ;;  %v945_v54 = vadd.f32 %v943_v1, %v941_v49  ;;  %v1077_v48 = vmul.f32 %v4323_v3, %v4125_v57 }
 0x12a   : > { %v942_v10 = vadd.f32 %v4263_v46, %v844_v27  ;;  %v930_v9 = vadd.f32 %v928_v7, %v926_v25  ;;  %v938_v6 = vadd.f32 %v936_v62, %v934_v61  ;;  %v4354_v40 = vadd.f32 1e-09, %v1017_v55  ;;  %v6502_v27 = vld [vmem:[#allocation64_spill] sm:$0xff]  ;;  %v6510_v61 = vld [vmem:[#allocation49_spill] sm:$0xff]  ;;  %v6511_v55 = vld [vmem:[#allocation39_spill] sm:$0xff] }
 0x12b   : > { %v933_v63 = vadd.f32 %v4266_v37, %v835_v31  ;;  %v4357_v18 = vadd.f32 %v1061_v58, %v929_v45  ;;  %2429 = vrsqrt.f32 %v4349_v34  ;;  %v4360_v21 = vadd.f32 %v1077_v48, %v945_v54  ;;  %1808 = vrot.lane.b32.xlu2 %v3928_v59, %s2620_s27  ;;  %v6499_v58 = vld [vmem:[#allocation16_spill] sm:$0xff]  ;;  %v6501_v31 = vld [vmem:[#allocation65_spill] sm:$0xff] }
 0x12c   : > { %v994_v56 = vsub.f32 %v6496_v5, %v4208_v30  ;;  %v4366_v1 = vadd.f32 %v1062_v17, %v930_v9  ;;  %v4368_v46 = vadd.f32 %v1070_v13, %v938_v6  ;;  %2431 = vrsqrt.f32 %v4354_v40  ;;  %1800 = vrot.lane.b32.xlu0 %v3992_v4, %s2620_s27  ;;  %v1088_v52 = vpop.permute.xlu1 %1087  ;;  %v6512_v54 = vld [vmem:[#allocation40_spill] sm:$0xff]  ;;  %v6513_v9 = vld [vmem:[#allocation57_spill] sm:$0xff] }
 0x12d   : > { %v4375_v37 = vsub.f32 %v3889_v51, %v4242_v32  ;;  %v4382_v7 = vsel %vm231_vm12, %v6499_v58, %v1232_v53  ;;  %1802 = vrot.lane.b32.xlu1 %v3954_v43, %s2620_s27  ;;  %v1242_v30 = vpop.permute.xlu2 %1241  ;;  %v1078_v24 = vmul.f32 %v4157_v35, %v4125_v57  ;;  %v4390_v62 = vsub.f32 %v3825_v26, %v4297_v15  ;;  %v1086_v16 = vpop.permute.xlu0 %1085 }
 0x12e   : > { %v946_v32 = vadd.f32 %v944_v12, %v942_v10  ;;  %v984_v8 = vsel %vm231_vm12, %v6501_v31, %v982_v33  ;;  %v1069_v29 = vmul.f32 %v4153_v19, %v4125_v57  ;;  %v977_v53 = vsub.f32 %v3992_v4, %v4304_v44  ;;  %v6504_v33 = vld [vmem:[#allocation38_spill] sm:$0xff] }
 0x12f   : > { %6498 = vst [vmem:[#allocation86_spill] sm:$0xff] %v4375_v37  ;;  %v937_v50 = vadd.f32 %v4285_v42, %v933_v63  ;;  %v991_v41 = vsel %vm231_vm12, %v6502_v27, %v988_v47  ;;  %v6503_v15 = vsub.f32 %v3928_v59, %v4131_v36  ;;  %v4410_v60 = vmul.f32 %v4110_v0, %v994_v56  ;;  %v6506_v44 = vld [vmem:[#allocation34_spill] sm:$0xff]  ;;  %v6509_v36 = vld [vmem:[#allocation83_spill] sm:$0xff]  ;;  %v6514_v63 = vld [vmem:[#allocation56_spill] sm:$0xff] }
 0x130   : > { %6500 = vst [vmem:[#allocation74_spill] sm:$0xff] %v4390_v62  ;;  %v4414_v57 = vmul.f32 %v4375_v37, %v6504_v33  ;;  %v4416_v4 = vadd.f32 %v1078_v24, %v946_v32  ;;  %v1941_v49 = vmul.f32 %v4375_v37, %v6506_v44  ;;  %v6507_v47 = vld [vmem:[#allocation54_spill] sm:$0xff]  ;;  %v1089_v17 = vsel %vm231_vm12, %v6509_v36, %v1086_v16 }
 0x131   : > { %v4407_v12 = vmul.f32 %v4110_v0, %v6503_v15  ;;  %v2430_v42 = vpop.eup %2429  ;;  %v4422_v39 = vmul.f32 %v4375_v37, %v6507_v47  ;;  %v4424_v59 = vadd.f32 %v1069_v29, %v937_v50  ;;  %v1961_v25 = vmul.f32 %v4375_v37, %v6510_v61  ;;  %v6519_v61 = vld [vmem:[#allocation41_spill] sm:$0xff] }
 0x132   : > { %6505 = vst [vmem:[#allocation88_spill] sm:$0xff] %v4414_v57  ;;  %v2432_v23 = vpop.eup %2431  ;;  %v1032_v13 = vmul.f32 %v2430_v42, %v4349_v34  ;;  %v4434_v45 = vmul.f32 %v4390_v62, %v6511_v55  ;;  %v4438_v48 = vmul.f32 %v4390_v62, %v6512_v54  ;;  %v4443_v6 = vmul.f32 %v4390_v62, %v6513_v9 }
 0x133   : > { %6508 = vst [vmem:[#allocation68_spill] sm:$0xff] %v4422_v39  ;;  %v1022_v10 = vmul.f32 %v2432_v23, %v4354_v40  ;;  %v4447_v56 = vmul.f32 %v4390_v62, %v6514_v63  ;;  %v4450_v58 = vmul.f32 %v4110_v0, %v977_v53  ;;  %1818 = vrot.lane.b32.xlu2 %v6496_v5, %s2620_s27  ;;  %vm1027_vm11 = vweird.f32 %v4354_v40  ;;  %v6515_v53 = vld [vmem:[#allocation89_spill] sm:$0xff] }
 0x134   : > { %v978_v24 = vsub.f32 %v3954_v43, %v4309_v2  ;;  %v1033_v32 = vmul.f32 %v2430_v42, %v1032_v13  ;;  %v4458_v31 = vsub.f32 %v6509_v36, %v1089_v17  ;;  %1810 = vrot.lane.b32.xlu0 %v3872_v28, %s2620_s27  ;;  %vm1037_vm13 = vweird.f32 %v4349_v34  ;;  %v4471_v2 = vpop.permute.xlu1 %1101  ;;  %v6516_v17 = vld [vmem:[#allocation33_spill] sm:$0xff] }
 0x135   : > { %v1023_v16 = vmul.f32 %v2432_v23, %v1022_v10  ;;  %v4464_v29 = vstv %s4377_s5  ;;  %v1090_v5 = vsel %vm231_vm12, %v6515_v53, %v1088_v52  ;;  %1816 = vrot.lane.b32.xlu1 %v4028_v14, %s2620_s27  ;;  %v1508_v43 = vpop.permute.xlu2 %1507  ;;  %v1237_v27 = vsub.f32 %v3889_v51, %v4382_v7  ;;  %v1096_v10 = vpop.permute.xlu0 %1095  ;;  %v6517_v52 = vld [vmem:[#allocation48_spill] sm:$0xff]  ;;  %s4749_s27 = sld [smem:[#allocation2 + $0xb]] }
 0x136   : > { %v1034_v50 = vmul.f32 0.5, %v1033_v32  ;;  %v986_v15 = vsub.f32 %v3872_v28, %v984_v8  ;;  %v1943_v13 = vmul.f32 %v4458_v31, %v6516_v17  ;;  %v993_v37 = vsub.f32 %v4028_v14, %v991_v41  ;;  %v6518_v32 = vld [vmem:[#allocation21_spill] sm:$0xff]  ;;  %s5439_s5 = sld [smem:[#allocation2 + $0x16]] }
 0x137   : > { %v1024_v62 = vmul.f32 0.5, %v1023_v16  ;;  %v1959_v36 = vmul.f32 %v4458_v31, %v6517_v52  ;;  %v4482_v39 = vsub.f32 %v6515_v53, %v1090_v5  ;;  %vm1038_vm14 = vweird.f32 %v2430_v42 }
 0x138   : > { %v1035_v57 = vsub.f32 1.5, %v1034_v50  ;;  %v1244_v7 = vsel %vm231_vm12, %v6518_v32, %v1242_v30  ;;  %v1945_v28 = vsub.f32 %v1941_v49, %v1943_v13  ;;  %vm1028_vm15 = vweird.f32 %v2432_v23  ;;  %v6520_v50 = vld [vmem:[#allocation61_spill] sm:$0xff]  ;;  %vm1039_vm0 = vmor %vm1037_vm13, %vm1038_vm14  ;;  %v6521_v13 = vld [vmem:[#allocation87_spill] sm:$0xff] }
 0x139   : > { %v1025_v8 = vsub.f32 1.5, %v1024_v62  ;;  %v1963_v16 = vsub.f32 %v1959_v36, %v1961_v25  ;;  %v1936_v14 = vmul.f32 %v4482_v39, %v6519_v61  ;;  %v1004_v41 = vmul.f32 %v4110_v0, %v978_v24  ;;  %vm1029_vm1 = vmor %vm1027_vm11, %vm1028_vm15 }
 0x13a   : > { %v1036_v52 = vmul.f32 %v2430_v42, %v1035_v57  ;;  %v1006_v5 = vmul.f32 %v4110_v0, %v986_v15  ;;  %v1956_v53 = vmul.f32 %v4482_v39, %v6520_v50  ;;  %v1007_v62 = vmul.f32 %v4110_v0, %v993_v37 }
 0x13b   : > { %v1026_v30 = vmul.f32 %v2432_v23, %v1025_v8  ;;  %v1246_v49 = vsub.f32 %v3825_v26, %v1244_v7  ;;  %v2022_v36 = vadd.f32 %v1963_v16, %v1945_v28  ;;  %v1940_v25 = vsub.f32 %v1936_v14, %v4438_v48 }
 0x13c   : > { %v1040_v57 = vsel %vm1039_vm0, %v2430_v42, %v1036_v52  ;;  %v1958_v24 = vsub.f32 %v4447_v56, %v1956_v53  ;;  %v6522_v56 = vld [vmem:[#allocation99_spill] sm:$0xff]  ;;  %v1511_v28 = vsub.f32 %v3889_v51, %v1508_v43  ;;  %v4528_v8 = vstv %s4487_s8  ;;  %s5680_s8 = sld [smem:[#allocation2 + $0x21]] }
 0x13d   : > { %v1030_v15 = vsel %vm1029_vm1, %v2432_v23, %v1026_v30  ;;  %v1042_v34 = vmul.f32 %v1040_v57, %v4289_v20  ;;  %v1046_v0 = vmul.f32 %v1040_v57, %v4157_v35  ;;  %v1044_v26 = vmul.f32 %v1040_v57, %v4316_v22  ;;  %v4511_v37 = vpop.permute.xlu2 %1517  ;;  %v4521_v23 = vpop.permute.xlu1 %1225  ;;  %v6525_v30 = vld [vmem:[#allocation96_spill] sm:$0xff] }
 0x13e   : > { %v1041_v40 = vmul.f32 %v1030_v15, %v4229_v11  ;;  %v1043_v42 = vmul.f32 %v1030_v15, %v4153_v19  ;;  %v1045_v48 = vmul.f32 %v1030_v15, %v4323_v3  ;;  %v6523_v53 = vsub.f32 %v6521_v13, %v6522_v56  ;;  %v1224_v20 = vpop.permute.xlu0 %1223  ;;  %v6530_v13 = vld [vmem:[#allocation67_spill] sm:$0xff] }
 0x13f   : > { %v1048_v35 = vmul.f32 %v1042_v34, %v1004_v41  ;;  %v1050_v22 = vmul.f32 %v1044_v26, %v1006_v5  ;;  %v1054_v32 = vmul.f32 %v1046_v0, %v4410_v60  ;;  %v2013_v7 = vadd.f32 %v1958_v24, %v1940_v25  ;;  %v6526_v41 = vld [vmem:[#allocation93_spill] sm:$0xff] }
 0x140   : > { %v4519_v52 = vadd.f32 %v2022_v36, %v6523_v53  ;;  %v1047_v11 = vmul.f32 %v1041_v40, %v4450_v58  ;;  %v1049_v19 = vmul.f32 %v1043_v42, %v4407_v12  ;;  %v1053_v3 = vmul.f32 %v1045_v48, %v1007_v62  ;;  %v6529_v58 = vld [vmem:[#allocation45_spill] sm:$0xff]  ;;  %v6532_v53 = vld [vmem:[#allocation66_spill] sm:$0xff] }
 0x141   : > { %v4531_v16 = vmul.f32 %v4464_v29, %v1237_v27  ;;  %v1052_v14 = vadd.f32 %v1050_v22, %v1048_v35  ;;  %v6527_v5 = vsub.f32 %v6525_v30, %v6526_v41  ;;  %v4539_v57 = vstv %s4493_s14  ;;  %s5687_s14 = sld [smem:[#allocation2 + $0x22]] }
 0x142   : > { %6524 = vst [vmem:[#allocation71_spill] sm:$0xff] %v4519_v52  ;;  %v1051_v60 = vadd.f32 %v1049_v19, %v1047_v11  ;;  %v4543_v12 = vsel %vm236_vm4, 0.0, %v1511_v28  ;;  %v1098_v51 = vsel %vm231_vm12, %v6529_v58, %v1096_v10  ;;  %v4549_v27 = vmul.f32 %v4464_v29, %v1246_v49  ;;  %v6531_v10 = vld [vmem:[#allocation17_spill] sm:$0xff] }
 0x143   : > { %v4536_v36 = vadd.f32 %v2013_v7, %v6527_v5  ;;  %v1056_v43 = vadd.f32 %v1054_v32, %v1052_v14  ;;  %v4553_v62 = vmul.f32 %v4539_v57, %v4482_v39  ;;  %v4556_v25 = vsub.f32 %v6529_v58, %v1098_v51 }
 0x144   : > { %v1055_v24 = vadd.f32 %v1053_v3, %v1051_v60  ;;  %v4559_v15 = vstv %s4503_s16  ;;  %v1105_v56 = vsel %vm231_vm12, %v6530_v13, %v4471_v2  ;;  %v4568_v49 = vsel %vm231_vm12, %v6531_v10, %v1224_v20  ;;  %v6533_v3 = vld [vmem:[#allocation69_spill] sm:$0xff]  ;;  %s5698_s16 = sld [smem:[#allocation2 + $0x23]] }
 0x145   : > { %6528 = vst [vmem:[#allocation80_spill] sm:$0xff] %v4536_v36  ;;  %v1058_v35 = vmul.f32 %v1056_v43, %v6532_v53  ;;  %v4573_v22 = vmul.f32 %v4458_v31, %v6504_v33  ;;  %v1944_v32 = vmul.f32 %v4482_v39, %v6511_v55  ;;  %v1960_v7 = vmul.f32 %v4482_v39, %v6513_v9  ;;  %v4579_v11 = vpop.permute.xlu2 %1784 }
 0x146   : > { %v1057_v2 = vmul.f32 %v1055_v24, %v6532_v53  ;;  %v1932_v20 = vmul.f32 %v4556_v25, %v6519_v61  ;;  %v1942_v19 = vmul.f32 %v4556_v25, %v6512_v54  ;;  %v1948_v33 = vmul.f32 %v4556_v25, %v6520_v50  ;;  %v4605_v30 = vpop.permute.xlu0 %1233  ;;  %v4607_v41 = vpop.permute.xlu1 %1239 }
 0x147   : > { %v1060_v55 = vadd.f32 %v1058_v35, %v6533_v3  ;;  %v1200_v39 = vmul.f32 %v4553_v62, %v4559_v15  ;;  %v1962_v9 = vmul.f32 %v4556_v25, %v6514_v63  ;;  %v4598_v28 = vsub.f32 %v6530_v13, %v1105_v56  ;;  %v6539_v35 = vld [vmem:[#allocation42_spill] sm:$0xff] }
 0x148   : > { %v1059_v61 = vadd.f32 %v1057_v2, %v6533_v3  ;;  %v1934_v54 = vsub.f32 %v4434_v45, %v1932_v20  ;;  %v1946_v50 = vsub.f32 %v1942_v19, %v1944_v32  ;;  %v1952_v14 = vsub.f32 %v1948_v33, %v4443_v6  ;;  %v6541_v2 = vld [vmem:[#allocation109_spill] sm:$0xff]  ;;  %v6542_v20 = vld [vmem:[#allocation18_spill] sm:$0xff] }
 0x149   : > { %v1066_v5 = vmul.f32 %v1060_v55, %v1042_v34  ;;  %v1074_v60 = vmul.f32 %v1060_v55, %v1044_v26  ;;  %v1082_v58 = vmul.f32 %v1060_v55, %v1046_v0  ;;  %v1964_v63 = vsub.f32 %v1960_v7, %v1962_v9  ;;  %v6544_v55 = vld [vmem:[#allocation48_spill] sm:$0xff]  ;;  %v6545_v9 = vld [vmem:[#allocation49_spill] sm:$0xff] }
 0x14a   : > { %v1065_v51 = vmul.f32 %v1059_v61, %v1041_v40  ;;  %v1073_v43 = vmul.f32 %v1059_v61, %v1043_v42  ;;  %v1081_v24 = vmul.f32 %v1059_v61, %v1045_v48  ;;  %v2002_v13 = vadd.f32 %v1952_v14, %v1934_v54  ;;  %v6547_v14 = vld [vmem:[#allocation110_spill] sm:$0xff] }
 0x14b   : > { %v1068_v56 = vadd.f32 %v1066_v5, %v4366_v1  ;;  %v4611_v10 = vadd.f32 %v1074_v60, %v4368_v46  ;;  %v4614_v45 = vadd.f32 %v1082_v58, %v4416_v4  ;;  %v2023_v6 = vadd.f32 %v1964_v63, %v1946_v50  ;;  %v6534_v1 = vld [vmem:[#allocation92_spill] sm:$0xff]  ;;  %v6535_v46 = vld [vmem:[#allocation107_spill] sm:$0xff]  ;;  %v6546_v50 = vld [vmem:[#allocation101_spill] sm:$0xff] }
 0x14c   : > { %v4619_v34 = vadd.f32 %v1065_v51, %v4357_v18  ;;  %v4622_v0 = vadd.f32 %v1073_v43, %v4424_v59  ;;  %v4625_v26 = vadd.f32 %v1081_v24, %v4360_v21  ;;  %v6536_v40 = vsub.f32 %v6534_v1, %v6535_v46  ;;  %v6538_v18 = vld [vmem:[#allocation108_spill] sm:$0xff]  ;;  %v6555_v46 = vld [vmem:[#allocation23_spill] sm:$0xff] }
 0x14d   : > { %v1955_v4 = vmul.f32 %v4458_v31, %v6507_v47  ;;  %v4632_v48 = vadd.f32 %v1200_v39, %v1068_v56  ;;  %v6540_v32 = vsub.f32 %v6538_v18, %v6539_v35  ;;  %v1929_v21 = vmul.f32 %v4598_v28, %v6516_v17  ;;  %v4641_v7 = vpop.permute.xlu2 %1794  ;;  %v6552_v43 = vld [vmem:[#allocation68_spill] sm:$0xff] }
 0x14e   : > { %v2004_v42 = vadd.f32 %v2002_v13, %v6536_v40  ;;  %v6543_v19 = vsub.f32 %v6541_v2, %v6542_v20  ;;  %v1937_v47 = vmul.f32 %v4598_v28, %v6506_v44  ;;  %v1949_v39 = vmul.f32 %v4598_v28, %v6544_v55  ;;  %v6550_v44 = vld [vmem:[#allocation88_spill] sm:$0xff]  ;;  %v6558_v20 = vld [vmem:[#allocation102_spill] sm:$0xff] }
 0x14f   : > { %6537 = vst [vmem:[#allocation70_spill] sm:$0xff] %v4632_v48  ;;  %v2025_v59 = vadd.f32 %v2023_v6, %v6540_v32  ;;  %v1953_v61 = vmul.f32 %v4598_v28, %v6545_v9  ;;  %v1287_v54 = vmul.f32 %v4531_v16, %v4531_v16  ;;  %v4656_v17 = vmul.f32 %v4539_v57, %v4458_v31  ;;  %v6554_v6 = vld [vmem:[#allocation83_spill] sm:$0xff]  ;;  %v4690_v18 = vld [vmem:[%s2746_s28 + $0x28] sm:$0xff]  ;;  %v1500_v32 = vpop.permute.xlu0 %1499 }
 0x150   : > { %v2006_v33 = vadd.f32 %v2004_v42, %v6543_v19  ;;  %v6548_v5 = vsub.f32 %v6546_v50, %v6547_v14  ;;  %v1933_v58 = vsub.f32 %v1929_v21, %v6550_v44  ;;  %v4667_v63 = vstv %s4601_s24  ;;  %6557 = vst [vmem:[#allocation44_spill] sm:$0xff] %v4690_v18  ;;  %v6559_v19 = vld [vmem:[#allocation72_spill] sm:$0xff]  ;;  %v6562_v9 = vld [vmem:[#allocation103_spill] sm:$0xff]  ;;  %v6564_v14 = vld [vmem:[#allocation89_spill] sm:$0xff]  ;;  %s5829_s24 = sld [smem:[#allocation2 + $0x1c]] }
 0x151   : > { %6551 = vst [vmem:[#allocation52_spill] sm:$0xff] %v4667_v63  ;;  %v1939_v51 = vsub.f32 %v4573_v22, %v1937_v47  ;;  %v1951_v24 = vsub.f32 %v6552_v43, %v1949_v39  ;;  %v1957_v13 = vsub.f32 %v1953_v61, %v1955_v4  ;;  %v4673_v31 = vmul.f32 %v4531_v16, %v4528_v8  ;;  %v6561_v39 = vld [vmem:[#allocation98_spill] sm:$0xff] }
 0x152   : > { %v4663_v60 = vadd.f32 %v2025_v59, %v6548_v5  ;;  %v4677_v56 = vmul.f32 %v4549_v27, %v4549_v27  ;;  %v1229_v1 = vsub.f32 %v6554_v6, %v4568_v49  ;;  %v1228_v22 = vsel %vm231_vm12, %v6555_v46, %v4521_v23  ;;  %v1502_v49 = vpop.permute.xlu1 %1501  ;;  %v6567_v6 = vld [vmem:[#allocation104_spill] sm:$0xff] }
 0x153   : > { %6553 = vst [vmem:[#allocation85_spill] sm:$0xff] %v4673_v31  ;;  %v4687_v40 = vmul.f32 %v4549_v27, %v4528_v8  ;;  %v2001_v42 = vadd.f32 %v1951_v24, %v1933_v58  ;;  %v2012_v4 = vadd.f32 %v1957_v13, %v1939_v51  ;;  %v1520_v35 = vsub.f32 %v4690_v18, %v4511_v37  ;;  %v6566_v13 = vld [vmem:[#allocation90_spill] sm:$0xff] }
 0x154   : > { %6549 = vst [vmem:[#allocation11_spill] sm:$0xff] %v4663_v60  ;;  %v4696_v59 = vmul.f32 %v4656_v17, %v4656_v17  ;;  %v4700_v23 = vmul.f32 %v4656_v17, %v4559_v15  ;;  %v4704_v21 = vmul.f32 %v4667_v63, %v4543_v12  ;;  %v4708_v2 = vmul.f32 %v4464_v29, %v1229_v1  ;;  %v6591_v31 = vld [vmem:[#allocation74_spill] sm:$0xff] }
 0x155   : > { %6556 = vst [vmem:[#allocation94_spill] sm:$0xff] %v4687_v40  ;;  %v4712_v37 = vmul.f32 %v4553_v62, %v4553_v62  ;;  %v6560_v47 = vsub.f32 %v6558_v20, %v6559_v19  ;;  %v6563_v61 = vsub.f32 %v6561_v39, %v6562_v9  ;;  %v1230_v5 = vsub.f32 %v6564_v14, %v1228_v22  ;;  %v1118_v43 = vpop.permute.xlu2 %1117  ;;  %v6570_v22 = vld [vmem:[#allocation106_spill] sm:$0xff]  ;;  %v6579_v14 = vld [vmem:[#allocation15_spill] sm:$0xff] }
 0x156   : > { %v4722_v12 = vstv %s4634_s26  ;;  %v4725_v44 = vstv %s4582_s17  ;;  %v4729_v58 = vmul.f32 %v4539_v57, %v4556_v25  ;;  %v1285_v51 = vmul.f32 %v4708_v2, %v4708_v2  ;;  %s5734_s17 = sld [smem:[#allocation2 + $0x1b]] }
 0x157   : > { %v2003_v55 = vadd.f32 %v2001_v42, %v6560_v47  ;;  %v2014_v50 = vadd.f32 %v2012_v4, %v6563_v61  ;;  %6565 = vst [vmem:[#allocation63_spill] sm:$0xff] %v4725_v44  ;;  %v4735_v24 = vmul.f32 %v4539_v57, %v4598_v28  ;;  %v6568_v1 = vsub.f32 %v6566_v13, %v6567_v6  ;;  %v6571_v42 = vld [vmem:[#allocation105_spill] sm:$0xff]  ;;  %v4767_v61 = vld [vmem:[%s2746_s28 + $0x18] sm:$0xff]  ;;  %v4782_v6 = vld [vmem:[%s2746_s28] sm:$0xff] }
 0x158   : > { %v6572_v4 = vsub.f32 %v6570_v22, %v6571_v42  ;;  %v1522_v20 = vsel %vm236_vm4, 0.0, %v1520_v35  ;;  %v1563_v28 = vmul.f32 %v4704_v21, %v4704_v21  ;;  %v4753_v19 = vstv %s215_s30  ;;  %6578 = vst [vmem:[#allocation59_spill] sm:$0xff] %v4767_v61 }
 0x159   : > { %v4740_v46 = vadd.f32 %v2003_v55, %v6568_v1  ;;  %6574 = vst [vmem:[#allocation53_spill] sm:$0xff] %v4753_v19  ;;  %v1289_v47 = vadd.f32 %v1287_v54, %v1285_v51  ;;  %v6575_v55 = vld [vmem:[#allocation22_spill] sm:$0xff]  ;;  %v4761_v9 = vmul.f32 %v4704_v21, %v4722_v12  ;;  %v4764_v35 = vmul.f32 %v4464_v29, %v1230_v5  ;;  %v4786_v1 = vld [vmem:[%s2746_s28 + $0x8] sm:$0xff] }
 0x15a   : > { %v4745_v25 = vadd.f32 %v2014_v50, %v6572_v4  ;;  %v1236_v39 = vsel %vm231_vm12, %v6575_v55, %v4605_v30  ;;  %v1243_v54 = vsel %vm231_vm12, %v6579_v14, %v4607_v41  ;;  %v4775_v51 = vmul.f32 %v4667_v63, %v1522_v20  ;;  %v4778_v30 = vld [vmem:[%s2746_s28 + $0x20] sm:$0xff]  ;;  %6582 = vst [vmem:[#allocation58_spill] sm:$0xff] %v4782_v6 }
 0x15b   : > { %6569 = vst [vmem:[#allocation84_spill] sm:$0xff] %v4740_v46  ;;  %v1238_v50 = vsub.f32 %v4767_v61, %v1236_v39  ;;  %v1245_v13 = vsub.f32 %v4778_v30, %v1243_v54  ;;  %v1503_v5 = vsub.f32 %v4782_v6, %v1500_v32  ;;  %v1504_v22 = vsub.f32 %v4786_v1, %v1502_v49  ;;  %v4801_v32 = vld [vmem:[%s2746_s28 + $0x10] sm:$0xff]  ;;  %v6587_v54 = vld [vmem:[#allocation86_spill] sm:$0xff] }
 0x15c   : > { %6573 = vst [vmem:[#allocation55_spill] sm:$0xff] %v4745_v25  ;;  %v1150_v42 = vmul.f32 %v4729_v58, %v4729_v58  ;;  %v4792_v41 = vmul.f32 %v4753_v19, %v2006_v33  ;;  %v1153_v4 = vmul.f32 %v4735_v24, %v4735_v24  ;;  %v1788_v49 = vsub.f32 %v4801_v32, %v4579_v11  ;;  %v1510_v11 = vpop.permute.xlu0 %1509 }
 0x15d   : > { %6576 = vst [vmem:[#allocation43_spill] sm:$0xff] %v4761_v9  ;;  %v4797_v20 = vmul.f32 %v4464_v29, %v1238_v50  ;;  %v4806_v55 = vmul.f32 %v4464_v29, %v1245_v13  ;;  %v1505_v33 = vsel %vm236_vm4, 0.0, %v1503_v5  ;;  %v1286_v39 = vmul.f32 %v4764_v35, %v4764_v35  ;;  %v1516_v13 = vpop.permute.xlu1 %1515  ;;  %v1128_v44 = vpop.permute.xlu2 %1127 }
 0x15e   : > { %6577 = vst [vmem:[#allocation81_spill] sm:$0xff] %v4764_v35  ;;  %v4815_v14 = vmul.f32 %v4667_v63, %v1505_v33  ;;  %v4819_v25 = vmul.f32 %v4539_v57, %v6587_v54  ;;  %v1568_v46 = vmul.f32 %v4775_v51, %v4775_v51  ;;  %v4825_v5 = vmul.f32 %v4775_v51, %v4722_v12 }
 0x15f   : > { %6580 = vst [vmem:[#allocation62_spill] sm:$0xff] %v4775_v51  ;;  %v1288_v50 = vmul.f32 %v4797_v20, %v4797_v20  ;;  %v1506_v33 = vsel %vm236_vm4, 0.0, %v1504_v22  ;;  %v4832_v60 = vstv %s4749_s27  ;;  %v1797_v19 = vsub.f32 %v4690_v18, %v4641_v7 }
 0x160   : > { %6581 = vst [vmem:[#allocation51_spill] sm:$0xff] %v4778_v30  ;;  %v1561_v52 = vmul.f32 %v4815_v14, %v4815_v14  ;;  %v1790_v36 = vsel %vm237_vm8, 0.0, %v1788_v49  ;;  %v4854_v51 = vmul.f32 %v4667_v63, %v1506_v33  ;;  %v1207_v49 = vmul.f32 %v4819_v25, %v4559_v15 }
 0x161   : > { %6583 = vst [vmem:[#allocation47_spill] sm:$0xff] %v4786_v1  ;;  %v1290_v54 = vadd.f32 %v1288_v50, %v1286_v39  ;;  %v4850_v39 = vmul.f32 %v4539_v57, %v6591_v31  ;;  %v1519_v40 = vsub.f32 %v4778_v30, %v1516_v13 }
 0x162   : > { %6584 = vst [vmem:[#allocation46_spill] sm:$0xff] %v4792_v41  ;;  %v1291_v41 = vmul.f32 %v4806_v55, %v4806_v55  ;;  %v1565_v50 = vadd.f32 %v1563_v28, %v1561_v52  ;;  %v1799_v52 = vsel %vm237_vm8, 0.0, %v1797_v19  ;;  %v1152_v28 = vadd.f32 %v1150_v42, %v4712_v37 }
 0x163   : > { %6585 = vst [vmem:[#allocation50_spill] sm:$0xff] %v4797_v20  ;;  %v1294_v7 = vadd.f32 %v4677_v56, %v1290_v54  ;;  %v1521_v13 = vsel %vm236_vm4, 0.0, %v1519_v40  ;;  %v1562_v19 = vmul.f32 %v4854_v51, %v4854_v51  ;;  %v1154_v40 = vmul.f32 %v4850_v39, %v4850_v39 }
 0x164   : > { %6586 = vst [vmem:[#allocation75_spill] sm:$0xff] %v4801_v32  ;;  %v1293_v9 = vadd.f32 %v1291_v41, %v1289_v47  ;;  %v1149_v47 = vmul.f32 %v4819_v25, %v4819_v25  ;;  %v4886_v37 = vmul.f32 %v4667_v63, %v1521_v13  ;;  %v1777_v42 = vpop.permute.xlu0 %1776  ;;  %v4910_v13 = vmul.f32 %v4832_v60, %v1799_v52 }
 0x165   : > { %6588 = vst [vmem:[#allocation73_spill] sm:$0xff] %v4825_v5  ;;  %v4841_v5 = vld [vmem:[%s2746_s28 + $0x40] sm:$0xff]  ;;  %v4864_v31 = vadd.f32 1e-09, %v1294_v7  ;;  %v1779_v54 = vpop.permute.xlu1 %1778  ;;  %v1156_v18 = vadd.f32 %v1154_v40, %v1152_v28 }
 0x166   : > { %6589 = vst [vmem:[#allocation60_spill] sm:$0xff] %v4832_v60  ;;  %v4846_v22 = vsel %vm231_vm12, %v4841_v5, %v1118_v43  ;;  %v4858_v41 = vadd.f32 1e-09, %v1293_v9  ;;  %v1512_v43 = vsub.f32 %v4767_v61, %v1510_v11  ;;  %v1151_v56 = vadd.f32 %v1149_v47, %v4696_v59 }
 0x167   : > { %6590 = vst [vmem:[#allocation76_spill] sm:$0xff] %v4841_v5  ;;  %v4874_v9 = vadd.f32 %v1207_v49, %v4622_v0  ;;  %v4889_v0 = vld [vmem:[%s2746_s28 + $0x58] sm:$0xff]  ;;  %v1780_v47 = vsub.f32 %v4782_v6, %v1777_v42  ;;  %v1256_v49 = vpop.permute.xlu2 %1255  ;;  %v1781_v28 = vsub.f32 %v4786_v1, %v1779_v54  ;;  %vm1313_vm0 = vweird.f32 %v4864_v31 }
 0x168   : > { %6592 = vst [vmem:[#allocation77_spill] sm:$0xff] %v4854_v51  ;;  %2433 = vrsqrt.f32 %v4858_v41  ;;  %v1514_v11 = vsel %vm236_vm4, 0.0, %v1512_v43  ;;  %v1155_v33 = vadd.f32 %v1153_v4, %v1151_v56  ;;  %v1130_v7 = vsel %vm231_vm12, %v4889_v0, %v1128_v44 }
 0x169   : > { %6593 = vst [vmem:[#allocation78_spill] sm:$0xff] %v4874_v9  ;;  %v4883_v59 = vmul.f32 %v4667_v63, %v1514_v11  ;;  %v1216_v4 = vmul.f32 %v4850_v39, %v4559_v15  ;;  %2435 = vrsqrt.f32 %v4864_v31  ;;  %v1567_v11 = vmul.f32 %v4886_v37, %v4886_v37 }
 0x16a   : > { %6595 = vst [vmem:[#allocation79_spill] sm:$0xff] %v4886_v37  ;;  %v4900_v43 = vadd.f32 1e-09, %v1155_v33  ;;  %v4907_v44 = vmul.f32 %v4832_v60, %v1790_v36  ;;  %v1123_v33 = vsub.f32 %v4841_v5, %v4846_v22  ;;  %v1132_v48 = vsub.f32 %v4889_v0, %v1130_v7  ;;  %v6604_v7 = vld [vmem:[#allocation26_spill] sm:$0xff] }
 0x16b   : > { %6594 = vst [vmem:[#allocation82_spill] sm:$0xff] %v4883_v59  ;;  %v1564_v56 = vmul.f32 %v4883_v59, %v4883_v59  ;;  %v4913_v42 = vadd.f32 %v1216_v4, %v4614_v45  ;;  %v1569_v6 = vadd.f32 %v1567_v11, %v1565_v50  ;;  %v4919_v36 = vadd.f32 1e-09, %v1156_v18 }
 0x16c   : > { %6596 = vst [vmem:[#allocation16_spill] sm:$0xff] %v4907_v44  ;;  %2437 = vrsqrt.f32 %v4900_v43  ;;  %v1782_v52 = vsel %vm237_vm8, 0.0, %v1780_v47  ;;  %v4932_v50 = vmul.f32 %v4708_v2, %v4528_v8  ;;  %v4936_v18 = vmul.f32 %v4764_v35, %v4528_v8 }
 0x16d   : > { %6597 = vst [vmem:[#allocation65_spill] sm:$0xff] %v4910_v13  ;;  %v1566_v32 = vadd.f32 %v1564_v56, %v1562_v19  ;;  %v4925_v4 = vadd.f32 1e-09, %v1569_v6  ;;  %v4928_v22 = vmul.f32 %v4832_v60, %v1782_v52  ;;  %v4939_v19 = vstv %s4870_s3  ;;  %v1787_v56 = vpop.permute.xlu0 %1786  ;;  %v1793_v11 = vpop.permute.xlu1 %1792 }
 0x16e   : > { %6598 = vst [vmem:[#allocation64_spill] sm:$0xff] %v4913_v42  ;;  %v2434_v9 = vpop.eup %2433  ;;  %2439 = vrsqrt.f32 %v4919_v36  ;;  %v4948_v6 = vmul.f32 %v4797_v20, %v4528_v8  ;;  %v1259_v47 = vsel %vm231_vm12, %v6604_v7, %v1256_v49  ;;  %v4955_v52 = vmul.f32 %v4910_v13, %v4910_v13 }
 0x16f   : > { %v1298_v45 = vmul.f32 %v2434_v9, %v4858_v41  ;;  %v1570_v40 = vadd.f32 %v1568_v46, %v1566_v32  ;;  %6599 = vst [vmem:[#allocation38_spill] sm:$0xff] %v4928_v22  ;;  %v4942_v54 = vpop.eup %2435  ;;  %v1840_v46 = vmul.f32 %v4907_v44, %v4907_v44  ;;  %2441 = vrsqrt.f32 %v4925_v4  ;;  %v1266_v13 = vpop.permute.xlu2 %1265 }
 0x170   : > { %6600 = vst [vmem:[#allocation34_spill] sm:$0xff] %v4932_v50  ;;  %v1838_v49 = vmul.f32 %v4928_v22, %v4928_v22  ;;  %v1783_v7 = vsel %vm237_vm8, 0.0, %v1781_v28  ;;  %vm1165_vm5 = vweird.f32 %v4900_v43  ;;  %vm1304_vm6 = vweird.f32 %v2434_v9 }
 0x171   : > { %6601 = vst [vmem:[#allocation54_spill] sm:$0xff] %v4936_v18  ;;  %v1299_v32 = vmul.f32 %v2434_v9, %v1298_v45  ;;  %v4960_v50 = vadd.f32 1e-09, %v1570_v40  ;;  %v4964_v45 = vmul.f32 %v4539_v57, %v1132_v48  ;;  %v1261_v18 = vsub.f32 %v4841_v5, %v1259_v47 }
 0x172   : > { %6602 = vst [vmem:[#allocation39_spill] sm:$0xff] %v4939_v19  ;;  %v4958_v19 = vmul.f32 %v4539_v57, %v1123_v33  ;;  %v2438_v44 = vpop.eup %2437  ;;  %v1308_v33 = vmul.f32 %v4942_v54, %v4864_v31  ;;  %v1789_v48 = vsub.f32 %v4767_v61, %v1787_v56  ;;  %v1796_v22 = vsub.f32 %v4778_v30, %v1793_v11 }
 0x173   : > { %6603 = vst [vmem:[#allocation40_spill] sm:$0xff] %v4948_v6  ;;  %v1300_v6 = vmul.f32 0.5, %v1299_v32  ;;  %v1160_v40 = vmul.f32 %v2438_v44, %v4900_v43  ;;  %2443 = vrsqrt.f32 %v4960_v50  ;;  %v4979_v28 = vmul.f32 %v4832_v60, %v1783_v7 }
 0x174   : > { %v2440_v1 = vpop.eup %2439  ;;  %vm1303_vm7 = vweird.f32 %v4858_v41  ;;  %v1842_v35 = vadd.f32 %v1840_v46, %v1838_v49  ;;  %v1281_v11 = vmul.f32 %v4464_v29, %v1261_v18  ;;  %v1798_v41 = vsel %vm237_vm8, 0.0, %v1796_v22 }
 0x175   : > { %v1301_v20 = vsub.f32 1.5, %v1300_v6  ;;  %v1161_v42 = vmul.f32 %v2438_v44, %v1160_v40  ;;  %6605 = vst [vmem:[#allocation57_spill] sm:$0xff] %v4979_v28  ;;  %v1170_v32 = vmul.f32 %v2440_v1, %v4919_v36  ;;  %v1791_v6 = vsel %vm237_vm8, 0.0, %v1789_v48  ;;  %v4985_v47 = vpop.eup %2441  ;;  %vm1305_vm9 = vmor %vm1303_vm7, %vm1304_vm6  ;;  %v1110_v49 = vpop.permute.xlu0 %1109 }
 0x176   : > { %v4990_v40 = vmul.f32 %v4832_v60, %v1791_v6  ;;  %v1309_v46 = vmul.f32 %v4942_v54, %v1308_v33  ;;  %vm1166_vm10 = vweird.f32 %v2438_v44  ;;  %v1839_v18 = vmul.f32 %v4979_v28, %v4979_v28  ;;  %v1112_v6 = vpop.permute.xlu1 %1111 }
 0x177   : > { %v1302_v3 = vmul.f32 %v2434_v9, %v1301_v20  ;;  %v1162_v56 = vmul.f32 0.5, %v1161_v42  ;;  %v1171_v7 = vmul.f32 %v2440_v1, %v1170_v32  ;;  %v4997_v20 = vmul.f32 %v4832_v60, %v1798_v41  ;;  %vm1167_vm14 = vmor %vm1165_vm5, %vm1166_vm10  ;;  %v1532_v60 = vpop.permute.xlu2 %1531 }
 0x178   : > { %6606 = vst [vmem:[#allocation56_spill] sm:$0xff] %v4990_v40  ;;  %v1841_v22 = vmul.f32 %v4990_v40, %v4990_v40  ;;  %vm1175_vm11 = vweird.f32 %v4919_v36  ;;  %vm1176_vm13 = vweird.f32 %v2440_v1  ;;  %v1310_v40 = vmul.f32 0.5, %v1309_v46 }
 0x179   : > { %v4994_v30 = vsel %vm1305_vm9, %v2434_v9, %v1302_v3  ;;  %6607 = vst [vmem:[#allocation33_spill] sm:$0xff] %v4997_v20  ;;  %v1163_v42 = vsub.f32 1.5, %v1162_v56  ;;  %v1574_v3 = vmul.f32 %v4985_v47, %v4925_v4  ;;  %v1172_v9 = vmul.f32 0.5, %v1171_v7  ;;  %v5012_v32 = vpop.eup %2443  ;;  %vm1177_vm15 = vmor %vm1175_vm11, %vm1176_vm13 }
 0x17a   : > { %v5004_v48 = vmul.f32 %v4994_v30, %v4531_v16  ;;  %v1844_v33 = vmul.f32 %v4997_v20, %v4997_v20  ;;  %v1843_v7 = vadd.f32 %v1841_v22, %v1839_v18  ;;  %v6609_v20 = vld [vmem:[#allocation29_spill] sm:$0xff]  ;;  %v1311_v36 = vsub.f32 1.5, %v1310_v40 }
 0x17b   : > { %v1164_v56 = vmul.f32 %v2438_v44, %v1163_v42  ;;  %v1173_v41 = vsub.f32 1.5, %v1172_v9  ;;  %v5023_v53 = vsel %vm231_vm12, %v6609_v20, %v1266_v13  ;;  %v5026_v42 = vld [vmem:[%s2746_s28 + $0x30] sm:$0xff]  ;;  %vm1314_vm1 = vweird.f32 %v4942_v54 }
 0x17c   : > { %6608 = vst [vmem:[#allocation21_spill] sm:$0xff] %v5004_v48  ;;  %v5016_v16 = vmul.f32 %v5004_v48, %v1281_v11  ;;  %v1846_v28 = vadd.f32 %v1844_v33, %v1842_v35  ;;  %v1113_v11 = vsel %vm231_vm12, %v5026_v42, %v1110_v49  ;;  %v5032_v48 = vld [vmem:[%s2746_s28 + $0x38] sm:$0xff]  ;;  %v1847_v13 = vadd.f32 %v4955_v52, %v1843_v7  ;;  %vm1315_vm9 = vmor %vm1313_vm0, %vm1314_vm1 }
 0x17d   : > { %v1168_v61 = vsel %vm1167_vm14, %v2438_v44, %v1164_v56  ;;  %v1114_v35 = vsel %vm231_vm12, %v5032_v48, %v1112_v6  ;;  %v1575_v44 = vmul.f32 %v4985_v47, %v1574_v3  ;;  %v1174_v46 = vmul.f32 %v2440_v1, %v1173_v41  ;;  %v1120_v9 = vpop.permute.xlu0 %1119 }
 0x17e   : > { %v5038_v43 = vmul.f32 %v1168_v61, %v4819_v25  ;;  %v5045_v20 = vadd.f32 1e-09, %v1846_v28  ;;  %v1115_v49 = vsub.f32 %v5026_v42, %v1113_v11  ;;  %v5050_v18 = vmul.f32 %v1168_v61, %v4656_v17  ;;  %v1126_v41 = vpop.permute.xlu1 %1125 }
 0x17f   : > { %v1116_v25 = vsub.f32 %v5032_v48, %v1114_v35  ;;  %v1178_v3 = vsel %vm1177_vm15, %v2440_v1, %v1174_v46  ;;  %v1270_v52 = vsub.f32 %v4889_v0, %v5023_v53  ;;  %v5060_v22 = vadd.f32 1e-09, %v1847_v13 }
 0x180   : > { %v1187_v6 = vmul.f32 %v5038_v43, %v4958_v19  ;;  %v5058_v28 = vmul.f32 %v1178_v3, %v4850_v39  ;;  %v1141_v33 = vmul.f32 %v4539_v57, %v1115_v49  ;;  %v1584_v56 = vmul.f32 %v5012_v32, %v4960_v50 }
 0x181   : > { %v1142_v17 = vmul.f32 %v4539_v57, %v1116_v25  ;;  %v5067_v1 = vmul.f32 %v1178_v3, %v4553_v62  ;;  %v1535_v53 = vsub.f32 %v4841_v5, %v1532_v60  ;;  %v1576_v19 = vmul.f32 0.5, %v1575_v44  ;;  %v1542_v25 = vpop.permute.xlu2 %1541 }
 0x182   : > { %v1192_v39 = vmul.f32 %v5058_v28, %v4964_v45  ;;  %2445 = vrsqrt.f32 %v5045_v20  ;;  %v1185_v40 = vmul.f32 %v5050_v18, %v1141_v33  ;;  %v1312_v7 = vmul.f32 %v4942_v54, %v1311_v36  ;;  %v5082_v45 = vld [vmem:[%s2746_s28 + $0x48] sm:$0xff]  ;;  %v5097_v33 = vld [vmem:[%s2746_s28 + $0x50] sm:$0xff] }
 0x183   : > { %v1186_v11 = vmul.f32 %v5067_v1, %v1142_v17  ;;  %v1537_v62 = vsel %vm236_vm4, 0.0, %v1535_v53  ;;  %v1577_v60 = vsub.f32 1.5, %v1576_v19  ;;  %2447 = vrsqrt.f32 %v5060_v22  ;;  %6610 = vst [vmem:[#allocation41_spill] sm:$0xff] %v5082_v45 }
 0x184   : > { %v1189_v35 = vadd.f32 %v1187_v6, %v1185_v40  ;;  %vm1580_vm5 = vweird.f32 %v4985_v47  ;;  %v1122_v44 = vsel %vm231_vm12, %v5082_v45, %v1120_v9  ;;  %vm1579_vm6 = vweird.f32 %v4925_v4 }
 0x185   : > { %v1578_v46 = vmul.f32 %v4985_v47, %v1577_v60  ;;  %v1124_v13 = vsub.f32 %v5082_v45, %v1122_v44  ;;  %v5091_v49 = vmul.f32 %v1178_v3, %v4729_v58  ;;  %v1557_v6 = vmul.f32 %v4667_v63, %v1537_v62  ;;  %vm1581_vm7 = vmor %vm1579_vm6, %vm1580_vm5  ;;  %v1248_v62 = vpop.permute.xlu0 %1247 }
 0x186   : > { %v1208_v36 = vmul.f32 %v4729_v58, %v4559_v15  ;;  %v1129_v9 = vsel %vm231_vm12, %v5097_v33, %v1126_v41  ;;  %v1183_v4 = vmul.f32 %v1168_v61, %v4735_v24  ;;  %v5114_v53 = vadd.f32 %v4700_v23, %v4619_v34 }
 0x187   : > { %v5108_v3 = vsel %vm1581_vm7, %v4985_v47, %v1578_v46  ;;  %v1144_v17 = vmul.f32 %v4539_v57, %v1124_v13  ;;  %v1131_v58 = vsub.f32 %v5097_v33, %v1129_v9  ;;  %v5120_v61 = vmul.f32 %v4806_v55, %v4528_v8 }
 0x188   : > { %v5116_v19 = vpop.eup %2445  ;;  %v5123_v31 = vsel %vm1315_vm9, %v4942_v54, %v1312_v7  ;;  %v5127_v47 = vmul.f32 %v5108_v3, %v4704_v21  ;;  %v1210_v40 = vadd.f32 %v1208_v36, %v4611_v10  ;;  %v5132_v41 = vmul.f32 %v4815_v14, %v4722_v12 }
 0x189   : > { %v1188_v34 = vmul.f32 %v5091_v49, %v1144_v17  ;;  %v1145_v23 = vmul.f32 %v4539_v57, %v1131_v58  ;;  %v1215_v8 = vmul.f32 %v4735_v24, %v4559_v15  ;;  %v5138_v54 = vpop.eup %2447  ;;  %v1284_v7 = vmul.f32 %v4464_v29, %v1270_v52  ;;  %v6614_v52 = vld [vmem:[#allocation28_spill] sm:$0xff] }
 0x18a   : > { %6611 = vst [vmem:[#allocation61_spill] sm:$0xff] %v5127_v47  ;;  %v5142_v21 = vmul.f32 %v5127_v47, %v1557_v6  ;;  %v1544_v10 = vsub.f32 %v4889_v0, %v1542_v25  ;;  %v1585_v60 = vmul.f32 %v5012_v32, %v1584_v56  ;;  %v5148_v44 = vmul.f32 %v5123_v31, %v4549_v27  ;;  %v1250_v56 = vpop.permute.xlu1 %1249 }
 0x18b   : > { %6612 = vst [vmem:[#allocation87_spill] sm:$0xff] %v5132_v41  ;;  %v1190_v57 = vadd.f32 %v1188_v34, %v1186_v11  ;;  %v1191_v46 = vmul.f32 %v1183_v4, %v1145_v23  ;;  %v1217_v15 = vadd.f32 %v1215_v8, %v4625_v26  ;;  %v1851_v24 = vmul.f32 %v5116_v19, %v5045_v20  ;;  %v6618_v34 = vld [vmem:[#allocation66_spill] sm:$0xff]  ;;  %v6619_v8 = vld [vmem:[#allocation27_spill] sm:$0xff] }
 0x18c   : > { %6613 = vst [vmem:[#allocation99_spill] sm:$0xff] %v5142_v21  ;;  %v1586_v13 = vmul.f32 0.5, %v1585_v60  ;;  %v1251_v6 = vsel %vm231_vm12, %v6614_v52, %v1248_v62  ;;  %v5158_v25 = vmul.f32 %v4994_v30, %v4708_v2  ;;  %v5162_v27 = vmul.f32 %v4854_v51, %v4722_v12  ;;  %v1809_v60 = vpop.permute.xlu2 %1808  ;;  %v6629_v51 = vld [vmem:[#allocation59_spill] sm:$0xff]  ;;  %v6634_v21 = vld [vmem:[#allocation54_spill] sm:$0xff] }
 0x18d   : > { %v1194_v11 = vadd.f32 %v1192_v39, %v1190_v57  ;;  %v1193_v36 = vadd.f32 %v1191_v46, %v1189_v35  ;;  %v1253_v26 = vsub.f32 %v5026_v42, %v1251_v6  ;;  %v5167_v9 = vmul.f32 %v4883_v59, %v4722_v12  ;;  %v6620_v57 = vld [vmem:[#allocation14_spill] sm:$0xff]  ;;  %v6621_v46 = vld [vmem:[#allocation69_spill] sm:$0xff] }
 0x18e   : > { %6615 = vst [vmem:[#allocation96_spill] sm:$0xff] %v5162_v27  ;;  %v5171_v17 = vmul.f32 %v4886_v37, %v4722_v12  ;;  %v5174_v2 = vmul.f32 %v5148_v44, %v1284_v7  ;;  %v1546_v58 = vsel %vm236_vm4, 0.0, %v1544_v10  ;;  %v1252_v62 = vsel %vm231_vm12, %v6619_v8, %v1250_v56  ;;  %v6628_v37 = vld [vmem:[#allocation75_spill] sm:$0xff] }
 0x18f   : > { %6616 = vst [vmem:[#allocation93_spill] sm:$0xff] %v5167_v9  ;;  %v1196_v23 = vmul.f32 %v1194_v11, %v6618_v34  ;;  %v1195_v39 = vmul.f32 %v1193_v36, %v6618_v34  ;;  %v1279_v35 = vmul.f32 %v4464_v29, %v1253_v26  ;;  %vm232_vm10 = vcmp.lt.s32.totalorder %v6620_v57, 2  ;;  %v6622_v26 = vld [vmem:[#allocation81_spill] sm:$0xff] }
 0x190   : > { %6617 = vst [vmem:[#allocation45_spill] sm:$0xff] %v5171_v17  ;;  %v5187_v12 = vmul.f32 %v5138_v54, %v5060_v22  ;;  %v1852_v7 = vmul.f32 %v5116_v19, %v1851_v24  ;;  %v1587_v10 = vsub.f32 1.5, %v1586_v13  ;;  %vm1589_vm11 = vweird.f32 %v4960_v50 }
 0x191   : > { %v1198_v52 = vadd.f32 %v1196_v23, %v6621_v46  ;;  %v1197_v6 = vadd.f32 %v1195_v39, %v6621_v46  ;;  %vm1590_vm13 = vweird.f32 %v5012_v32  ;;  %v1323_v56 = vmul.f32 %v5158_v25, %v1279_v35 }
 0x192   : > { %v5196_v11 = vmul.f32 %v4667_v63, %v1546_v58  ;;  %v1254_v36 = vsub.f32 %v5032_v48, %v1252_v62  ;;  %v5201_v8 = vmul.f32 %v5123_v31, %v6622_v26  ;;  %v1812_v24 = vsub.f32 %v4841_v5, %v1809_v60  ;;  %v6623_v26 = vld [vmem:[#allocation70_spill] sm:$0xff]  ;;  %vm1591_vm14 = vmor %vm1589_vm11, %vm1590_vm13 }
 0x193   : > { %v1204_v13 = vmul.f32 %v1198_v52, %v5067_v1  ;;  %v1212_v23 = vmul.f32 %v1198_v52, %v5091_v49  ;;  %v1220_v39 = vmul.f32 %v1198_v52, %v5058_v28  ;;  %v1203_v17 = vmul.f32 %v1197_v6, %v5050_v18  ;;  %v6624_v1 = vld [vmem:[#allocation64_spill] sm:$0xff]  ;;  %v1258_v28 = vpop.permute.xlu0 %1257  ;;  %v6625_v52 = vld [vmem:[#allocation78_spill] sm:$0xff] }
 0x194   : > { %v1211_v35 = vmul.f32 %v1197_v6, %v5038_v43  ;;  %v1219_v58 = vmul.f32 %v1197_v6, %v1183_v4  ;;  %v1588_v41 = vmul.f32 %v5012_v32, %v1587_v10  ;;  %v5211_v62 = vadd.f32 %v5016_v16, %v1323_v56  ;;  %v6626_v10 = vld [vmem:[#allocation58_spill] sm:$0xff]  ;;  %v6627_v16 = vld [vmem:[#allocation47_spill] sm:$0xff] }
 0x195   : > { %v1206_v60 = vadd.f32 %v1204_v13, %v6623_v26  ;;  %v1214_v9 = vadd.f32 %v1212_v23, %v1210_v40  ;;  %v1222_v27 = vadd.f32 %v1220_v39, %v6624_v1  ;;  %v1205_v49 = vadd.f32 %v1203_v17, %v5114_v53  ;;  %v6630_v40 = vld [vmem:[#allocation51_spill] sm:$0xff]  ;;  %v6631_v17 = vld [vmem:[#allocation44_spill] sm:$0xff] }
 0x196   : > { %v1213_v18 = vadd.f32 %v1211_v35, %v6625_v52  ;;  %v1221_v47 = vadd.f32 %v1219_v58, %v1217_v15  ;;  %v1280_v43 = vmul.f32 %v4464_v29, %v1254_v36  ;;  %v1853_v4 = vmul.f32 0.5, %v1852_v7  ;;  %v6632_v36 = vld [vmem:[#allocation31_spill] sm:$0xff] }
 0x197   : > { %v1361_v6 = vrot.slane %v6626_v10, 6  ;;  %v1362_v56 = vrot.slane %v6627_v16, 6  ;;  %v1369_v59 = vrot.slane %v6628_v37, 6  ;;  %v1370_v13 = vrot.slane %v6629_v51, 6 }
 0x198   : > { %v5232_v53 = vsel %vm237_vm8, 0.0, %v1812_v24  ;;  %v1377_v15 = vrot.slane %v6630_v40, 6  ;;  %v1378_v7 = vrot.slane %v6631_v17, 6  ;;  %v1260_v23 = vsel %vm231_vm12, %v6632_v36, %v1258_v28 }
 0x199   : > { %v5240_v39 = vsel %vm1591_vm14, %v5012_v32, %v1588_v41  ;;  %v1363_v50 = vsel %vm232_vm10, %v1361_v6, %v1362_v56  ;;  %v1371_v35 = vsel %vm232_vm10, %v1369_v59, %v1370_v13  ;;  %v1262_v24 = vsub.f32 %v5082_v45, %v1260_v23  ;;  %v6633_v41 = vld [vmem:[#allocation50_spill] sm:$0xff] }
 0x19a   : > { %v1854_v58 = vsub.f32 1.5, %v1853_v4  ;;  %v1366_v26 = vsub.f32 %v6627_v16, %v1363_v50  ;;  %v1374_v1 = vsub.f32 %v6629_v51, %v1371_v35  ;;  %v1379_v28 = vsel %vm232_vm10, %v1377_v15, %v1378_v7  ;;  %v6635_v4 = vld [vmem:[#allocation40_spill] sm:$0xff]  ;;  %v6636_v16 = vld [vmem:[#allocation94_spill] sm:$0xff]  ;;  %v1264_v51 = vpop.permute.xlu1 %1263 }
 0x19b   : > { %v1382_v52 = vsub.f32 %v6631_v17, %v1379_v28  ;;  %v1282_v32 = vmul.f32 %v4464_v29, %v1262_v24  ;;  %v1320_v36 = vmul.f32 %v5123_v31, %v6633_v41  ;;  %v1340_v5 = vadd.f32 %v6634_v21, %v1206_v60  ;;  %v6640_v21 = vld [vmem:[#allocation62_spill] sm:$0xff] }
 0x19c   : > { %v1324_v23 = vmul.f32 %v5201_v8, %v1280_v43  ;;  %v1348_v45 = vadd.f32 %v6635_v4, %v1214_v9  ;;  %v1356_v50 = vadd.f32 %v6636_v16, %v1222_v27  ;;  %v5260_v35 = vstv %s5213_s7  ;;  %v6642_v16 = vld [vmem:[#allocation34_spill] sm:$0xff]  ;;  %s2170_s7 = scalar_lea.sflag [#allocation4], %s2740_s4 }
 0x19d   : > { %v1326_v63 = vmul.f32 %v1320_v36, %v1282_v32  ;;  %v5263_v28 = vmul.f32 %v5260_v35, %v1366_v26  ;;  %v5266_v24 = vmul.f32 %v5260_v35, %v1374_v1  ;;  %v5269_v31 = vmul.f32 %v5260_v35, %v1382_v52  ;;  %v6641_v52 = vld [vmem:[#allocation30_spill] sm:$0xff] }
 0x19e   : > { %v5273_v60 = vmul.f32 %v5240_v39, %v6640_v21  ;;  %v1364_v27 = vsel %vm232_vm10, %v1362_v56, %v1361_v6  ;;  %v1372_v9 = vsel %vm232_vm10, %v1370_v13, %v1369_v59  ;;  %v1380_v43 = vsel %vm232_vm10, %v1378_v7, %v1377_v15 }
 0x19f   : > { %6637 = vst [vmem:[#allocation67_spill] sm:$0xff] %v5263_v28  ;;  %v5282_v26 = vmul.f32 %v5116_v19, %v1854_v58  ;;  %v1328_v1 = vadd.f32 %v1326_v63, %v1324_v23  ;;  %v1410_v32 = vstv %s5224_s20  ;;  %v1267_v41 = vsel %vm231_vm12, %v6641_v52, %v1264_v51 }
 0x1a0   : > { %6638 = vst [vmem:[#allocation17_spill] sm:$0xff] %v5266_v24  ;;  %v1424_v4 = vmul.f32 %v5263_v28, %v5263_v28  ;;  %v1426_v6 = vmul.f32 %v5266_v24, %v5266_v24  ;;  %v5294_v59 = vmul.f32 %v5269_v31, %v5269_v31  ;;  %v1365_v56 = vsub.f32 %v6626_v10, %v1364_v27 }
 0x1a1   : > { %6639 = vst [vmem:[#allocation92_spill] sm:$0xff] %v5269_v31  ;;  %v1332_v13 = vadd.f32 %v5174_v2, %v1328_v1  ;;  %v1476_v63 = vmul.f32 %v5263_v28, %v1410_v32  ;;  %v1373_v15 = vsub.f32 %v6628_v37, %v1372_v9  ;;  %v1381_v51 = vsub.f32 %v6630_v40, %v1380_v43  ;;  %v1819_v1 = vpop.permute.xlu2 %1818  ;;  %v1524_v28 = vpop.permute.xlu0 %1523 }
 0x1a2   : > { %v1367_v7 = vsel %vm232_vm10, 0.0, %v1365_v56  ;;  %v1269_v58 = vsub.f32 %v5097_v33, %v1267_v41  ;;  %v1321_v23 = vmul.f32 %v4994_v30, %v4806_v55  ;;  %v1339_v21 = vadd.f32 %v6642_v16, %v1205_v49  ;;  %v6643_v41 = vld [vmem:[#allocation85_spill] sm:$0xff] }
 0x1a3   : > { %vm1857_vm12 = vweird.f32 %v5116_v19  ;;  %v1334_v2 = vmul.f32 %v1332_v13, %v6618_v34  ;;  %v1484_v27 = vmul.f32 %v5266_v24, %v1410_v32  ;;  %v1375_v9 = vsel %vm232_vm10, 0.0, %v1373_v15 }
 0x1a4   : > { %v1383_v43 = vsel %vm232_vm10, 0.0, %v1381_v51  ;;  %v1283_v52 = vmul.f32 %v4464_v29, %v1269_v58  ;;  %v1347_v56 = vadd.f32 %v6643_v41, %v1213_v18  ;;  %v1355_v30 = vadd.f32 %v5120_v61, %v1221_v47 }
 0x1a5   : > { %v5318_v55 = vmul.f32 %v5260_v35, %v1367_v7  ;;  %vm1856_vm15 = vweird.f32 %v5045_v20  ;;  %v1336_v49 = vadd.f32 %v1334_v2, %v6621_v46  ;;  %v1492_v13 = vmul.f32 %v5269_v31, %v1410_v32 }
 0x1a6   : > { %v5324_v15 = vmul.f32 %v5260_v35, %v1375_v9  ;;  %v5327_v51 = vmul.f32 %v5260_v35, %v1383_v43  ;;  %v1329_v29 = vmul.f32 %v1321_v23, %v1283_v52  ;;  %v1821_v61 = vsub.f32 %v4889_v0, %v1819_v1  ;;  %vm1858_vm5 = vmor %vm1856_vm15, %vm1857_vm12 }
 0x1a7   : > { %v1423_v18 = vmul.f32 %v5318_v55, %v5318_v55  ;;  %v1862_v47 = vmul.f32 %v5138_v54, %v5187_v12  ;;  %v1342_v7 = vmul.f32 %v1336_v49, %v5201_v8  ;;  %v1350_v58 = vmul.f32 %v1336_v49, %v1320_v36 }
 0x1a8   : > { %v1358_v16 = vmul.f32 %v1336_v49, %v5148_v44  ;;  %v1425_v2 = vmul.f32 %v5324_v15, %v5324_v15  ;;  %v1428_v9 = vadd.f32 %v1426_v6, %v1424_v4  ;;  %v1331_v43 = vadd.f32 %v1329_v29, %v5211_v62  ;;  %v1526_v4 = vpop.permute.xlu1 %1525 }
 0x1a9   : > { %v1429_v52 = vmul.f32 %v5327_v51, %v5327_v51  ;;  %v1475_v41 = vmul.f32 %v5318_v55, %v1410_v32  ;;  %v1344_v1 = vadd.f32 %v1342_v7, %v1340_v5  ;;  %v1352_v31 = vadd.f32 %v1350_v58, %v1348_v45 }
 0x1aa   : > { %v1360_v24 = vadd.f32 %v1358_v16, %v1356_v50  ;;  %v1427_v12 = vadd.f32 %v1425_v2, %v1423_v18  ;;  %v1333_v8 = vmul.f32 %v1331_v43, %v6618_v34  ;;  %v1483_v36 = vmul.f32 %v5324_v15, %v1410_v32  ;;  %v6647_v43 = vld [vmem:[#allocation52_spill] sm:$0xff] }
 0x1ab   : > { %v1491_v44 = vmul.f32 %v5327_v51, %v1410_v32  ;;  %v1863_v49 = vmul.f32 0.5, %v1862_v47  ;;  %v5345_v6 = vadd.f32 %v1476_v63, %v1344_v1  ;;  %v5347_v62 = vadd.f32 %v1484_v27, %v1352_v31  ;;  %v6644_v27 = vld [vmem:[#allocation21_spill] sm:$0xff] }
 0x1ac   : > { %v5349_v29 = vadd.f32 %v1492_v13, %v1360_v24  ;;  %v1823_v5 = vsel %vm237_vm8, 0.0, %v1821_v61  ;;  %v1335_v45 = vadd.f32 %v1333_v8, %v6621_v46  ;;  %vm1866_vm0 = vweird.f32 %v5060_v22  ;;  %v6654_v8 = vld [vmem:[#allocation41_spill] sm:$0xff] }
 0x1ad   : > { %v1864_v50 = vsub.f32 1.5, %v1863_v49  ;;  %vm1867_vm1 = vweird.f32 %v5138_v54  ;;  %v1431_v32 = vadd.f32 %v1429_v52, %v1427_v12  ;;  %v1527_v18 = vsub.f32 %v5026_v42, %v1524_v28 }
 0x1ae   : > { %v5359_v63 = vmul.f32 %v5108_v3, %v4815_v14  ;;  %v1528_v24 = vsub.f32 %v5032_v48, %v1526_v4  ;;  %v1341_v31 = vmul.f32 %v1335_v45, %v5158_v25  ;;  %v1349_v22 = vmul.f32 %v1335_v45, %v6644_v27  ;;  %v6645_v14 = vld [vmem:[#allocation60_spill] sm:$0xff]  ;;  %vm1868_vm6 = vmor %vm1866_vm0, %vm1867_vm1  ;;  %v6655_v4 = vld [vmem:[#allocation99_spill] sm:$0xff] }
 0x1af   : > { %v1357_v13 = vmul.f32 %v1335_v45, %v1321_v23  ;;  %v1865_v61 = vmul.f32 %v5138_v54, %v1864_v50  ;;  %v5371_v28 = vmul.f32 %v5273_v60, %v5196_v11  ;;  %v5375_v47 = vmul.f32 %v6645_v14, %v5232_v53 }
 0x1b0   : > { %v5379_v7 = vsel %vm1858_vm5, %v5116_v19, %v5282_v26  ;;  %v1529_v20 = vsel %vm236_vm4, 0.0, %v1527_v18  ;;  %v1343_v25 = vadd.f32 %v1341_v31, %v1339_v21  ;;  %v1351_v23 = vadd.f32 %v1349_v22, %v1347_v56 }
 0x1b1   : > { %6646 = vst [vmem:[#allocation107_spill] sm:$0xff] %v5375_v47  ;;  %v1359_v58 = vadd.f32 %v1357_v13, %v1355_v30  ;;  %v5384_v16 = vsel %vm1868_vm6, %v5138_v54, %v1865_v61  ;;  %v1432_v11 = vadd.f32 %v5294_v59, %v1428_v9  ;;  %v5387_v2 = vadd.f32 1e-09, %v1431_v32  ;;  %v6651_v54 = vld [vmem:[#allocation65_spill] sm:$0xff]  ;;  %v6656_v32 = vld [vmem:[#allocation59_spill] sm:$0xff] }
 0x1b2   : > { %v1837_v53 = vmul.f32 %v6645_v14, %v1823_v5  ;;  %v1555_v52 = vmul.f32 %v6647_v43, %v1529_v20  ;;  %v5391_v19 = vadd.f32 %v1475_v41, %v1343_v25  ;;  %v5393_v26 = vadd.f32 %v1483_v36, %v1351_v23  ;;  %v6653_v41 = vld [vmem:[#allocation76_spill] sm:$0xff]  ;;  %v6657_v61 = vld [vmem:[#allocation77_spill] sm:$0xff]  ;;  %v1534_v23 = vpop.permute.xlu0 %1533 }
 0x1b3   : > { %v5395_v1 = vadd.f32 %v1491_v44, %v1359_v58  ;;  %v1530_v21 = vsel %vm236_vm4, 0.0, %v1528_v24  ;;  %v5403_v59 = vmul.f32 %v5384_v16, %v6651_v54  ;;  %v1385_v30 = vrot.slane %v5026_v42, 6 }
 0x1b4   : > { %6648 = vst [vmem:[#allocation108_spill] sm:$0xff] %v5391_v19  ;;  %v1599_v56 = vmul.f32 %v5359_v63, %v1555_v52  ;;  %v1386_v9 = vrot.slane %v5032_v48, 6  ;;  %v1393_v12 = vrot.slane %v6653_v41, 6  ;;  %v1394_v36 = vrot.slane %v6654_v8, 6  ;;  %v6664_v19 = vld [vmem:[#allocation12_spill] sm:$0xff] }
 0x1b5   : > { %6649 = vst [vmem:[#allocation42_spill] sm:$0xff] %v5393_v26  ;;  %v1401_v44 = vrot.slane %v5097_v33, 6  ;;  %v1402_v49 = vrot.slane %v4889_v0, 6  ;;  %v1646_v50 = vrot.slane %v6628_v37, 2  ;;  %v1647_v18 = vrot.slane %v6656_v32, 2 }
 0x1b6   : > { %6650 = vst [vmem:[#allocation109_spill] sm:$0xff] %v5395_v1  ;;  %v5413_v5 = vadd.f32 %v6655_v4, %v1599_v56  ;;  %v1387_v45 = vsel %vm232_vm10, %v1385_v30, %v1386_v9  ;;  %v1395_v24 = vsel %vm232_vm10, %v1393_v12, %v1394_v36  ;;  %v1654_v27 = vrot.slane %v6630_v40, 2 }
 0x1b7   : > { %6652 = vst [vmem:[#allocation18_spill] sm:$0xff] %v5403_v59  ;;  %v1403_v31 = vsel %vm232_vm10, %v1401_v44, %v1402_v49  ;;  %v1655_v22 = vrot.slane %v6631_v17, 2  ;;  %2449 = vrsqrt.f32 %v5387_v2  ;;  %v1556_v13 = vmul.f32 %v6647_v43, %v1530_v21 }
 0x1b8   : > { %v5429_v20 = vmul.f32 %v5240_v39, %v6657_v61  ;;  %v1649_v25 = vsel %vm1639_vm2, %v1647_v18, %v1646_v50  ;;  %v5434_v58 = vmul.f32 %v5403_v59, %v1837_v53  ;;  %v5441_v21 = vadd.f32 1e-09, %v1432_v11  ;;  %v6660_v59 = vld [vmem:[#allocation35_spill] sm:$0xff] }
 0x1b9   : > { %v1651_v52 = vsub.f32 %v6656_v32, %v1649_v25  ;;  %v1657_v56 = vsel %vm1639_vm2, %v1655_v22, %v1654_v27  ;;  %v1390_v4 = vsub.f32 %v5032_v48, %v1387_v45  ;;  %v1398_v61 = vsub.f32 %v6654_v8, %v1395_v24 }
 0x1ba   : > { %6658 = vst [vmem:[#allocation48_spill] sm:$0xff] %v5434_v58  ;;  %v1406_v47 = vsub.f32 %v4889_v0, %v1403_v31  ;;  %v1659_v54 = vsub.f32 %v6631_v17, %v1657_v56  ;;  %2451 = vrsqrt.f32 %v5441_v21  ;;  %v1536_v32 = vsub.f32 %v6654_v8, %v1534_v23  ;;  %v6661_v31 = vld [vmem:[#allocation82_spill] sm:$0xff] }
 0x1bb   : > { %v1653_v53 = vsel %vm235_vm3, 0.0, %v1651_v52  ;;  %v5452_v25 = vstv %s5399_s23  ;;  %v1388_v17 = vsel %vm232_vm10, %v1386_v9, %v1385_v30  ;;  %v5469_v23 = vmul.f32 %v5240_v39, %v6661_v31 }
 0x1bc   : > { %v1661_v11 = vsel %vm235_vm3, 0.0, %v1659_v54  ;;  %v5458_v45 = vmul.f32 %v5452_v25, %v6660_v59  ;;  %v5461_v0 = vmul.f32 %v5452_v25, %v1653_v53  ;;  %v1538_v24 = vsel %vm236_vm4, 0.0, %v1536_v32 }
 0x1bd   : > { %v5472_v52 = vmul.f32 %v5452_v25, %v1661_v11  ;;  %v1396_v54 = vsel %vm232_vm10, %v1394_v36, %v1393_v12  ;;  %v5476_v59 = vpop.eup %2449  ;;  %v1558_v56 = vmul.f32 %v6647_v43, %v1538_v24  ;;  %v1389_v39 = vsub.f32 %v5026_v42, %v1388_v17 }
 0x1be   : > { %v1701_v30 = vmul.f32 %v5458_v45, %v5458_v45  ;;  %v1703_v9 = vmul.f32 %v5461_v0, %v5461_v0  ;;  %v1600_v53 = vmul.f32 %v5429_v20, %v1556_v13  ;;  %v5486_v32 = vmul.f32 %v5260_v35, %v1390_v4 }
 0x1bf   : > { %v5489_v12 = vmul.f32 %v5260_v35, %v1398_v61  ;;  %v1707_v36 = vmul.f32 %v5472_v52, %v5472_v52  ;;  %v1602_v11 = vmul.f32 %v5469_v23, %v1558_v56  ;;  %v1397_v31 = vsub.f32 %v6653_v41, %v1396_v54  ;;  %v6662_v61 = vld [vmem:[#allocation13_spill] sm:$0xff] }
 0x1c0   : > { %v1705_v24 = vadd.f32 %v1703_v9, %v1701_v30  ;;  %v1404_v58 = vsel %vm232_vm10, %v1402_v49, %v1401_v44  ;;  %v2452_v17 = vpop.eup %2451  ;;  %v5498_v13 = vmul.f32 %v5260_v35, %v1406_v47  ;;  %vm1451_vm7 = vweird.f32 %v5441_v21 }
 0x1c1   : > { %v5502_v4 = vstv %s5439_s5  ;;  %v6663_v26 = vrot.slane %v6662_v61, 2  ;;  %v6665_v1 = vrot.slane %v6664_v19, 2  ;;  %v1446_v41 = vmul.f32 %v2452_v17, %v5441_v21  ;;  %v6666_v61 = vld [vmem:[#allocation79_spill] sm:$0xff] }
 0x1c2   : > { %v1604_v54 = vadd.f32 %v1602_v11, %v1600_v53  ;;  %v1709_v30 = vadd.f32 %v1707_v36, %v1705_v24  ;;  %v1391_v44 = vsel %vm232_vm10, 0.0, %v1389_v39  ;;  %v5515_v47 = vmul.f32 %v5458_v45, %v5502_v4  ;;  %v1540_v36 = vpop.permute.xlu1 %1539 }
 0x1c3   : > { %v1640_v56 = vsel %vm1639_vm2, %v6665_v1, %v6663_v26  ;;  %v1405_v49 = vsub.f32 %v5097_v33, %v1404_v58  ;;  %v1648_v9 = vsel %vm1639_vm2, %v1646_v50, %v1647_v18  ;;  %v1656_v19 = vsel %vm1639_vm2, %v1654_v27, %v1655_v22 }
 0x1c4   : > { %v1447_v26 = vmul.f32 %v2452_v17, %v1446_v41  ;;  %v1608_v1 = vadd.f32 %v5371_v28, %v1604_v54  ;;  %v1399_v53 = vsel %vm232_vm10, 0.0, %v1397_v31  ;;  %v1642_v39 = vsub.f32 %v6626_v10, %v1640_v56 }
 0x1c5   : > { %vm1452_vm9 = vweird.f32 %v2452_v17  ;;  %v5528_v11 = vmul.f32 %v5461_v0, %v5502_v4  ;;  %v5532_v50 = vmul.f32 %v5472_v52, %v5502_v4  ;;  %v1650_v18 = vsub.f32 %v6628_v37, %v1648_v9 }
 0x1c6   : > { %v1448_v27 = vmul.f32 0.5, %v1447_v26  ;;  %v1610_v28 = vmul.f32 %v1608_v1, %v6618_v34  ;;  %v1658_v22 = vsub.f32 %v6630_v40, %v1656_v19  ;;  %v1436_v10 = vmul.f32 %v5476_v59, %v5387_v2  ;;  %vm1453_vm11 = vmor %vm1451_vm7, %vm1452_vm9 }
 0x1c7   : > { %v5539_v58 = vadd.f32 1e-09, %v1709_v30  ;;  %v1407_v24 = vsel %vm232_vm10, 0.0, %v1405_v49  ;;  %v1543_v31 = vsub.f32 %v5097_v33, %v1540_v36  ;;  %v5546_v56 = vmul.f32 %v5108_v3, %v6666_v61  ;;  %v6669_v61 = vld [vmem:[#allocation92_spill] sm:$0xff] }
 0x1c8   : > { %v1449_v37 = vsub.f32 1.5, %v1448_v27  ;;  %v1417_v41 = vmul.f32 %v5260_v35, %v1391_v44  ;;  %v1437_v54 = vmul.f32 %v5476_v59, %v1436_v10  ;;  %v5551_v40 = vmul.f32 %v5452_v25, %v1642_v39  ;;  %v1801_v44 = vpop.permute.xlu0 %1800 }
 0x1c9   : > { %v1419_v30 = vmul.f32 %v5260_v35, %v1399_v53  ;;  %vm1441_vm10 = vweird.f32 %v5387_v2  ;;  %v1545_v3 = vsel %vm236_vm4, 0.0, %v1543_v31  ;;  %v5561_v49 = vmul.f32 %v5452_v25, %v1650_v18 }
 0x1ca   : > { %v1450_v9 = vmul.f32 %v2452_v17, %v1449_v37  ;;  %v1612_v19 = vadd.f32 %v1610_v28, %v6621_v46  ;;  %vm1442_vm13 = vweird.f32 %v5476_v59  ;;  %v5566_v26 = vmul.f32 %v5452_v25, %v1658_v22  ;;  %v6667_v28 = vld [vmem:[#allocation67_spill] sm:$0xff]  ;;  %v6668_v22 = vld [vmem:[#allocation17_spill] sm:$0xff] }
 0x1cb   : > { %v1438_v21 = vmul.f32 0.5, %v1437_v54  ;;  %v1559_v1 = vmul.f32 %v6647_v43, %v1545_v3  ;;  %v1700_v53 = vmul.f32 %v5551_v40, %v5551_v40  ;;  %v1702_v39 = vmul.f32 %v5561_v49, %v5561_v49  ;;  %vm1443_vm4 = vmor %vm1441_vm10, %vm1442_vm13  ;;  %v1803_v3 = vpop.permute.xlu1 %1802 }
 0x1cc   : > { %v1454_v36 = vsel %vm1453_vm11, %v2452_v17, %v1450_v9  ;;  %2453 = vrsqrt.f32 %v5539_v58  ;;  %v1421_v18 = vmul.f32 %v5260_v35, %v1407_v24  ;;  %v1804_v27 = vsub.f32 %v5026_v42, %v1801_v44 }
 0x1cd   : > { %v1456_v10 = vmul.f32 %v1454_v36, %v6667_v28  ;;  %v1458_v31 = vmul.f32 %v1454_v36, %v6668_v22  ;;  %v1460_v37 = vmul.f32 %v1454_v36, %v6669_v61  ;;  %v1439_v43 = vsub.f32 1.5, %v1438_v21 }
 0x1ce   : > { %v5580_v54 = vmul.f32 %v1612_v19, %v5429_v20  ;;  %v1605_v17 = vmul.f32 %v5546_v56, %v1559_v1  ;;  %v1704_v35 = vadd.f32 %v1702_v39, %v1700_v53  ;;  %v1706_v24 = vmul.f32 %v5566_v26, %v5566_v26 }
 0x1cf   : > { %v1462_v44 = vmul.f32 %v1456_v10, %v5486_v32  ;;  %v1464_v9 = vmul.f32 %v1458_v31, %v5489_v12  ;;  %v1468_v21 = vmul.f32 %v1460_v37, %v5498_v13  ;;  %v1440_v20 = vmul.f32 %v5476_v59, %v1439_v43 }
 0x1d0   : > { %v5594_v36 = vmul.f32 %v1612_v19, %v5469_v23  ;;  %v5597_v2 = vmul.f32 %v1612_v19, %v5273_v60  ;;  %v1607_v1 = vadd.f32 %v1605_v17, %v5413_v5  ;;  %v5602_v53 = vmul.f32 %v5551_v40, %v5502_v4 }
 0x1d1   : > { %v1466_v39 = vadd.f32 %v1464_v9, %v1462_v44  ;;  %v1444_v32 = vsel %vm1443_vm4, %v5476_v59, %v1440_v20  ;;  %v5607_v12 = vmul.f32 %v5561_v49, %v5502_v4  ;;  %v1805_v13 = vsub.f32 %v5032_v48, %v1803_v3 }
 0x1d2   : > { %v5610_v23 = vpop.eup %2453  ;;  %v1455_v60 = vmul.f32 %v1444_v32, %v5318_v55  ;;  %v1457_v19 = vmul.f32 %v1444_v32, %v5324_v15  ;;  %v1459_v5 = vmul.f32 %v1444_v32, %v5327_v51  ;;  %v1609_v28 = vmul.f32 %v1607_v1, %v6618_v34 }
 0x1d3   : > { %v1470_v22 = vadd.f32 %v1468_v21, %v1466_v39  ;;  %v1708_v61 = vadd.f32 %v1706_v24, %v1704_v35  ;;  %v1806_v59 = vsel %vm237_vm8, 0.0, %v1804_v27  ;;  %v1807_v43 = vsel %vm237_vm8, 0.0, %v1805_v13  ;;  %v6670_v24 = vld [vmem:[#allocation57_spill] sm:$0xff] }
 0x1d4   : > { %v1461_v48 = vmul.f32 %v1455_v60, %v1417_v41  ;;  %v1463_v17 = vmul.f32 %v1457_v19, %v1419_v30  ;;  %v1467_v3 = vmul.f32 %v1459_v5, %v1421_v18  ;;  %v1611_v55 = vadd.f32 %v1609_v28, %v6621_v46  ;;  %v6671_v41 = vld [vmem:[#allocation61_spill] sm:$0xff]  ;;  %v6672_v28 = vld [vmem:[#allocation38_spill] sm:$0xff] }
 0x1d5   : > { %v1472_v15 = vmul.f32 %v1470_v22, %v6618_v34  ;;  %v5624_v51 = vmul.f32 %v5566_v26, %v5502_v4  ;;  %v1833_v35 = vmul.f32 %v6645_v14, %v1807_v43  ;;  %v5629_v27 = vmul.f32 %v5384_v16, %v6670_v24  ;;  %v5639_v4 = vld [vmem:[%s2746_s28 + $0x40] sm:$0xff] }
 0x1d6   : > { %v1465_v44 = vadd.f32 %v1463_v17, %v1461_v48  ;;  %v1617_v9 = vmul.f32 %v1611_v55, %v5359_v63  ;;  %v1625_v30 = vmul.f32 %v1611_v55, %v6671_v41  ;;  %v1633_v18 = vmul.f32 %v1611_v55, %v5546_v56  ;;  %v1811_v17 = vpop.permute.xlu0 %1810  ;;  %v6673_v55 = vld [vmem:[#allocation36_spill] sm:$0xff]  ;;  %v6680_v41 = vld [vmem:[#allocation109_spill] sm:$0xff] }
 0x1d7   : > { %v1474_v21 = vadd.f32 %v1472_v15, %v6621_v46  ;;  %v5636_v20 = vmul.f32 %v6645_v14, %v1806_v59  ;;  %v6286_v1 = vrot.slane %v5639_v4, 2  ;;  %v6287_v39 = vrot.slane %v6654_v8, 2 }
 0x1d8   : > { %v1469_v32 = vadd.f32 %v1467_v3, %v1465_v44  ;;  %v5643_v13 = vadd.f32 1e-09, %v1708_v61  ;;  %v5647_v63 = vmul.f32 %v5379_v7, %v6672_v28  ;;  %v5650_v56 = vmul.f32 %v5629_v27, %v1833_v35 }
 0x1d9   : > { %v1480_v22 = vmul.f32 %v1474_v21, %v1456_v10  ;;  %v1488_v43 = vmul.f32 %v1474_v21, %v1458_v31  ;;  %v1496_v59 = vmul.f32 %v1474_v21, %v1460_v37  ;;  %v1673_v48 = vsel %vm1639_vm2, %v6287_v39, %v6286_v1  ;;  %v6676_v39 = vld [vmem:[#allocation93_spill] sm:$0xff] }
 0x1da   : > { %v1471_v61 = vmul.f32 %v1469_v32, %v6618_v34  ;;  %v1675_v3 = vsub.f32 %v6654_v8, %v1673_v48  ;;  %v1695_v15 = vmul.f32 %v5452_v25, %v6673_v55  ;;  %v1723_v10 = vmul.f32 %v5610_v23, %v5539_v58  ;;  %v6675_v55 = vld [vmem:[#allocation96_spill] sm:$0xff] }
 0x1db   : > { %v1482_v31 = vadd.f32 %v1480_v22, %v5345_v6  ;;  %v1490_v37 = vadd.f32 %v1488_v43, %v5347_v62  ;;  %v1498_v35 = vadd.f32 %v1496_v59, %v5349_v29  ;;  %vm1728_vm14 = vweird.f32 %v5539_v58  ;;  %v6677_v6 = vld [vmem:[#allocation73_spill] sm:$0xff]  ;;  %v6686_v58 = vld [vmem:[#allocation95_spill] sm:$0xff] }
 0x1dc   : > { %v1473_v44 = vadd.f32 %v1471_v61, %v6621_v46  ;;  %v1677_v21 = vsel %vm235_vm3, 0.0, %v1675_v3  ;;  %v1724_v32 = vmul.f32 %v5610_v23, %v1723_v10  ;;  %v1813_v48 = vsub.f32 %v6654_v8, %v1811_v17 }
 0x1dd   : > { %v1616_v1 = vadd.f32 %v6675_v55, %v1482_v31  ;;  %v1624_v28 = vadd.f32 %v6676_v39, %v1490_v37  ;;  %v1632_v22 = vadd.f32 %v6677_v6, %v1498_v35  ;;  %vm1729_vm12 = vweird.f32 %v5610_v23  ;;  %v6678_v39 = vld [vmem:[#allocation108_spill] sm:$0xff]  ;;  %v6679_v37 = vld [vmem:[#allocation42_spill] sm:$0xff]  ;;  %v6684_v55 = vld [vmem:[#allocation37_spill] sm:$0xff] }
 0x1de   : > { %v1479_v62 = vmul.f32 %v1473_v44, %v1455_v60  ;;  %v1487_v29 = vmul.f32 %v1473_v44, %v1457_v19  ;;  %v1495_v43 = vmul.f32 %v1473_v44, %v1459_v5  ;;  %v1725_v59 = vmul.f32 0.5, %v1724_v32  ;;  %vm1730_vm3 = vmor %vm1728_vm14, %vm1729_vm12  ;;  %v6682_v44 = vld [vmem:[#allocation43_spill] sm:$0xff]  ;;  %v6683_v32 = vld [vmem:[#allocation45_spill] sm:$0xff] }
 0x1df   : > { %v1620_v61 = vadd.f32 %v5580_v54, %v1616_v1  ;;  %v1628_v3 = vadd.f32 %v5594_v36, %v1624_v28  ;;  %v1636_v10 = vadd.f32 %v5597_v2, %v1632_v22  ;;  %v1815_v17 = vsel %vm237_vm8, 0.0, %v1813_v48  ;;  %v6681_v1 = vld [vmem:[#allocation87_spill] sm:$0xff]  ;;  %v6685_v22 = vld [vmem:[#allocation56_spill] sm:$0xff] }
 0x1e0   : > { %v1481_v31 = vadd.f32 %v1479_v62, %v6678_v39  ;;  %v1489_v35 = vadd.f32 %v1487_v29, %v6679_v37  ;;  %v1497_v60 = vadd.f32 %v1495_v43, %v6680_v41  ;;  %v1726_v19 = vsub.f32 1.5, %v1725_v59  ;;  %v6687_v29 = vld [vmem:[#allocation97_spill] sm:$0xff]  ;;  %v6689_v59 = vld [vmem:[#allocation80_spill] sm:$0xff] }
 0x1e1   : > { %v5690_v54 = vadd.f32 %v5515_v47, %v1620_v61  ;;  %v5693_v36 = vadd.f32 %v5528_v11, %v1628_v3  ;;  %v5696_v2 = vadd.f32 %v5532_v50, %v1636_v10  ;;  %v1835_v5 = vmul.f32 %v6645_v14, %v1815_v17 }
 0x1e2   : > { %v1615_v28 = vadd.f32 %v6681_v1, %v1481_v31  ;;  %v1623_v47 = vadd.f32 %v6682_v44, %v1489_v35  ;;  %v1631_v48 = vadd.f32 %v6683_v32, %v1497_v60  ;;  %v1727_v11 = vmul.f32 %v5610_v23, %v1726_v19  ;;  %v6691_v19 = vld [vmem:[#allocation48_spill] sm:$0xff]  ;;  %v6693_v44 = vld [vmem:[#allocation65_spill] sm:$0xff] }
 0x1e3   : > { %v1697_v50 = vmul.f32 %v5452_v25, %v1677_v21  ;;  %v1699_v6 = vmul.f32 %v5452_v25, %v6684_v55  ;;  %v1873_v62 = vmul.f32 %v5384_v16, %v6685_v22  ;;  %v6688_v43 = vsub.f32 %v6686_v58, %v6687_v29  ;;  %v5747_v1 = vld [vmem:[%s2746_s28 + $0x8] sm:$0xff]  ;;  %v6694_v55 = vld [vmem:[#allocation107_spill] sm:$0xff] }
 0x1e4   : > { %v1619_v3 = vadd.f32 %v1617_v9, %v1615_v28  ;;  %v1627_v10 = vadd.f32 %v1625_v30, %v1623_v47  ;;  %v1635_v17 = vadd.f32 %v1633_v18, %v1631_v48  ;;  %v1731_v39 = vsel %vm1730_vm3, %v5610_v23, %v1727_v11  ;;  %v6690_v18 = vld [vmem:[#allocation16_spill] sm:$0xff]  ;;  %v5760_v48 = vld [vmem:[%s2746_s28 + $0x18] sm:$0xff] }
 0x1e5   : > { %v5718_v61 = vadd.f32 %v6689_v59, %v6688_v43  ;;  %v1733_v21 = vmul.f32 %v1731_v39, %v5458_v45  ;;  %v1735_v31 = vmul.f32 %v1731_v39, %v5461_v0  ;;  %v1737_v37 = vmul.f32 %v1731_v39, %v5472_v52  ;;  %v5766_v11 = vld [vmem:[%s2746_s28 + $0x28] sm:$0xff] }
 0x1e6   : > { %v1879_v16 = vmul.f32 %v1873_v62, %v1835_v5  ;;  %2455 = vrsqrt.f32 %v5643_v13  ;;  %v5726_v35 = vadd.f32 %v5602_v53, %v1619_v3  ;;  %v5729_v9 = vadd.f32 %v5607_v12, %v1627_v10 }
 0x1e7   : > { %v5732_v23 = vadd.f32 %v5624_v51, %v1635_v17  ;;  %v1739_v45 = vmul.f32 %v1733_v21, %v1695_v15  ;;  %v1741_v0 = vmul.f32 %v1735_v31, %v1697_v50  ;;  %v1745_v52 = vmul.f32 %v1737_v37, %v1699_v6  ;;  %v6695_v17 = vld [vmem:[#allocation20_spill] sm:$0xff] }
 0x1e8   : > { %v1881_v30 = vadd.f32 %v1879_v16, %v5650_v56  ;;  %v5739_v53 = vmul.f32 %v5379_v7, %v6690_v18  ;;  %v1876_v12 = vmul.f32 %v5647_v63, %v5636_v20  ;;  %v6289_v41 = vstv %s5680_s8  ;;  %v6692_v56 = vld [vmem:[#allocation39_spill] sm:$0xff] }
 0x1e9   : > { %v2047_v51 = vstv %s5687_s14  ;;  %v1743_v60 = vadd.f32 %v1741_v0, %v1739_v45  ;;  %v5752_v15 = vsub.f32 %v5747_v1, %v6289_v41  ;;  %v6288_v28 = vstv %s5698_s16  ;;  %v6697_v16 = vld [vmem:[#allocation19_spill] sm:$0xff]  ;;  %v5807_v41 = vld [vmem:[%s2746_s28 + $0x10] sm:$0xff]  ;;  %s2562_s14 = scalar_lea.hbm %s6061_s2, 192 }
 0x1ea   : > { %v1885_v5 = vadd.f32 %v6691_v19, %v1881_v30  ;;  %v1907_v47 = vmul.f32 %v6693_v44, %v6692_v56  ;;  %v1891_v32 = vmul.f32 %v6670_v24, %v6692_v56  ;;  %v5763_v20 = vsub.f32 %v5760_v48, %v2047_v51  ;;  %v6700_v19 = vld [vmem:[#allocation91_spill] sm:$0xff] }
 0x1eb   : > { %v5771_v50 = vsub.f32 %v5766_v11, %v6288_v28  ;;  %v1878_v6 = vmul.f32 %v5739_v53, %v6694_v55  ;;  %v1747_v58 = vadd.f32 %v1745_v52, %v1743_v60  ;;  %v2054_v29 = vmul.f32 %v5752_v15, %v5752_v15  ;;  %v6702_v44 = vld [vmem:[#allocation71_spill] sm:$0xff] }
 0x1ec   : > { %v1887_v24 = vmul.f32 %v1885_v5, %v6618_v34  ;;  %v5778_v43 = vpop.eup %2455  ;;  %v1899_v59 = vmul.f32 %v6685_v22, %v6692_v56  ;;  %v2056_v3 = vmul.f32 %v5763_v20, %v5763_v20  ;;  %v6696_v39 = vrot.slane %v6695_v17, 2  ;;  %v6699_v22 = vld [vmem:[#allocation100_spill] sm:$0xff]  ;;  %v1817_v17 = vpop.permute.xlu1 %1816 }
 0x1ed   : > { %v2060_v10 = vmul.f32 %v5771_v50, %v5771_v50  ;;  %v6698_v45 = vrot.slane %v6697_v16, 2  ;;  %v5792_v52 = vadd.f32 %v1878_v6, %v1876_v12  ;;  %v1749_v30 = vmul.f32 %v1747_v58, %v6618_v34 }
 0x1ee   : > { %v1889_v60 = vadd.f32 %v1887_v24, %v6621_v46  ;;  %v6701_v5 = vsub.f32 %v6699_v22, %v6700_v19  ;;  %v5803_v28 = vstv %s4616_s25  ;;  %v5810_v16 = vsub.f32 %v5807_v41, %v2047_v51  ;;  %v6705_v22 = vld [vmem:[#allocation25_spill] sm:$0xff]  ;;  %s5895_s25 = sld [smem:[#allocation2 + $0x20]] }
 0x1ef   : > { %v1664_v0 = vsel %vm1639_vm2, %v6698_v45, %v6696_v39  ;;  %v2058_v12 = vadd.f32 %v2056_v3, %v2054_v29  ;;  %v1751_v6 = vadd.f32 %v1749_v30, %v6621_v46  ;;  %v6703_v24 = vrot.slane %v6654_v8, 2 }
 0x1f0   : > { %v5800_v55 = vadd.f32 %v6702_v44, %v6701_v5  ;;  %v1666_v58 = vsub.f32 %v5026_v42, %v1664_v0  ;;  %v6704_v39 = vrot.slane %v5639_v4, 2  ;;  %v6706_v19 = vrot.slane %v6705_v22, 2  ;;  %v6707_v5 = vld [vmem:[#allocation24_spill] sm:$0xff] }
 0x1f1   : > { %v6708_v44 = vrot.slane %v6707_v5, 2  ;;  %v1895_v29 = vmul.f32 %v1889_v60, %v5629_v27  ;;  %v1903_v42 = vmul.f32 %v1889_v60, %v1873_v62  ;;  %v2062_v3 = vadd.f32 %v2060_v10, %v2058_v12 }
 0x1f2   : > { %v1672_v45 = vsel %vm1639_vm2, %v6704_v39, %v6703_v24  ;;  %v1713_v8 = vmul.f32 %v5778_v43, %v5643_v13  ;;  %v1757_v0 = vmul.f32 %v1751_v6, %v1733_v21  ;;  %v1765_v30 = vmul.f32 %v1751_v6, %v1735_v31  ;;  %v6709_v24 = vld [vmem:[#allocation18_spill] sm:$0xff] }
 0x1f3   : > { %v1680_v51 = vsel %vm1639_vm2, %v6708_v44, %v6706_v19  ;;  %v1911_v39 = vmul.f32 %v1889_v60, %v6709_v24  ;;  %v1773_v22 = vmul.f32 %v1751_v6, %v1737_v37  ;;  %v5834_v5 = vadd.f32 1e-10, %v2062_v3  ;;  %v6710_v60 = vld [vmem:[#allocation33_spill] sm:$0xff] }
 0x1f4   : > { %v1714_v57 = vmul.f32 %v5778_v43, %v1713_v8  ;;  %vm1718_vm2 = vweird.f32 %v5643_v13  ;;  %v1820_v27 = vsub.f32 %v5097_v33, %v1817_v17  ;;  %v1759_v62 = vadd.f32 %v1757_v0, %v5690_v54  ;;  %v6711_v19 = vld [vmem:[#allocation53_spill] sm:$0xff]  ;;  %s216_s26 = smul.f32 %s5895_s25, %s5895_s25 }
 0x1f5   : > { %v1767_v10 = vadd.f32 %v1765_v30, %v5693_v36  ;;  %vm1719_vm15 = vweird.f32 %v5778_v43  ;;  %v1775_v21 = vadd.f32 %v1773_v22, %v5696_v2  ;;  %2457 = vrsqrt.f32 %v5834_v5  ;;  %v6713_v22 = vld [vmem:[#allocation11_spill] sm:$0xff] }
 0x1f6   : > { %v1715_v31 = vmul.f32 0.5, %v1714_v57  ;;  %v1822_v37 = vsel %vm237_vm8, 0.0, %v1820_v27  ;;  %v5848_v12 = vmul.f32 %v5379_v7, %v6710_v60  ;;  %v1893_v17 = vadd.f32 %v1891_v32, %v1759_v62  ;;  %vm1720_vm8 = vmor %vm1718_vm2, %vm1719_vm15  ;;  %v6714_v27 = vld [vmem:[#allocation63_spill] sm:$0xff] }
 0x1f7   : > { %v1901_v54 = vadd.f32 %v1899_v59, %v1767_v10  ;;  %v1836_v36 = vmul.f32 %v6645_v14, %v1822_v37  ;;  %v1909_v6 = vadd.f32 %v1907_v47, %v1775_v21  ;;  %v2019_v2 = vmul.f32 %v5718_v61, %v6711_v19 }
 0x1f8   : > { %v1674_v38 = vsub.f32 %v5639_v4, %v1672_v45  ;;  %v1682_v44 = vsub.f32 %v5097_v33, %v1680_v51  ;;  %v1716_v3 = vsub.f32 1.5, %v1715_v31  ;;  %v1897_v7 = vadd.f32 %v1895_v29, %v1893_v17 }
 0x1f9   : > { %v1905_v8 = vadd.f32 %v1903_v42, %v1901_v54  ;;  %v1882_v14 = vmul.f32 %v5848_v12, %v1836_v36  ;;  %v1913_v47 = vadd.f32 %v1911_v39, %v1909_v6  ;;  %v2055_v32 = vmul.f32 %v5810_v16, %v5810_v16 }
 0x1fa   : > { %v1717_v61 = vmul.f32 %v5778_v43, %v1716_v3  ;;  %v1914_v59 = vstv %s5826_s19  ;;  %v1924_v45 = vstv %s5829_s24  ;;  %v6712_v0 = vstv %s5734_s17 }
 0x1fb   : > { %v1921_v33 = vadd.f32 %v6712_v0, %v1905_v8  ;;  %v1694_v51 = vmul.f32 %v5452_v25, %v1666_v58  ;;  %v1916_v29 = vadd.f32 %v1914_v59, %v1897_v7  ;;  %v1926_v13 = vadd.f32 %v1924_v45, %v1913_v47  ;;  %v2458_v42 = vpop.eup %2457  ;;  %v5898_v8 = vld [vmem:[%s2746_s28 + $0x20] sm:$0xff]  ;;  %v2492_v47 = vld [vmem:[%s2746_s28 + $0x48] sm:$0xff] }
 0x1fc   : > { %v1696_v30 = vmul.f32 %v5452_v25, %v1674_v38  ;;  %v1698_v24 = vmul.f32 %v5452_v25, %v1682_v44  ;;  %v1721_v39 = vsel %vm1720_vm8, %v5778_v43, %v1717_v61  ;;  %v2029_v57 = vmul.f32 %v6713_v22, %v6711_v19  ;;  %v5885_v43 = vld [vmem:[%s2746_s28] sm:$0xff]  ;;  %v6716_v38 = vld [vmem:[#allocation46_spill] sm:$0xff] }
 0x1fd   : > { %v1923_v62 = vmul.f32 %v1921_v33, %v6714_v27  ;;  %v2076_v10 = vmul.f32 %v2458_v42, %v5834_v5  ;;  %v1732_v58 = vmul.f32 %v1721_v39, %v5551_v40  ;;  %v1884_v21 = vadd.f32 %v1882_v14, %v5792_v52 }
 0x1fe   : > { %v1734_v31 = vmul.f32 %v1721_v39, %v5561_v49  ;;  %v1736_v37 = vmul.f32 %v1721_v39, %v5566_v26  ;;  %v1918_v25 = vmul.f32 %v1916_v29, %v6714_v27  ;;  %v6715_v17 = vstv %s5680_s8  ;;  %v2493_v29 = vld [vmem:[%s2746_s28 + $0x38] sm:$0xff] }
 0x1ff   : > { %v5890_v54 = vsub.f32 %v5885_v43, %v6715_v17  ;;  %v2021_v36 = vadd.f32 %v2019_v2, %v1923_v62  ;;  %v2077_v6 = vmul.f32 %v2458_v42, %v2076_v10  ;;  %v1738_v40 = vmul.f32 %v1732_v58, %v1694_v51 }
 0x200   : > { %v1928_v52 = vmul.f32 %v1926_v13, %v6714_v27  ;;  %vm2081_vm0 = vweird.f32 %v5834_v5  ;;  %v1740_v49 = vmul.f32 %v1734_v31, %v1696_v30  ;;  %v1744_v26 = vmul.f32 %v1736_v37, %v1698_v24 }
 0x201   : > { %v2011_v44 = vadd.f32 %v6716_v38, %v1918_v25  ;;  %v2078_v3 = vmul.f32 0.5, %v2077_v6  ;;  %vm2082_vm1 = vweird.f32 %v2458_v42  ;;  %v6717_v2 = vstv %s5698_s16 }
 0x202   : > { %v2031_v7 = vadd.f32 %v2029_v57, %v1928_v52  ;;  %v5903_v14 = vsub.f32 %v5898_v8, %v6717_v2  ;;  %v2037_v61 = vmul.f32 %v2492_v47, %v5803_v28  ;;  %v1742_v0 = vadd.f32 %v1740_v49, %v1738_v40  ;;  %vm2083_vm5 = vmor %vm2081_vm0, %vm2082_vm1  ;;  %v2494_v57 = vld [vmem:[%s2746_s28 + $0x58] sm:$0xff] }
 0x203   : > { %v2079_v33 = vsub.f32 1.5, %v2078_v3  ;;  %v1886_v51 = vmul.f32 %v1884_v21, %v6618_v34  ;;  %v2033_v13 = vmul.f32 %v2493_v29, %v5803_v28  ;;  %v2053_v30 = vmul.f32 %v5890_v54, %v5890_v54  ;;  %v6719_v29 = vld [vmem:[#allocation84_spill] sm:$0xff] }
 0x204   : > { %v1746_v24 = vadd.f32 %v1744_v26, %v1742_v0  ;;  %v2059_v39 = vmul.f32 %v5903_v14, %v5903_v14  ;;  %v2041_v62 = vmul.f32 %v2494_v57, %v5803_v28  ;;  %v1898_v21 = vmul.f32 %v6690_v18, %v6692_v56  ;;  %v6718_v26 = vld [vmem:[#allocation38_spill] sm:$0xff] }
 0x205   : > { %v2080_v22 = vmul.f32 %v2458_v42, %v2079_v33  ;;  %v2057_v10 = vadd.f32 %v2055_v32, %v2053_v30  ;;  %v5920_v25 = vadd.f32 %v2037_v61, %v2021_v36  ;;  %v1888_v40 = vadd.f32 %v1886_v51, %v6621_v46 }
 0x206   : > { %v1748_v17 = vmul.f32 %v1746_v24, %v6618_v34  ;;  %v5924_v52 = vadd.f32 %v2033_v13, %v2011_v44  ;;  %v1890_v38 = vmul.f32 %v6718_v26, %v6692_v56  ;;  %v1906_v34 = vmul.f32 %v6710_v60, %v6692_v56 }
 0x207   : > { %v2084_v6 = vsel %vm2083_vm5, %v2458_v42, %v2080_v22  ;;  %v2061_v49 = vadd.f32 %v2059_v39, %v2057_v10  ;;  %v5939_v42 = vadd.f32 %v2041_v62, %v2031_v7  ;;  %v1894_v61 = vmul.f32 %v1888_v40, %v5647_v63  ;;  %v6721_v10 = vld [vmem:[#allocation55_spill] sm:$0xff] }
 0x208   : > { %v5929_v3 = vmul.f32 %v2084_v6, %v5752_v15  ;;  %v5932_v32 = vmul.f32 %v2084_v6, %v5763_v20  ;;  %v1750_v18 = vadd.f32 %v1748_v17, %v6621_v46  ;;  %v2090_v44 = vmul.f32 %v2084_v6, %v5771_v50  ;;  %v2495_v6 = vld [vmem:[%s2746_s28 + $0x30] sm:$0xff] }
 0x209   : > { %v5941_v36 = vadd.f32 1e-10, %v2061_v49  ;;  %v1902_v46 = vmul.f32 %v1888_v40, %v5739_v53  ;;  %v1910_v0 = vmul.f32 %v1888_v40, %v5848_v12  ;;  %v2008_v13 = vmul.f32 %v6711_v19, %v6719_v29 }
 0x20a   : > { %v2101_v15 = vmul.f32 %v5932_v32, %v5920_v25  ;;  %v1756_v2 = vmul.f32 %v1750_v18, %v1732_v58  ;;  %v1764_v47 = vmul.f32 %v1750_v18, %v1734_v31  ;;  %v1772_v20 = vmul.f32 %v1750_v18, %v1736_v37 }
 0x20b   : > { %2459 = vrsqrt.f32 %v5941_v36  ;;  %v2099_v56 = vmul.f32 %v5929_v3, %v5924_v52  ;;  %v5955_v58 = vstv %s216_s26  ;;  %v2105_v63 = vmul.f32 %v2090_v44, %v5939_v42 }
 0x20c   : > { %v1758_v60 = vadd.f32 %v1756_v2, %v5726_v35  ;;  %v1766_v7 = vadd.f32 %v1764_v47, %v5729_v9  ;;  %v1774_v50 = vadd.f32 %v1772_v20, %v5732_v23  ;;  %vm2093_vm6 = vcmp.le.f32.partialorder %v5834_v5, %v5955_v58 }
 0x20d   : > { %v2103_v31 = vadd.f32 %v2101_v15, %v2099_v56  ;;  %v2621_v30 = vmov 0.0   ;;  %v6720_v22 = vstv %s5734_s17  ;;  %v2028_v17 = vmul.f32 %v5800_v55, %v6711_v19 }
 0x20e   : > { %v1892_v53 = vadd.f32 %v1890_v38, %v1758_v60  ;;  %v1900_v37 = vadd.f32 %v1898_v21, %v1766_v7  ;;  %v1908_v33 = vadd.f32 %v1906_v34, %v1774_v50  ;;  %v2323_v24 = vsel %vm2093_vm6, 1.0, %v2621_v30 }
 0x20f   : > { %v2107_v35 = vadd.f32 %v2105_v63, %v2103_v31  ;;  %v2018_v21 = vmul.f32 %v6721_v10, %v6711_v19  ;;  %v2032_v40 = vmul.f32 %v2495_v6, %v5803_v28  ;;  %v2036_v18 = vmul.f32 %v5639_v4, %v5803_v28 }
 0x210   : > { %v1896_v9 = vadd.f32 %v1894_v61, %v1892_v53  ;;  %v1904_v23 = vadd.f32 %v1902_v46, %v1900_v37  ;;  %v1912_v51 = vadd.f32 %v1910_v0, %v1908_v33  ;;  %vm2071_vm9 = vweird.f32 %v5941_v36  ;;  %v2496_v61 = vld [vmem:[%s2746_s28 + $0x50] sm:$0xff]  ;;  %s5996_s28 = scalar_lea.vmem [#allocation7], %s2341_s6  ;;  %s2342_s6 = smul.u32 96, %s2660_s13 }
 0x211   : > { %v2460_v12 = vpop.eup %2459  ;;  %vm2109_vm7 = vcmp.lt.f32.partialorder %v2107_v35, 0.0  ;;  %v2040_v46 = vmul.f32 %v2496_v61, %v5803_v28  ;;  %vm2092_vm13 = vcmp.le.f32.partialorder %v5941_v36, %v5955_v58  ;;  %s2182_s13 = sshll.u32 %s5996_s28, 4  ;;  %s2183_s13 = int_to_ptr.vmem [resolvable:$true] %s2182_s13 }
 0x212   : > { %v1915_v39 = vadd.f32 %v1914_v59, %v1896_v9  ;;  %v1920_v57 = vadd.f32 %v6720_v22, %v1904_v23  ;;  %v1925_v62 = vadd.f32 %v1924_v45, %v1912_v51  ;;  %v2066_v5 = vmul.f32 %v2460_v12, %v5941_v36  ;;  %s2181_s27 = scalar_lea.hbm %s6061_s2, %s2342_s6 }
 0x213   : > { %v2325_v49 = vsel %vm2109_vm7, 1.0, %v2621_v30  ;;  %vm2072_vm11 = vweird.f32 %v2460_v12  ;;  %v2322_v22 = vsel %vm2092_vm13, 1.0, %v2621_v30  ;;  %s2184_s3 = sshll.u32 %s2181_s27, 4  ;;  %s2185_s3 = int_to_ptr.hbm [resolvable:$true] %s2184_s3 }
 0x214   : > { %v1917_v59 = vmul.f32 %v1915_v39, %v6714_v27  ;;  %v1922_v26 = vmul.f32 %v1920_v57, %v6714_v27  ;;  %v1927_v45 = vmul.f32 %v1925_v62, %v6714_v27  ;;  %v2067_v38 = vmul.f32 %v2460_v12, %v2066_v5  ;;  %vm2073_vm10 = vmor %vm2071_vm9, %vm2072_vm11  ;;  %s2556_s20 = sshra.s32 %s2185_s3, 4  ;;  %s2557_s20 = int_to_ptr.hbm [resolvable:$true] %s2556_s20 }
 0x215   : > { %v2115_v55 = vmul.f32 %v2325_v49, %v2323_v24  ;;  %s2558_s23 = scalar_lea.hbm %s2557_s20, 96  ;;  %p2563_p0 = scmp.lt.s32.totalorder %s2557_s20, %s6061_s2 }
 0x216   : > { %v2010_v19 = vadd.f32 %v2008_v13, %v1917_v59  ;;  %v2020_v34 = vadd.f32 %v2018_v21, %v1922_v26  ;;  %v2030_v15 = vadd.f32 %v2028_v17, %v1927_v45  ;;  %v2068_v2 = vmul.f32 0.5, %v2067_v38  ;;  %p2559_p4 = scmp.ne.s32.totalorder %s2557_s20, %s2558_s23  ;;  %p2564_p3 = scmp.lt.s32.totalorder %s2562_s14, %s2558_s23 }
 0x217   : > { %v2117_v47 = vmul.f32 %v2115_v55, %v2107_v35  ;;  %v2131_v20 = vmul.f32 0.05, %v2115_v55 }
 0x218   : > { %v2069_v56 = vsub.f32 1.5, %v2068_v2  ;;  %v2034_v50 = vadd.f32 %v2032_v40, %v2010_v19  ;;  %v2038_v0 = vadd.f32 %v2036_v18, %v2020_v34  ;;  %v2042_v35 = vadd.f32 %v2040_v46, %v2030_v15  ;;  %p2560_p6 = pnand %p2559_p4, %p2691_p11  ;;  %p2565_p5 = por %p2564_p3, %p2563_p0 }
 0x219   : > { %v2119_v60 = vmul.f32 %v2117_v47, %v5929_v3  ;;  %v2123_v7 = vmul.f32 %v2117_v47, %v5932_v32  ;;  %v2127_v4 = vmul.f32 %v2117_v47, %v2090_v44  ;;  %v2133_v33 = vsub.f32 1.0, %v2131_v20 }
 0x21a   : > { %v2070_v31 = vmul.f32 %v2460_v12, %v2069_v56  ;;  %p2561_p13 = pneg %p2560_p6 }
 0x21b   : > { %v2121_v63 = vsub.f32 %v5924_v52, %v2119_v60  ;;  %v2125_v53 = vsub.f32 %v5920_v25, %v2123_v7  ;;  %v2129_v37 = vsub.f32 %v5939_v42, %v2127_v4 }
 0x21c   : > { %v2074_v28 = vsel %vm2073_vm10, %v2460_v12, %v2070_v31  ;;  %p2566_p8 = pnand %p2565_p5, %p2561_p13 }
 0x21d   : > { %v2085_v9 = vmul.f32 %v2074_v28, %v5890_v54  ;;  %v2087_v3 = vmul.f32 %v2074_v28, %v5810_v16  ;;  %v2089_v32 = vmul.f32 %v2074_v28, %v5903_v14  ;;  %v2135_v44 = vmul.f32 %v2133_v33, %v2121_v63 }
 0x21e   : > { %v2137_v23 = vmul.f32 %v2133_v33, %v2125_v53  ;;  %v2139_v51 = vmul.f32 %v2133_v33, %v2129_v37 }
 0x21f   : > { %v2098_v29 = vmul.f32 %v2085_v9, %v2034_v50  ;;  %v2100_v13 = vmul.f32 %v2087_v3, %v2038_v0  ;;  %v2141_v52 = vmul.f32 %v2135_v44, %v6714_v27  ;;  %2327 = vst [vmem:[%s5996_s28 + $0x38] sm:$0xff] %v2135_v44  ;;  %v2104_v25 = vmul.f32 %v2089_v32, %v2042_v35 }
 0x220   : > { %v2150_v16 = vmul.f32 %v2137_v23, %v6714_v27  ;;  %2331 = vst [vmem:[%s5996_s28 + $0x48] sm:$0xff] %v2137_v23  ;;  %v2160_v54 = vmul.f32 %v2139_v51, %v6714_v27 }
 0x221   : > { %v2102_v14 = vadd.f32 %v2100_v13, %v2098_v29  ;;  %v2143_v42 = vadd.f32 %v5747_v1, %v2141_v52  ;;  %2335 = vst [vmem:[%s5996_s28 + $0x58] sm:$0xff] %v2139_v51 }
 0x222   : > { %v2152_v12 = vadd.f32 %v5760_v48, %v2150_v16  ;;  %v2162_v24 = vadd.f32 %v5766_v11, %v2160_v54 }
 0x223   : > { %v2106_v39 = vadd.f32 %v2104_v25, %v2102_v14  ;;  %2145 = vst [vmem:[%s5996_s28 + $0x8] sm:$0xff] %v2143_v42 }
 0x224   : > { %2329 = vst [vmem:[%s5996_s28 + $0x18] sm:$0xff] %v2152_v12 }
 0x225   : > { %vm2108_vm4 = vcmp.lt.f32.partialorder %v2106_v39, 0.0  ;;  %2333 = vst [vmem:[%s5996_s28 + $0x28] sm:$0xff] %v2162_v24 }
 0x226   : > { %v2324_v57 = vsel %vm2108_vm4, 1.0, %v2621_v30 }
 0x227   : > { %v2114_v36 = vmul.f32 %v2324_v57, %v2322_v22 }
 0x229   : > { %v2116_v58 = vmul.f32 %v2114_v36, %v2106_v39  ;;  %v2130_v62 = vmul.f32 0.05, %v2114_v36 }
 0x22b   : > { %v2118_v1 = vmul.f32 %v2116_v58, %v2085_v9  ;;  %v2122_v5 = vmul.f32 %v2116_v58, %v2087_v3  ;;  %v2126_v48 = vmul.f32 %v2116_v58, %v2089_v32  ;;  %v2132_v17 = vsub.f32 1.0, %v2130_v62 }
 0x22d   : > { %v2120_v11 = vsub.f32 %v2034_v50, %v2118_v1  ;;  %v2124_v10 = vsub.f32 %v2038_v0, %v2122_v5  ;;  %v2128_v21 = vsub.f32 %v2042_v35, %v2126_v48 }
 0x22f   : > { %v2134_v6 = vmul.f32 %v2132_v17, %v2120_v11  ;;  %v2136_v40 = vmul.f32 %v2132_v17, %v2124_v10  ;;  %v2138_v49 = vmul.f32 %v2132_v17, %v2128_v21 }
 0x231   : > { %v2140_v30 = vmul.f32 %v2134_v6, %v6714_v27  ;;  %2326 = vst [vmem:[%s5996_s28 + $0x30] sm:$0xff] %v2134_v6  ;;  %v2149_v59 = vmul.f32 %v2136_v40, %v6714_v27  ;;  %v2159_v26 = vmul.f32 %v2138_v49, %v6714_v27 }
 0x232   : > { %2330 = vst [vmem:[%s5996_s28 + $0x40] sm:$0xff] %v2136_v40 }
 0x233   : > { %v2142_v45 = vadd.f32 %v5885_v43, %v2140_v30  ;;  %v2151_v38 = vadd.f32 %v5807_v41, %v2149_v59  ;;  %v2161_v18 = vadd.f32 %v5898_v8, %v2159_v26  ;;  %2334 = vst [vmem:[%s5996_s28 + $0x50] sm:$0xff] %v2138_v49 }
 0x235   : > { %2144 = vst [vmem:[%s5996_s28] sm:$0xff] %v2142_v45 }
 0x236   : > { %2328 = vst [vmem:[%s5996_s28 + $0x10] sm:$0xff] %v2151_v38 }
 0x237   : > { %2332 = vst [vmem:[%s5996_s28 + $0x20] sm:$0xff] %v2161_v18 }
 0x238   : > { %2569 = shalt.err (!%p2566_p8)
}
 0x239   : > { %s2622_s4 = smov 128   ;;  %s2623_s19 = smov 8  }
 0x23a   : > { %2349 = dma.vmem_to_hbm [thread:$0]  (%p2691_p11), %s2183_s13, 1536, %s2185_s3, %s2170_s7, %s2622_s4, %s2622_s4, %s2623_s19  }
 0x23b PF: > { %s2199_s24 = sand.u32 1, %s2600_s9   ;;  %p6722_p9 = scmp.ge.s32.totalorder %s2612_s12, 2 }
 0x23c   : > { %s2200_s25 = scalar_lea.sflag [#allocation4], %s2199_s24 }
 0x23d   : > { %p2360_p10 = pnand %p6722_p9, %p2695_p12 }
 0x23f   : > { %p2361_p1 = pneg %p2360_p10 }
 0x241   : > { %2595 = dma.done.wait (%p2361_p1), %s2200_s25, 1536  }
 0x242   : > { %2597 = vsyncadd (%p2361_p1), %s2200_s25, 4294965760  ;;  %p16_p2 = scmp.ge.s32.totalorder %s2664_s15, 4   ;;  %s6723_s9 = smov %s2604_s10 }
 0x243   : > { %s6724_s10 = smov %s2608_s11  ;;  %s6725_s11 = smov %s2676_s18 }
 0x244   : > { %s6726_s12 = smov %s2664_s15  ;;  %18 = sbr.rel (!%p16_p2) target bundleno = 6 (0x6), region = 88 }
 0x249   :  { %2206 = vsyncpa [#allocation3], 1 }
 0x24a   :  { %2208 = vsyncpa [#allocation3 + $0x1], 1 }
 0x24b   :  { %2209 = vsyncpa [#allocation4], 1 }
 0x24c   :  { %2211 = vsyncpa [#allocation4 + $0x1], 1 }
 0x24d   :  { %2212 = vsyncpa [#allocation5], 1 }
 0x24e   :  { %2214 = vsyncpa [#allocation5 + $0x1], 1 }

</bundles_post_ra>
